<compile_context>
chip_gen: v6e
topology: v6e:2x2x1
jax: 0.10.0
libtpu: 0.0.40
codegen_flags: <defaults>
</compile_context>

<pallas_src>
import math
from functools import partial

import jax
import jax.numpy as jnp
from jax.experimental import pallas as pl
from jax.experimental.pallas import tpu as pltpu


# ------------------------- in-kernel helper functions -------------------------

def _layernorm(x, g, b, eps=1e-5):
    mean = jnp.mean(x, axis=-1, keepdims=True)
    var = jnp.mean((x - mean) ** 2, axis=-1, keepdims=True)
    return (x - mean) * jax.lax.rsqrt(var + eps) * g + b


def _gelu(x):
    # TODO(synk): torch nn.GELU() default is the exact erf form; Mosaic has no guaranteed erf
    # lowering, so the tanh approximation is used here (~1e-3-level drift).
    return 0.5 * x * (1.0 + jnp.tanh(0.7978845608028654 * (x + 0.044715 * x * x * x)))


def _softmax_lastdim(s):
    s = s - jnp.max(s, axis=-1, keepdims=True)
    p = jnp.exp(s)
    return p * pl.reciprocal(jnp.sum(p, axis=-1, keepdims=True), approx=True)


def _attend(q, k, v, num_heads):
    """Softmax attention for one batch element (handled by the grid's batch axis).

    q: (Lq, E) f32, k/v: (Lk, E) f32.  The 1/sqrt(Dh) scale is already folded into the
    query projection weights.  Head outputs are collected register-resident and
    concatenated once (no VMEM scratch, no masked partial stores).
    """
    E = q.shape[-1]
    Dh = E // num_heads
    qb = q.astype(jnp.bfloat16)
    kb = k.astype(jnp.bfloat16)
    vb = v.astype(jnp.bfloat16)
    outs = []
    for h in range(num_heads):                           # num_heads is tiny & static
        sl = slice(h * Dh, (h + 1) * Dh)
        s = jax.lax.dot_general(qb[:, sl], kb[:, sl], (((1,), (1,)), ((), ())),
                                preferred_element_type=jnp.float32)     # (Lq, Lk)
        p = _softmax_lastdim(s)
        outs.append(jnp.dot(p.astype(jnp.bfloat16), vb[:, sl],
                            preferred_element_type=jnp.float32))        # (Lq, Dh)
    return jnp.concatenate(outs, axis=-1)                               # (Lq, E)


# ------------------------------ the fused kernel ------------------------------

def _fused_forward_kernel(
        # embed
        x_ref, pe_ref, in_w_ref, in_b_ref,
        # stacked encoder layers (leading layer axis, streamed by BlockSpec)
        e_ln1g_ref, e_ln1b_ref, e_wqkv_ref, e_bqkv_ref, e_wo_ref, e_bo_ref,
        e_ln2g_ref, e_ln2b_ref, e_w1_ref, e_b1_ref, e_w2_ref, e_b2_ref,
        # decoder
        dec_in_ref,
        d_ln1g_ref, d_ln1b_ref, d_sa_wqkv_ref, d_sa_bqkv_ref, d_sa_wo_ref, d_sa_bo_ref,
        d_ln2g_ref, d_ln2b_ref, d_ca_wq_ref, d_ca_bq_ref, d_ca_wkv_ref, d_ca_bkv_ref,
        d_ca_wo_ref, d_ca_bo_ref,
        d_ln3g_ref, d_ln3b_ref, d_w1_ref, d_b1_ref, d_w2_ref, d_b2_ref,
        head_w_ref, head_b_ref,
        # outputs
        feat_ref, pred_ref,
        # scratch: encoder activation, resident across the layer grid axis
        act_ref,
        *, num_heads, num_decheads):
    layer = pl.program_id(1)
    E = act_ref.shape[-1]

    # ---- first layer step: input projection + positional encoding (dropout = identity) ----
    @pl.when(layer == 0)
    def _():
        y = jnp.dot(x_ref[...].astype(jnp.bfloat16), in_w_ref[...],
                    preferred_element_type=jnp.float32)
        act_ref[...] = y + in_b_ref[...] + pe_ref[...]

    # ---- encoder AttentionBlock `layer` ----
    # TODO(synk): AttentionBlock source not included in the reference file; implemented as a
    # standard pre-LN transformer encoder block (MHA residual + GELU MLP residual).
    x = act_ref[...]
    h = _layernorm(x, e_ln1g_ref[0], e_ln1b_ref[0])
    qkv = (jnp.dot(h.astype(jnp.bfloat16), e_wqkv_ref[0],
                   preferred_element_type=jnp.float32) + e_bqkv_ref[0])
    attn = _attend(qkv[:, :E], qkv[:, E:2 * E], qkv[:, 2 * E:], num_heads)
    x = x + (jnp.dot(attn.astype(jnp.bfloat16), e_wo_ref[0],
                     preferred_element_type=jnp.float32) + e_bo_ref[0])
    h = _layernorm(x, e_ln2g_ref[0], e_ln2b_ref[0])
    h = _gelu(jnp.dot(h.astype(jnp.bfloat16), e_w1_ref[0],
                      preferred_element_type=jnp.float32) + e_b1_ref[0])
    h = jnp.dot(h.astype(jnp.bfloat16), e_w2_ref[0],
                preferred_element_type=jnp.float32) + e_b2_ref[0]
    act_ref[...] = x + h

    # ---- last layer step: decoder block + fused mlp_head ----
    # TODO(synk): AttentionDecoderBlock source not included; implemented as a standard pre-LN
    # decoder block (self-attn, cross-attn over the encoder output, GELU MLP).
    @pl.when(layer == pl.num_programs(1) - 1)
    def _():
        enc = act_ref[...]                       # (L, E) encoder output for this batch
        dec = dec_in_ref[...]                    # (T, E): input_layer_dec(zeros) + PE (folded)
        # self attention
        h = _layernorm(dec, d_ln1g_ref[...], d_ln1b_ref[...])
        qkv = (jnp.dot(h.astype(jnp.bfloat16), d_sa_wqkv_ref[...],
                       preferred_element_type=jnp.float32) + d_sa_bqkv_ref[...])
        attn = _attend(qkv[:, :E], qkv[:, E:2 * E], qkv[:, 2 * E:], num_decheads)
        dec = dec + (jnp.dot(attn.astype(jnp.bfloat16), d_sa_wo_ref[...],
                             preferred_element_type=jnp.float32) + d_sa_bo_ref[...])
        # cross attention (queries from decoder, keys/values from encoder output)
        h = _layernorm(dec, d_ln2g_ref[...], d_ln2b_ref[...])
        q = (jnp.dot(h.astype(jnp.bfloat16), d_ca_wq_ref[...],
                     preferred_element_type=jnp.float32) + d_ca_bq_ref[...])
        kv = (jnp.dot(enc.astype(jnp.bfloat16), d_ca_wkv_ref[...],
                      preferred_element_type=jnp.float32) + d_ca_bkv_ref[...])
        attn = _attend(q, kv[:, :E], kv[:, E:], num_decheads)
        dec = dec + (jnp.dot(attn.astype(jnp.bfloat16), d_ca_wo_ref[...],
                             preferred_element_type=jnp.float32) + d_ca_bo_ref[...])
        # GELU MLP
        h = _layernorm(dec, d_ln3g_ref[...], d_ln3b_ref[...])
        h = _gelu(jnp.dot(h.astype(jnp.bfloat16), d_w1_ref[...],
                          preferred_element_type=jnp.float32) + d_b1_ref[...])
        dec = dec + (jnp.dot(h.astype(jnp.bfloat16), d_w2_ref[...],
                             preferred_element_type=jnp.float32) + d_b2_ref[...])
        feat_ref[...] = dec.astype(feat_ref.dtype)
        # fused mlp_head, lane-dense (padded to 128 output lanes, sliced outside)
        pred_ref[...] = (jnp.dot(dec.astype(jnp.bfloat16), head_w_ref[...],
                                 preferred_element_type=jnp.float32)
                         + head_b_ref[...]).astype(pred_ref.dtype)


# ------------------------------ pallas wrapper ------------------------------

def bsi_block_pred_forward(prepped, x, cfg):
    """x: (B, num_patches, L) -> (pred (B, 5, num_t_pints), feature (B, num_t_pints, E))."""
    B, C, L = x.shape
    E, T, NL = cfg["embed_dim"], cfg["num_t_pints"], cfg["num_layers"]

    # encoder path input: (B, C, L) -> (B, L, C) -> batch-major rows (B*L, C)
    x2d = jnp.transpose(x, (0, 2, 1)).reshape(B * L, C)

    enc, dec = prepped["encoder"], prepped["decoder"]
    args = [
        x2d, prepped["pe_enc"], prepped["in_w"], prepped["in_b"],
        enc["ln1_g"], enc["ln1_b"], enc["w_qkv"], enc["b_qkv"], enc["w_o"], enc["b_o"],
        enc["ln2_g"], enc["ln2_b"], enc["w1"], enc["b1"], enc["w2"], enc["b2"],
        prepped["dec_init"],
        dec["ln1_g"], dec["ln1_b"], dec["sa_w_qkv"], dec["sa_b_qkv"], dec["sa_w_o"], dec["sa_b_o"],
        dec["ln2_g"], dec["ln2_b"], dec["ca_w_q"], dec["ca_b_q"], dec["ca_w_kv"], dec["ca_b_kv"],
        dec["ca_w_o"], dec["ca_b_o"],
        dec["ln3_g"], dec["ln3_b"], dec["w1"], dec["b1"], dec["w2"], dec["b2"],
        prepped["head_w"], prepped["head_b"],
    ]

    def const_spec(a):
        nd = a.ndim
        return pl.BlockSpec(tuple(a.shape), lambda b, l: (0,) * nd)

    def layer_spec(a):
        nd = a.ndim
        return pl.BlockSpec((1,) + tuple(a.shape[1:]),
                            lambda b, l: (l,) + (0,) * (nd - 1))

    in_specs = [
        pl.BlockSpec((L, C), lambda b, l: (b, 0)),      # rows of batch b
        const_spec(prepped["pe_enc"]),
        const_spec(prepped["in_w"]),
        const_spec(prepped["in_b"]),
    ]
    in_specs += [layer_spec(args[i]) for i in range(4, 16)]     # stacked encoder params
    in_specs += [const_spec(a) for a in args[16:]]              # decoder + head params

    out_shape = (jax.ShapeDtypeStruct((B * T, E), jnp.float32),
                 jax.ShapeDtypeStruct((B * T, 128), jnp.float32))
    out_specs = (pl.BlockSpec((T, E), lambda b, l: (b, 0)),
                 pl.BlockSpec((T, 128), lambda b, l: (b, 0)))

    feat2d, pred_pad = pl.pallas_call(
        partial(_fused_forward_kernel,
                num_heads=cfg["num_heads"], num_decheads=cfg["num_decheads"]),
        out_shape=out_shape,
        grid=(B, NL),
        in_specs=in_specs,
        out_specs=out_specs,
        scratch_shapes=[pltpu.VMEM((L, E), jnp.float32)],
        compiler_params=pltpu.CompilerParams(
            dimension_semantics=("parallel", "arbitrary")),
    )(*args)

    feature = feat2d.reshape(B, T, E)
    pred = pred_pad[:, :5].reshape(B, T, 5).transpose(0, 2, 1)          # (B, 5, T)
    # TODO(synk): torch moves `feature` to numpy when task != 'SSLEval'; returned as array here.
    return pred, feature


# ------------------------------ parameter init ------------------------------

def make_positional_encoding(max_len, d_model):
    position = jnp.arange(max_len, dtype=jnp.float32)[:, None]
    div_term = jnp.exp(jnp.arange(0, d_model, 2, dtype=jnp.float32)
                       * -(math.log(10000.0) / d_model))
    pe = jnp.zeros((max_len, d_model), jnp.float32)
    pe = pe.at[:, 0::2].set(jnp.sin(position * div_term))
    if d_model % 2 == 1:
        pe = pe.at[:, 1::2].set(jnp.cos(position * div_term[:-1]))
    else:
        pe = pe.at[:, 1::2].set(jnp.cos(position * div_term))
    return pe   # (max_len, d_model)


def init_self_mha(key, E):
    ks = jax.random.split(key, 2)
    s = 1.0 / math.sqrt(E)
    return {"w_qkv": jax.random.uniform(ks[0], (E, 3 * E), jnp.float32, -s, s),
            "b_qkv": jnp.zeros((1, 3 * E), jnp.float32),
            "w_o": jax.random.uniform(ks[1], (E, E), jnp.float32, -s, s),
            "b_o": jnp.zeros((1, E), jnp.float32)}


def init_cross_mha(key, E):
    ks = jax.random.split(key, 3)
    s = 1.0 / math.sqrt(E)
    return {"w_q": jax.random.uniform(ks[0], (E, E), jnp.float32, -s, s),
            "b_q": jnp.zeros((1, E), jnp.float32),
            "w_kv": jax.random.uniform(ks[1], (E, 2 * E), jnp.float32, -s, s),
            "b_kv": jnp.zeros((1, 2 * E), jnp.float32),
            "w_o": jax.random.uniform(ks[2], (E, E), jnp.float32, -s, s),
            "b_o": jnp.zeros((1, E), jnp.float32)}


def init_encoder_block(key, E, H):
    ks = jax.random.split(key, 3)
    return {"ln1_g": jnp.ones((1, E), jnp.float32), "ln1_b": jnp.zeros((1, E), jnp.float32),
            "attn": init_self_mha(ks[0], E),
            "ln2_g": jnp.ones((1, E), jnp.float32), "ln2_b": jnp.zeros((1, E), jnp.float32),
            "mlp_w1": jax.random.normal(ks[1], (E, H), jnp.float32) * 0.02,
            "mlp_b1": jnp.zeros((1, H), jnp.float32),
            "mlp_w2": jax.random.normal(ks[2], (H, E), jnp.float32) * 0.02,
            "mlp_b2": jnp.zeros((1, E), jnp.float32)}


def init_decoder_block(key, E, H):
    ks = jax.random.split(key, 4)
    return {"ln1_g": jnp.ones((1, E), jnp.float32), "ln1_b": jnp.zeros((1, E), jnp.float32),
            "self_attn": init_self_mha(ks[0], E),
            "ln2_g": jnp.ones((1, E), jnp.float32), "ln2_b": jnp.zeros((1, E), jnp.float32),
            "cross_attn": init_cross_mha(ks[1], E),
            "ln3_g": jnp.ones((1, E), jnp.float32), "ln3_b": jnp.zeros((1, E), jnp.float32),
            "mlp_w1": jax.random.normal(ks[2], (E, H), jnp.float32) * 0.02,
            "mlp_b1": jnp.zeros((1, H), jnp.float32),
            "mlp_w2": jax.random.normal(ks[3], (H, E), jnp.float32) * 0.02,
            "mlp_b2": jnp.zeros((1, E), jnp.float32)}


def init_params(key, cfg):
    E, H, P = cfg["embed_dim"], cfg["hidden_dim"], cfg["num_patches"]
    keys = jax.random.split(key, 3 + cfg["num_layers"])
    # NOTE: cls_token / pos_embedding / channel_embedding / channel_tokens / init_norm exist
    # in the torch __init__ but are never used in forward_feature -> omitted.
    # input_layer_dec's weight multiplies an all-zeros tensor -> only its bias matters.
    return {
        "input_w": jax.random.normal(keys[0], (P, E), jnp.float32) * 0.02,
        "input_b": jnp.zeros((1, E), jnp.float32),
        "input_dec_b": jnp.zeros((1, E), jnp.float32),
        "head_w": jax.random.normal(keys[1], (E, 5), jnp.float32) * 0.02,   # mlp_head -> 5
        "head_b": jnp.zeros((1, 5), jnp.float32),
        "decoder": init_decoder_block(keys[2], E, H),
        "encoder": [init_encoder_block(keys[3 + i], E, H) for i in range(cfg["num_layers"])],
        "pe": make_positional_encoding(max(cfg["seq_len"], cfg["num_t_pints"]), E),
    }


def prepare_params(params, cfg):
    """Kernel-ready params: fold Q-scale, stack encoder layers, cast matmul weights to bf16,
    pad mlp_head to 128 lanes, fold the zero-input decoder embedding."""
    E = cfg["embed_dim"]
    L, T = cfg["seq_len"], cfg["num_t_pints"]
    bf = jnp.bfloat16

    def fold_q_scale(w, b, nheads):
        scale = 1.0 / math.sqrt(E // nheads)
        return w.at[:, :E].multiply(scale), b.at[:, :E].multiply(scale)

    enc_layers = params["encoder"]
    folded = [fold_q_scale(p["attn"]["w_qkv"], p["attn"]["b_qkv"], cfg["num_heads"])
              for p in enc_layers]

    def stack(fn, dtype=jnp.float32):
        return jnp.stack([fn(p) for p in enc_layers], axis=0).astype(dtype)

    enc = {
        "ln1_g": stack(lambda p: p["ln1_g"]), "ln1_b": stack(lambda p: p["ln1_b"]),
        "w_qkv": jnp.stack([w for w, _ in folded], 0).astype(bf),
        "b_qkv": jnp.stack([b for _, b in folded], 0),
        "w_o": stack(lambda p: p["attn"]["w_o"], bf), "b_o": stack(lambda p: p["attn"]["b_o"]),
        "ln2_g": stack(lambda p: p["ln2_g"]), "ln2_b": stack(lambda p: p["ln2_b"]),
        "w1": stack(lambda p: p["mlp_w1"], bf), "b1": stack(lambda p: p["mlp_b1"]),
        "w2": stack(lambda p: p["mlp_w2"], bf), "b2": stack(lambda p: p["mlp_b2"]),
    }

    d = params["decoder"]
    sa_w, sa_b = fold_q_scale(d["self_attn"]["w_qkv"], d["self_attn"]["b_qkv"],
                              cfg["num_decheads"])
    ca_scale = 1.0 / math.sqrt(E // cfg["num_decheads"])
    dec = {
        "ln1_g": d["ln1_g"], "ln1_b": d["ln1_b"],
        "sa_w_qkv": sa_w.astype(bf), "sa_b_qkv": sa_b,
        "sa_w_o": d["self_attn"]["w_o"].astype(bf), "sa_b_o": d["self_attn"]["b_o"],
        "ln2_g": d["ln2_g"], "ln2_b": d["ln2_b"],
        "ca_w_q": (d["cross_attn"]["w_q"] * ca_scale).astype(bf),
        "ca_b_q": d["cross_attn"]["b_q"] * ca_scale,
        "ca_w_kv": d["cross_attn"]["w_kv"].astype(bf), "ca_b_kv": d["cross_attn"]["b_kv"],
        "ca_w_o": d["cross_attn"]["w_o"].astype(bf), "ca_b_o": d["cross_attn"]["b_o"],
        "ln3_g": d["ln3_g"], "ln3_b": d["ln3_b"],
        "w1": d["mlp_w1"].astype(bf), "b1": d["mlp_b1"],
        "w2": d["mlp_w2"].astype(bf), "b2": d["mlp_b2"],
    }

    head_w = jnp.zeros((E, 128), jnp.float32).at[:, :5].set(params["head_w"]).astype(bf)
    head_b = jnp.zeros((1, 128), jnp.float32).at[:, :5].set(params["head_b"])

    pe = params["pe"]
    return {
        "pe_enc": pe[:L],                                     # (L, E)
        "in_w": params["input_w"].astype(bf),
        "in_b": params["input_b"],
        "dec_init": pe[:T] + params["input_dec_b"],           # Linear(zeros)+PE, bit-exact fold
        "encoder": enc,
        "decoder": dec,
        "head_w": head_w,
        "head_b": head_b,
    }


# ----------------------------------- main ------------------------------------

if __name__ == "__main__":
    cfg = dict(embed_dim=32, hidden_dim=64, num_heads=4, num_decheads=4,
               num_layers=2, num_t_pints=8, num_patches=8, seq_len=16, batch=2)

    key = jax.random.PRNGKey(0)
    pkey, xkey = jax.random.split(key)
    params = init_params(pkey, cfg)
    prepped = prepare_params(params, cfg)
    x = jax.random.normal(xkey, (cfg["batch"], cfg["num_patches"], cfg["seq_len"]), jnp.float32)

    fwd = jax.jit(partial(bsi_block_pred_forward, cfg=cfg))
    pred, feature = fwd(prepped, x)
    jax.block_until_ready((pred, feature))

    assert pred.shape == (cfg["batch"], 5, cfg["num_t_pints"])
    assert feature.shape == (cfg["batch"], cfg["num_t_pints"], cfg["embed_dim"])
    assert bool(jnp.all(jnp.isfinite(pred))) and bool(jnp.all(jnp.isfinite(feature)))
    print("KERNEL_OK")
</pallas_src>

<mosaic_0001>
module attributes {stable_mosaic.version = 11 : i64} {
  func.func @_fused_forward_kernel(%arg0: i32, %arg1: i32, %arg2: memref<16x8xf32, #tpu.memory_space<vmem>>, %arg3: memref<16x32xf32, #tpu.memory_space<vmem>>, %arg4: memref<8x32xbf16, #tpu.memory_space<vmem>>, %arg5: memref<1x32xf32, #tpu.memory_space<vmem>>, %arg6: memref<1x1x32xf32, #tpu.memory_space<vmem>>, %arg7: memref<1x1x32xf32, #tpu.memory_space<vmem>>, %arg8: memref<1x32x96xbf16, #tpu.memory_space<vmem>>, %arg9: memref<1x1x96xf32, #tpu.memory_space<vmem>>, %arg10: memref<1x32x32xbf16, #tpu.memory_space<vmem>>, %arg11: memref<1x1x32xf32, #tpu.memory_space<vmem>>, %arg12: memref<1x1x32xf32, #tpu.memory_space<vmem>>, %arg13: memref<1x1x32xf32, #tpu.memory_space<vmem>>, %arg14: memref<1x32x64xbf16, #tpu.memory_space<vmem>>, %arg15: memref<1x1x64xf32, #tpu.memory_space<vmem>>, %arg16: memref<1x64x32xbf16, #tpu.memory_space<vmem>>, %arg17: memref<1x1x32xf32, #tpu.memory_space<vmem>>, %arg18: memref<8x32xf32, #tpu.memory_space<vmem>>, %arg19: memref<1x32xf32, #tpu.memory_space<vmem>>, %arg20: memref<1x32xf32, #tpu.memory_space<vmem>>, %arg21: memref<32x96xbf16, #tpu.memory_space<vmem>>, %arg22: memref<1x96xf32, #tpu.memory_space<vmem>>, %arg23: memref<32x32xbf16, #tpu.memory_space<vmem>>, %arg24: memref<1x32xf32, #tpu.memory_space<vmem>>, %arg25: memref<1x32xf32, #tpu.memory_space<vmem>>, %arg26: memref<1x32xf32, #tpu.memory_space<vmem>>, %arg27: memref<32x32xbf16, #tpu.memory_space<vmem>>, %arg28: memref<1x32xf32, #tpu.memory_space<vmem>>, %arg29: memref<32x64xbf16, #tpu.memory_space<vmem>>, %arg30: memref<1x64xf32, #tpu.memory_space<vmem>>, %arg31: memref<32x32xbf16, #tpu.memory_space<vmem>>, %arg32: memref<1x32xf32, #tpu.memory_space<vmem>>, %arg33: memref<1x32xf32, #tpu.memory_space<vmem>>, %arg34: memref<1x32xf32, #tpu.memory_space<vmem>>, %arg35: memref<32x64xbf16, #tpu.memory_space<vmem>>, %arg36: memref<1x64xf32, #tpu.memory_space<vmem>>, %arg37: memref<64x32xbf16, #tpu.memory_space<vmem>>, %arg38: memref<1x32xf32, #tpu.memory_space<vmem>>, %arg39: memref<32x128xbf16, #tpu.memory_space<vmem>>, %arg40: memref<1x128xf32, #tpu.memory_space<vmem>>, %arg41: memref<8x32xf32, #tpu.memory_space<vmem>>, %arg42: memref<8x128xf32, #tpu.memory_space<vmem>>, %arg43: memref<16x32xf32, #tpu.memory_space<vmem>>) attributes {dimension_semantics = [#tpu.dimension_semantics<parallel>, #tpu.dimension_semantics<arbitrary>], iteration_bounds = array<i64: 2, 2>, scalar_prefetch = 0 : i64, scratch_operands = 1 : i64, tpu.core_type = #tpu.core_type<tc>, window_params = [{transform_indices = @transform_0, window_bounds = array<i64: 16, 8>}, {pipeline_mode = #tpu.pipeline_mode<synchronous>, transform_indices = @transform_1, window_bounds = array<i64: 16, 32>}, {pipeline_mode = #tpu.pipeline_mode<synchronous>, transform_indices = @transform_2, window_bounds = array<i64: 8, 32>}, {pipeline_mode = #tpu.pipeline_mode<synchronous>, transform_indices = @transform_3, window_bounds = array<i64: 1, 32>}, {transform_indices = @transform_4, window_bounds = array<i64: 1, 1, 32>}, {transform_indices = @transform_5, window_bounds = array<i64: 1, 1, 32>}, {transform_indices = @transform_6, window_bounds = array<i64: 1, 32, 96>}, {transform_indices = @transform_7, window_bounds = array<i64: 1, 1, 96>}, {transform_indices = @transform_8, window_bounds = array<i64: 1, 32, 32>}, {transform_indices = @transform_9, window_bounds = array<i64: 1, 1, 32>}, {transform_indices = @transform_10, window_bounds = array<i64: 1, 1, 32>}, {transform_indices = @transform_11, window_bounds = array<i64: 1, 1, 32>}, {transform_indices = @transform_12, window_bounds = array<i64: 1, 32, 64>}, {transform_indices = @transform_13, window_bounds = array<i64: 1, 1, 64>}, {transform_indices = @transform_14, window_bounds = array<i64: 1, 64, 32>}, {transform_indices = @transform_15, window_bounds = array<i64: 1, 1, 32>}, {pipeline_mode = #tpu.pipeline_mode<synchronous>, transform_indices = @transform_16, window_bounds = array<i64: 8, 32>}, {pipeline_mode = #tpu.pipeline_mode<synchronous>, transform_indices = @transform_17, window_bounds = array<i64: 1, 32>}, {pipeline_mode = #tpu.pipeline_mode<synchronous>, transform_indices = @transform_18, window_bounds = array<i64: 1, 32>}, {pipeline_mode = #tpu.pipeline_mode<synchronous>, transform_indices = @transform_19, window_bounds = array<i64: 32, 96>}, {pipeline_mode = #tpu.pipeline_mode<synchronous>, transform_indices = @transform_20, window_bounds = array<i64: 1, 96>}, {pipeline_mode = #tpu.pipeline_mode<synchronous>, transform_indices = @transform_21, window_bounds = array<i64: 32, 32>}, {pipeline_mode = #tpu.pipeline_mode<synchronous>, transform_indices = @transform_22, window_bounds = array<i64: 1, 32>}, {pipeline_mode = #tpu.pipeline_mode<synchronous>, transform_indices = @transform_23, window_bounds = array<i64: 1, 32>}, {pipeline_mode = #tpu.pipeline_mode<synchronous>, transform_indices = @transform_24, window_bounds = array<i64: 1, 32>}, {pipeline_mode = #tpu.pipeline_mode<synchronous>, transform_indices = @transform_25, window_bounds = array<i64: 32, 32>}, {pipeline_mode = #tpu.pipeline_mode<synchronous>, transform_indices = @transform_26, window_bounds = array<i64: 1, 32>}, {pipeline_mode = #tpu.pipeline_mode<synchronous>, transform_indices = @transform_27, window_bounds = array<i64: 32, 64>}, {pipeline_mode = #tpu.pipeline_mode<synchronous>, transform_indices = @transform_28, window_bounds = array<i64: 1, 64>}, {pipeline_mode = #tpu.pipeline_mode<synchronous>, transform_indices = @transform_29, window_bounds = array<i64: 32, 32>}, {pipeline_mode = #tpu.pipeline_mode<synchronous>, transform_indices = @transform_30, window_bounds = array<i64: 1, 32>}, {pipeline_mode = #tpu.pipeline_mode<synchronous>, transform_indices = @transform_31, window_bounds = array<i64: 1, 32>}, {pipeline_mode = #tpu.pipeline_mode<synchronous>, transform_indices = @transform_32, window_bounds = array<i64: 1, 32>}, {pipeline_mode = #tpu.pipeline_mode<synchronous>, transform_indices = @transform_33, window_bounds = array<i64: 32, 64>}, {pipeline_mode = #tpu.pipeline_mode<synchronous>, transform_indices = @transform_34, window_bounds = array<i64: 1, 64>}, {pipeline_mode = #tpu.pipeline_mode<synchronous>, transform_indices = @transform_35, window_bounds = array<i64: 64, 32>}, {pipeline_mode = #tpu.pipeline_mode<synchronous>, transform_indices = @transform_36, window_bounds = array<i64: 1, 32>}, {pipeline_mode = #tpu.pipeline_mode<synchronous>, transform_indices = @transform_37, window_bounds = array<i64: 32, 128>}, {pipeline_mode = #tpu.pipeline_mode<synchronous>, transform_indices = @transform_38, window_bounds = array<i64: 1, 128>}, {transform_indices = @transform_39, window_bounds = array<i64: 8, 32>}, {transform_indices = @transform_40, window_bounds = array<i64: 8, 128>}]} {
    %c0_i32 = arith.constant 0 : i32
    %0 = arith.cmpi eq, %arg1, %c0_i32 : i32
    %1 = arith.extui %0 : i1 to i32
    %c0_i32_0 = arith.constant 0 : i32
    %2 = arith.cmpi ne, %1, %c0_i32_0 : i32
    scf.if %2 {
      %c0_74 = arith.constant 0 : index
      %c0_75 = arith.constant 0 : index
      %178 = vector.load %arg2[%c0_74, %c0_75] : memref<16x8xf32, #tpu.memory_space<vmem>>, vector<16x8xf32>
      %179 = arith.truncf %178 : vector<16x8xf32> to vector<16x8xbf16>
      %c0_76 = arith.constant 0 : index
      %c0_77 = arith.constant 0 : index
      %180 = vector.load %arg4[%c0_76, %c0_77] : memref<8x32xbf16, #tpu.memory_space<vmem>>, vector<8x32xbf16>
      %cst_78 = arith.constant dense<0.000000e+00> : vector<16x32xf32>
      %181 = tpu.matmul %179, %180, %cst_78 {dimension_numbers = #tpu.dot_dimension_numbers<[1], [0], [0], [1], [0, 0, 1, 1], [], []>} : vector<16x8xbf16>, vector<8x32xbf16>, vector<16x32xf32> -> vector<16x32xf32>
      %c0_79 = arith.constant 0 : index
      %c0_80 = arith.constant 0 : index
      %182 = vector.load %arg5[%c0_79, %c0_80] : memref<1x32xf32, #tpu.memory_space<vmem>>, vector<1x32xf32>
      %183 = vector.broadcast %182 : vector<1x32xf32> to vector<16x32xf32>
      %184 = arith.addf %181, %183 : vector<16x32xf32>
      %c0_81 = arith.constant 0 : index
      %c0_82 = arith.constant 0 : index
      %185 = vector.load %arg3[%c0_81, %c0_82] : memref<16x32xf32, #tpu.memory_space<vmem>>, vector<16x32xf32>
      %186 = arith.addf %184, %185 : vector<16x32xf32>
      %c0_83 = arith.constant 0 : index
      %c0_84 = arith.constant 0 : index
      %187 = vector.load %arg43[%c0_83, %c0_84] : memref<16x32xf32, #tpu.memory_space<vmem>>, vector<16x32xf32>
      tpu.vector_store %arg43[%c0_83, %c0_84], %186 {strides = array<i32>} : memref<16x32xf32, #tpu.memory_space<vmem>>, vector<16x32xf32>,
    } else {
    }
    %c0 = arith.constant 0 : index
    %c0_1 = arith.constant 0 : index
    %3 = vector.load %arg43[%c0, %c0_1] : memref<16x32xf32, #tpu.memory_space<vmem>>, vector<16x32xf32>
    %c0_2 = arith.constant 0 : index
    %c0_3 = arith.constant 0 : index
    %c0_4 = arith.constant 0 : index
    %4 = vector.load %arg6[%c0_2, %c0_3, %c0_4] : memref<1x1x32xf32, #tpu.memory_space<vmem>>, vector<1x1x32xf32>
    %5 = vector.shape_cast %4 : vector<1x1x32xf32> to vector<1x32xf32>
    %c0_5 = arith.constant 0 : index
    %c0_6 = arith.constant 0 : index
    %c0_7 = arith.constant 0 : index
    %6 = vector.load %arg7[%c0_5, %c0_6, %c0_7] : memref<1x1x32xf32, #tpu.memory_space<vmem>>, vector<1x1x32xf32>
    %7 = vector.shape_cast %6 : vector<1x1x32xf32> to vector<1x32xf32>
    %cst = arith.constant dense<0.000000e+00> : vector<16xf32>
    %8 = vector.multi_reduction <add>, %3, %cst [1] : vector<16x32xf32> to vector<16xf32>
    %9 = vector.shape_cast %8 : vector<16xf32> to vector<16x1xf32>
    %cst_8 = arith.constant 3.200000e+01 : f32
    %10 = vector.broadcast %cst_8 : f32 to vector<16x1xf32>
    %11 = arith.divf %9, %10 : vector<16x1xf32>
    %12 = vector.broadcast %11 : vector<16x1xf32> to vector<16x32xf32>
    %13 = arith.subf %3, %12 : vector<16x32xf32>
    %14 = arith.mulf %13, %13 : vector<16x32xf32>
    %cst_9 = arith.constant dense<0.000000e+00> : vector<16xf32>
    %15 = vector.multi_reduction <add>, %14, %cst_9 [1] : vector<16x32xf32> to vector<16xf32>
    %16 = vector.shape_cast %15 : vector<16xf32> to vector<16x1xf32>
    %cst_10 = arith.constant 3.200000e+01 : f32
    %17 = vector.broadcast %cst_10 : f32 to vector<16x1xf32>
    %18 = arith.divf %16, %17 : vector<16x1xf32>
    %19 = vector.broadcast %11 : vector<16x1xf32> to vector<16x32xf32>
    %20 = arith.subf %3, %19 : vector<16x32xf32>
    %cst_11 = arith.constant 9.99999974E-6 : f32
    %21 = vector.broadcast %cst_11 : f32 to vector<16x1xf32>
    %22 = arith.addf %18, %21 : vector<16x1xf32>
    %23 = math.rsqrt %22 : vector<16x1xf32>
    %24 = vector.broadcast %23 : vector<16x1xf32> to vector<16x32xf32>
    %25 = arith.mulf %20, %24 : vector<16x32xf32>
    %26 = vector.broadcast %5 : vector<1x32xf32> to vector<16x32xf32>
    %27 = arith.mulf %25, %26 : vector<16x32xf32>
    %28 = vector.broadcast %7 : vector<1x32xf32> to vector<16x32xf32>
    %29 = arith.addf %27, %28 : vector<16x32xf32>
    %30 = arith.truncf %29 : vector<16x32xf32> to vector<16x32xbf16>
    %c0_12 = arith.constant 0 : index
    %c0_13 = arith.constant 0 : index
    %c0_14 = arith.constant 0 : index
    %31 = vector.load %arg8[%c0_12, %c0_13, %c0_14] : memref<1x32x96xbf16, #tpu.memory_space<vmem>>, vector<1x32x96xbf16>
    %32 = vector.shape_cast %31 : vector<1x32x96xbf16> to vector<32x96xbf16>
    %cst_15 = arith.constant dense<0.000000e+00> : vector<16x96xf32>
    %33 = tpu.matmul %30, %32, %cst_15 {dimension_numbers = #tpu.dot_dimension_numbers<[1], [0], [0], [1], [0, 0, 1, 1], [], []>} : vector<16x32xbf16>, vector<32x96xbf16>, vector<16x96xf32> -> vector<16x96xf32>
    %c0_16 = arith.constant 0 : index
    %c0_17 = arith.constant 0 : index
    %c0_18 = arith.constant 0 : index
    %34 = vector.load %arg9[%c0_16, %c0_17, %c0_18] : memref<1x1x96xf32, #tpu.memory_space<vmem>>, vector<1x1x96xf32>
    %35 = vector.shape_cast %34 : vector<1x1x96xf32> to vector<1x96xf32>
    %36 = vector.broadcast %35 : vector<1x96xf32> to vector<16x96xf32>
    %37 = arith.addf %33, %36 : vector<16x96xf32>
    %38 = vector.extract_strided_slice %37 {offsets = [0, 0], sizes = [16, 32], strides = [1, 1]} : vector<16x96xf32> to vector<16x32xf32>
    %39 = vector.extract_strided_slice %37 {offsets = [0, 32], sizes = [16, 32], strides = [1, 1]} : vector<16x96xf32> to vector<16x32xf32>
    %40 = vector.extract_strided_slice %37 {offsets = [0, 64], sizes = [16, 32], strides = [1, 1]} : vector<16x96xf32> to vector<16x32xf32>
    %41 = arith.truncf %38 : vector<16x32xf32> to vector<16x32xbf16>
    %42 = arith.truncf %39 : vector<16x32xf32> to vector<16x32xbf16>
    %43 = arith.truncf %40 : vector<16x32xf32> to vector<16x32xbf16>
    %44 = vector.extract_strided_slice %41 {offsets = [0, 0], sizes = [16, 8], strides = [1, 1]} : vector<16x32xbf16> to vector<16x8xbf16>
    %45 = vector.extract_strided_slice %42 {offsets = [0, 0], sizes = [16, 8], strides = [1, 1]} : vector<16x32xbf16> to vector<16x8xbf16>
    %cst_19 = arith.constant dense<0.000000e+00> : vector<16x16xf32>
    %46 = tpu.matmul %44, %45, %cst_19 {dimension_numbers = #tpu.dot_dimension_numbers<[1], [1], [0], [0], [0, 0, 1, 0], [], []>} : vector<16x8xbf16>, vector<16x8xbf16>, vector<16x16xf32> -> vector<16x16xf32>
    %cst_20 = arith.constant dense<0xFF800000> : vector<16xf32>
    %47 = vector.multi_reduction <maximumf>, %46, %cst_20 [1] : vector<16x16xf32> to vector<16xf32>
    %48 = vector.shape_cast %47 : vector<16xf32> to vector<16x1xf32>
    %49 = vector.broadcast %48 : vector<16x1xf32> to vector<16x16xf32>
    %50 = arith.subf %46, %49 : vector<16x16xf32>
    %51 = math.exp %50 : vector<16x16xf32>
    %cst_21 = arith.constant dense<0.000000e+00> : vector<16xf32>
    %52 = vector.multi_reduction <add>, %51, %cst_21 [1] : vector<16x16xf32> to vector<16xf32>
    %53 = vector.shape_cast %52 : vector<16xf32> to vector<16x1xf32>
    %54 = tpu.reciprocal %53 {approx = true} : vector<16x1xf32> -> vector<16x1xf32>
    %55 = vector.broadcast %54 : vector<16x1xf32> to vector<16x16xf32>
    %56 = arith.mulf %51, %55 : vector<16x16xf32>
    %57 = arith.truncf %56 : vector<16x16xf32> to vector<16x16xbf16>
    %58 = vector.extract_strided_slice %43 {offsets = [0, 0], sizes = [16, 8], strides = [1, 1]} : vector<16x32xbf16> to vector<16x8xbf16>
    %cst_22 = arith.constant dense<0.000000e+00> : vector<16x8xf32>
    %59 = tpu.matmul %57, %58, %cst_22 {dimension_numbers = #tpu.dot_dimension_numbers<[1], [0], [0], [1], [0, 0, 1, 1], [], []>} : vector<16x16xbf16>, vector<16x8xbf16>, vector<16x8xf32> -> vector<16x8xf32>
    %60 = vector.extract_strided_slice %41 {offsets = [0, 8], sizes = [16, 8], strides = [1, 1]} : vector<16x32xbf16> to vector<16x8xbf16>
    %61 = vector.extract_strided_slice %42 {offsets = [0, 8], sizes = [16, 8], strides = [1, 1]} : vector<16x32xbf16> to vector<16x8xbf16>
    %cst_23 = arith.constant dense<0.000000e+00> : vector<16x16xf32>
    %62 = tpu.matmul %60, %61, %cst_23 {dimension_numbers = #tpu.dot_dimension_numbers<[1], [1], [0], [0], [0, 0, 1, 0], [], []>} : vector<16x8xbf16>, vector<16x8xbf16>, vector<16x16xf32> -> vector<16x16xf32>
    %cst_24 = arith.constant dense<0xFF800000> : vector<16xf32>
    %63 = vector.multi_reduction <maximumf>, %62, %cst_24 [1] : vector<16x16xf32> to vector<16xf32>
    %64 = vector.shape_cast %63 : vector<16xf32> to vector<16x1xf32>
    %65 = vector.broadcast %64 : vector<16x1xf32> to vector<16x16xf32>
    %66 = arith.subf %62, %65 : vector<16x16xf32>
    %67 = math.exp %66 : vector<16x16xf32>
    %cst_25 = arith.constant dense<0.000000e+00> : vector<16xf32>
    %68 = vector.multi_reduction <add>, %67, %cst_25 [1] : vector<16x16xf32> to vector<16xf32>
    %69 = vector.shape_cast %68 : vector<16xf32> to vector<16x1xf32>
    %70 = tpu.reciprocal %69 {approx = true} : vector<16x1xf32> -> vector<16x1xf32>
    %71 = vector.broadcast %70 : vector<16x1xf32> to vector<16x16xf32>
    %72 = arith.mulf %67, %71 : vector<16x16xf32>
    %73 = arith.truncf %72 : vector<16x16xf32> to vector<16x16xbf16>
    %74 = vector.extract_strided_slice %43 {offsets = [0, 8], sizes = [16, 8], strides = [1, 1]} : vector<16x32xbf16> to vector<16x8xbf16>
    %cst_26 = arith.constant dense<0.000000e+00> : vector<16x8xf32>
    %75 = tpu.matmul %73, %74, %cst_26 {dimension_numbers = #tpu.dot_dimension_numbers<[1], [0], [0], [1], [0, 0, 1, 1], [], []>} : vector<16x16xbf16>, vector<16x8xbf16>, vector<16x8xf32> -> vector<16x8xf32>
    %76 = vector.extract_strided_slice %41 {offsets = [0, 16], sizes = [16, 8], strides = [1, 1]} : vector<16x32xbf16> to vector<16x8xbf16>
    %77 = vector.extract_strided_slice %42 {offsets = [0, 16], sizes = [16, 8], strides = [1, 1]} : vector<16x32xbf16> to vector<16x8xbf16>
    %cst_27 = arith.constant dense<0.000000e+00> : vector<16x16xf32>
    %78 = tpu.matmul %76, %77, %cst_27 {dimension_numbers = #tpu.dot_dimension_numbers<[1], [1], [0], [0], [0, 0, 1, 0], [], []>} : vector<16x8xbf16>, vector<16x8xbf16>, vector<16x16xf32> -> vector<16x16xf32>
    %cst_28 = arith.constant dense<0xFF800000> : vector<16xf32>
    %79 = vector.multi_reduction <maximumf>, %78, %cst_28 [1] : vector<16x16xf32> to vector<16xf32>
    %80 = vector.shape_cast %79 : vector<16xf32> to vector<16x1xf32>
    %81 = vector.broadcast %80 : vector<16x1xf32> to vector<16x16xf32>
    %82 = arith.subf %78, %81 : vector<16x16xf32>
    %83 = math.exp %82 : vector<16x16xf32>
    %cst_29 = arith.constant dense<0.000000e+00> : vector<16xf32>
    %84 = vector.multi_reduction <add>, %83, %cst_29 [1] : vector<16x16xf32> to vector<16xf32>
    %85 = vector.shape_cast %84 : vector<16xf32> to vector<16x1xf32>
    %86 = tpu.reciprocal %85 {approx = true} : vector<16x1xf32> -> vector<16x1xf32>
    %87 = vector.broadcast %86 : vector<16x1xf32> to vector<16x16xf32>
    %88 = arith.mulf %83, %87 : vector<16x16xf32>
    %89 = arith.truncf %88 : vector<16x16xf32> to vector<16x16xbf16>
    %90 = vector.extract_strided_slice %43 {offsets = [0, 16], sizes = [16, 8], strides = [1, 1]} : vector<16x32xbf16> to vector<16x8xbf16>
    %cst_30 = arith.constant dense<0.000000e+00> : vector<16x8xf32>
    %91 = tpu.matmul %89, %90, %cst_30 {dimension_numbers = #tpu.dot_dimension_numbers<[1], [0], [0], [1], [0, 0, 1, 1], [], []>} : vector<16x16xbf16>, vector<16x8xbf16>, vector<16x8xf32> -> vector<16x8xf32>
    %92 = vector.extract_strided_slice %41 {offsets = [0, 24], sizes = [16, 8], strides = [1, 1]} : vector<16x32xbf16> to vector<16x8xbf16>
    %93 = vector.extract_strided_slice %42 {offsets = [0, 24], sizes = [16, 8], strides = [1, 1]} : vector<16x32xbf16> to vector<16x8xbf16>
    %cst_31 = arith.constant dense<0.000000e+00> : vector<16x16xf32>
    %94 = tpu.matmul %92, %93, %cst_31 {dimension_numbers = #tpu.dot_dimension_numbers<[1], [1], [0], [0], [0, 0, 1, 0], [], []>} : vector<16x8xbf16>, vector<16x8xbf16>, vector<16x16xf32> -> vector<16x16xf32>
    %cst_32 = arith.constant dense<0xFF800000> : vector<16xf32>
    %95 = vector.multi_reduction <maximumf>, %94, %cst_32 [1] : vector<16x16xf32> to vector<16xf32>
    %96 = vector.shape_cast %95 : vector<16xf32> to vector<16x1xf32>
    %97 = vector.broadcast %96 : vector<16x1xf32> to vector<16x16xf32>
    %98 = arith.subf %94, %97 : vector<16x16xf32>
    %99 = math.exp %98 : vector<16x16xf32>
    %cst_33 = arith.constant dense<0.000000e+00> : vector<16xf32>
    %100 = vector.multi_reduction <add>, %99, %cst_33 [1] : vector<16x16xf32> to vector<16xf32>
    %101 = vector.shape_cast %100 : vector<16xf32> to vector<16x1xf32>
    %102 = tpu.reciprocal %101 {approx = true} : vector<16x1xf32> -> vector<16x1xf32>
    %103 = vector.broadcast %102 : vector<16x1xf32> to vector<16x16xf32>
    %104 = arith.mulf %99, %103 : vector<16x16xf32>
    %105 = arith.truncf %104 : vector<16x16xf32> to vector<16x16xbf16>
    %106 = vector.extract_strided_slice %43 {offsets = [0, 24], sizes = [16, 8], strides = [1, 1]} : vector<16x32xbf16> to vector<16x8xbf16>
    %cst_34 = arith.constant dense<0.000000e+00> : vector<16x8xf32>
    %107 = tpu.matmul %105, %106, %cst_34 {dimension_numbers = #tpu.dot_dimension_numbers<[1], [0], [0], [1], [0, 0, 1, 1], [], []>} : vector<16x16xbf16>, vector<16x8xbf16>, vector<16x8xf32> -> vector<16x8xf32>
    %108 = tpu.concatenate %59, %75, %91, %107 in 1 : vector<16x8xf32>, vector<16x8xf32>, vector<16x8xf32>, vector<16x8xf32> -> vector<16x32xf32>
    %109 = arith.truncf %108 : vector<16x32xf32> to vector<16x32xbf16>
    %c0_35 = arith.constant 0 : index
    %c0_36 = arith.constant 0 : index
    %c0_37 = arith.constant 0 : index
    %110 = vector.load %arg10[%c0_35, %c0_36, %c0_37] : memref<1x32x32xbf16, #tpu.memory_space<vmem>>, vector<1x32x32xbf16>
    %111 = vector.shape_cast %110 : vector<1x32x32xbf16> to vector<32x32xbf16>
    %cst_38 = arith.constant dense<0.000000e+00> : vector<16x32xf32>
    %112 = tpu.matmul %109, %111, %cst_38 {dimension_numbers = #tpu.dot_dimension_numbers<[1], [0], [0], [1], [0, 0, 1, 1], [], []>} : vector<16x32xbf16>, vector<32x32xbf16>, vector<16x32xf32> -> vector<16x32xf32>
    %c0_39 = arith.constant 0 : index
    %c0_40 = arith.constant 0 : index
    %c0_41 = arith.constant 0 : index
    %113 = vector.load %arg11[%c0_39, %c0_40, %c0_41] : memref<1x1x32xf32, #tpu.memory_space<vmem>>, vector<1x1x32xf32>
    %114 = vector.shape_cast %113 : vector<1x1x32xf32> to vector<1x32xf32>
    %115 = vector.broadcast %114 : vector<1x32xf32> to vector<16x32xf32>
    %116 = arith.addf %112, %115 : vector<16x32xf32>
    %117 = arith.addf %3, %116 : vector<16x32xf32>
    %c0_42 = arith.constant 0 : index
    %c0_43 = arith.constant 0 : index
    %c0_44 = arith.constant 0 : index
    %118 = vector.load %arg12[%c0_42, %c0_43, %c0_44] : memref<1x1x32xf32, #tpu.memory_space<vmem>>, vector<1x1x32xf32>
    %119 = vector.shape_cast %118 : vector<1x1x32xf32> to vector<1x32xf32>
    %c0_45 = arith.constant 0 : index
    %c0_46 = arith.constant 0 : index
    %c0_47 = arith.constant 0 : index
    %120 = vector.load %arg13[%c0_45, %c0_46, %c0_47] : memref<1x1x32xf32, #tpu.memory_space<vmem>>, vector<1x1x32xf32>
    %121 = vector.shape_cast %120 : vector<1x1x32xf32> to vector<1x32xf32>
    %cst_48 = arith.constant dense<0.000000e+00> : vector<16xf32>
    %122 = vector.multi_reduction <add>, %117, %cst_48 [1] : vector<16x32xf32> to vector<16xf32>
    %123 = vector.shape_cast %122 : vector<16xf32> to vector<16x1xf32>
    %cst_49 = arith.constant 3.200000e+01 : f32
    %124 = vector.broadcast %cst_49 : f32 to vector<16x1xf32>
    %125 = arith.divf %123, %124 : vector<16x1xf32>
    %126 = vector.broadcast %125 : vector<16x1xf32> to vector<16x32xf32>
    %127 = arith.subf %117, %126 : vector<16x32xf32>
    %128 = arith.mulf %127, %127 : vector<16x32xf32>
    %cst_50 = arith.constant dense<0.000000e+00> : vector<16xf32>
    %129 = vector.multi_reduction <add>, %128, %cst_50 [1] : vector<16x32xf32> to vector<16xf32>
    %130 = vector.shape_cast %129 : vector<16xf32> to vector<16x1xf32>
    %cst_51 = arith.constant 3.200000e+01 : f32
    %131 = vector.broadcast %cst_51 : f32 to vector<16x1xf32>
    %132 = arith.divf %130, %131 : vector<16x1xf32>
    %133 = vector.broadcast %125 : vector<16x1xf32> to vector<16x32xf32>
    %134 = arith.subf %117, %133 : vector<16x32xf32>
    %cst_52 = arith.constant 9.99999974E-6 : f32
    %135 = vector.broadcast %cst_52 : f32 to vector<16x1xf32>
    %136 = arith.addf %132, %135 : vector<16x1xf32>
    %137 = math.rsqrt %136 : vector<16x1xf32>
    %138 = vector.broadcast %137 : vector<16x1xf32> to vector<16x32xf32>
    %139 = arith.mulf %134, %138 : vector<16x32xf32>
    %140 = vector.broadcast %119 : vector<1x32xf32> to vector<16x32xf32>
    %141 = arith.mulf %139, %140 : vector<16x32xf32>
    %142 = vector.broadcast %121 : vector<1x32xf32> to vector<16x32xf32>
    %143 = arith.addf %141, %142 : vector<16x32xf32>
    %144 = arith.truncf %143 : vector<16x32xf32> to vector<16x32xbf16>
    %c0_53 = arith.constant 0 : index
    %c0_54 = arith.constant 0 : index
    %c0_55 = arith.constant 0 : index
    %145 = vector.load %arg14[%c0_53, %c0_54, %c0_55] : memref<1x32x64xbf16, #tpu.memory_space<vmem>>, vector<1x32x64xbf16>
    %146 = vector.shape_cast %145 : vector<1x32x64xbf16> to vector<32x64xbf16>
    %cst_56 = arith.constant dense<0.000000e+00> : vector<16x64xf32>
    %147 = tpu.matmul %144, %146, %cst_56 {dimension_numbers = #tpu.dot_dimension_numbers<[1], [0], [0], [1], [0, 0, 1, 1], [], []>} : vector<16x32xbf16>, vector<32x64xbf16>, vector<16x64xf32> -> vector<16x64xf32>
    %c0_57 = arith.constant 0 : index
    %c0_58 = arith.constant 0 : index
    %c0_59 = arith.constant 0 : index
    %148 = vector.load %arg15[%c0_57, %c0_58, %c0_59] : memref<1x1x64xf32, #tpu.memory_space<vmem>>, vector<1x1x64xf32>
    %149 = vector.shape_cast %148 : vector<1x1x64xf32> to vector<1x64xf32>
    %150 = vector.broadcast %149 : vector<1x64xf32> to vector<16x64xf32>
    %151 = arith.addf %147, %150 : vector<16x64xf32>
    %cst_60 = arith.constant 5.000000e-01 : f32
    %152 = vector.broadcast %cst_60 : f32 to vector<16x64xf32>
    %153 = arith.mulf %152, %151 : vector<16x64xf32>
    %cst_61 = arith.constant 4.471500e-02 : f32
    %154 = vector.broadcast %cst_61 : f32 to vector<16x64xf32>
    %155 = arith.mulf %154, %151 : vector<16x64xf32>
    %156 = arith.mulf %155, %151 : vector<16x64xf32>
    %157 = arith.mulf %156, %151 : vector<16x64xf32>
    %158 = arith.addf %151, %157 : vector<16x64xf32>
    %cst_62 = arith.constant 0.797884583 : f32
    %159 = vector.broadcast %cst_62 : f32 to vector<16x64xf32>
    %160 = arith.mulf %159, %158 : vector<16x64xf32>
    %161 = math.tanh %160 : vector<16x64xf32>
    %cst_63 = arith.constant 1.000000e+00 : f32
    %162 = vector.broadcast %cst_63 : f32 to vector<16x64xf32>
    %163 = arith.addf %162, %161 : vector<16x64xf32>
    %164 = arith.mulf %153, %163 : vector<16x64xf32>
    %165 = arith.truncf %164 : vector<16x64xf32> to vector<16x64xbf16>
    %c0_64 = arith.constant 0 : index
    %c0_65 = arith.constant 0 : index
    %c0_66 = arith.constant 0 : index
    %166 = vector.load %arg16[%c0_64, %c0_65, %c0_66] : memref<1x64x32xbf16, #tpu.memory_space<vmem>>, vector<1x64x32xbf16>
    %167 = vector.shape_cast %166 : vector<1x64x32xbf16> to vector<64x32xbf16>
    %cst_67 = arith.constant dense<0.000000e+00> : vector<16x32xf32>
    %168 = tpu.matmul %165, %167, %cst_67 {dimension_numbers = #tpu.dot_dimension_numbers<[1], [0], [0], [1], [0, 0, 1, 1], [], []>} : vector<16x64xbf16>, vector<64x32xbf16>, vector<16x32xf32> -> vector<16x32xf32>
    %c0_68 = arith.constant 0 : index
    %c0_69 = arith.constant 0 : index
    %c0_70 = arith.constant 0 : index
    %169 = vector.load %arg17[%c0_68, %c0_69, %c0_70] : memref<1x1x32xf32, #tpu.memory_space<vmem>>, vector<1x1x32xf32>
    %170 = vector.shape_cast %169 : vector<1x1x32xf32> to vector<1x32xf32>
    %171 = vector.broadcast %170 : vector<1x32xf32> to vector<16x32xf32>
    %172 = arith.addf %168, %171 : vector<16x32xf32>
    %173 = arith.addf %117, %172 : vector<16x32xf32>
    %c0_71 = arith.constant 0 : index
    %c0_72 = arith.constant 0 : index
    %174 = vector.load %arg43[%c0_71, %c0_72] : memref<16x32xf32, #tpu.memory_space<vmem>>, vector<16x32xf32>
    tpu.vector_store %arg43[%c0_71, %c0_72], %173 {strides = array<i32>} : memref<16x32xf32, #tpu.memory_space<vmem>>, vector<16x32xf32>,
    %c1_i32 = arith.constant 1 : i32
    %175 = arith.cmpi eq, %arg1, %c1_i32 : i32
    %176 = arith.extui %175 : i1 to i32
    %c0_i32_73 = arith.constant 0 : i32
    %177 = arith.cmpi ne, %176, %c0_i32_73 : i32
    scf.if %177 {
      %c0_74 = arith.constant 0 : index
      %c0_75 = arith.constant 0 : index
      %178 = vector.load %arg43[%c0_74, %c0_75] : memref<16x32xf32, #tpu.memory_space<vmem>>, vector<16x32xf32>
      %c0_76 = arith.constant 0 : index
      %c0_77 = arith.constant 0 : index
      %179 = vector.load %arg18[%c0_76, %c0_77] : memref<8x32xf32, #tpu.memory_space<vmem>>, vector<8x32xf32>
      %c0_78 = arith.constant 0 : index
      %c0_79 = arith.constant 0 : index
      %180 = vector.load %arg19[%c0_78, %c0_79] : memref<1x32xf32, #tpu.memory_space<vmem>>, vector<1x32xf32>
      %c0_80 = arith.constant 0 : index
      %c0_81 = arith.constant 0 : index
      %181 = vector.load %arg20[%c0_80, %c0_81] : memref<1x32xf32, #tpu.memory_space<vmem>>, vector<1x32xf32>
      %cst_82 = arith.constant dense<0.000000e+00> : vector<8xf32>
      %182 = vector.multi_reduction <add>, %179, %cst_82 [1] : vector<8x32xf32> to vector<8xf32>
      %183 = vector.shape_cast %182 : vector<8xf32> to vector<8x1xf32>
      %cst_83 = arith.constant 3.200000e+01 : f32
      %184 = vector.broadcast %cst_83 : f32 to vector<8x1xf32>
      %185 = arith.divf %183, %184 : vector<8x1xf32>
      %186 = vector.broadcast %185 : vector<8x1xf32> to vector<8x32xf32>
      %187 = arith.subf %179, %186 : vector<8x32xf32>
      %188 = arith.mulf %187, %187 : vector<8x32xf32>
      %cst_84 = arith.constant dense<0.000000e+00> : vector<8xf32>
      %189 = vector.multi_reduction <add>, %188, %cst_84 [1] : vector<8x32xf32> to vector<8xf32>
      %190 = vector.shape_cast %189 : vector<8xf32> to vector<8x1xf32>
      %cst_85 = arith.constant 3.200000e+01 : f32
      %191 = vector.broadcast %cst_85 : f32 to vector<8x1xf32>
      %192 = arith.divf %190, %191 : vector<8x1xf32>
      %193 = vector.broadcast %185 : vector<8x1xf32> to vector<8x32xf32>
      %194 = arith.subf %179, %193 : vector<8x32xf32>
      %cst_86 = arith.constant 9.99999974E-6 : f32
      %195 = vector.broadcast %cst_86 : f32 to vector<8x1xf32>
      %196 = arith.addf %192, %195 : vector<8x1xf32>
      %197 = math.rsqrt %196 : vector<8x1xf32>
      %198 = vector.broadcast %197 : vector<8x1xf32> to vector<8x32xf32>
      %199 = arith.mulf %194, %198 : vector<8x32xf32>
      %200 = vector.broadcast %180 : vector<1x32xf32> to vector<8x32xf32>
      %201 = arith.mulf %199, %200 : vector<8x32xf32>
      %202 = vector.broadcast %181 : vector<1x32xf32> to vector<8x32xf32>
      %203 = arith.addf %201, %202 : vector<8x32xf32>
      %204 = arith.truncf %203 : vector<8x32xf32> to vector<8x32xbf16>
      %c0_87 = arith.constant 0 : index
      %c0_88 = arith.constant 0 : index
      %205 = vector.load %arg21[%c0_87, %c0_88] : memref<32x96xbf16, #tpu.memory_space<vmem>>, vector<32x96xbf16>
      %cst_89 = arith.constant dense<0.000000e+00> : vector<8x96xf32>
      %206 = tpu.matmul %204, %205, %cst_89 {dimension_numbers = #tpu.dot_dimension_numbers<[1], [0], [0], [1], [0, 0, 1, 1], [], []>} : vector<8x32xbf16>, vector<32x96xbf16>, vector<8x96xf32> -> vector<8x96xf32>
      %c0_90 = arith.constant 0 : index
      %c0_91 = arith.constant 0 : index
      %207 = vector.load %arg22[%c0_90, %c0_91] : memref<1x96xf32, #tpu.memory_space<vmem>>, vector<1x96xf32>
      %208 = vector.broadcast %207 : vector<1x96xf32> to vector<8x96xf32>
      %209 = arith.addf %206, %208 : vector<8x96xf32>
      %210 = vector.extract_strided_slice %209 {offsets = [0, 0], sizes = [8, 32], strides = [1, 1]} : vector<8x96xf32> to vector<8x32xf32>
      %211 = vector.extract_strided_slice %209 {offsets = [0, 32], sizes = [8, 32], strides = [1, 1]} : vector<8x96xf32> to vector<8x32xf32>
      %212 = vector.extract_strided_slice %209 {offsets = [0, 64], sizes = [8, 32], strides = [1, 1]} : vector<8x96xf32> to vector<8x32xf32>
      %213 = arith.truncf %210 : vector<8x32xf32> to vector<8x32xbf16>
      %214 = arith.truncf %211 : vector<8x32xf32> to vector<8x32xbf16>
      %215 = arith.truncf %212 : vector<8x32xf32> to vector<8x32xbf16>
      %216 = vector.extract_strided_slice %213 {offsets = [0, 0], sizes = [8, 8], strides = [1, 1]} : vector<8x32xbf16> to vector<8x8xbf16>
      %217 = vector.extract_strided_slice %214 {offsets = [0, 0], sizes = [8, 8], strides = [1, 1]} : vector<8x32xbf16> to vector<8x8xbf16>
      %cst_92 = arith.constant dense<0.000000e+00> : vector<8x8xf32>
      %218 = tpu.matmul %216, %217, %cst_92 {dimension_numbers = #tpu.dot_dimension_numbers<[1], [1], [0], [0], [0, 0, 1, 0], [], []>} : vector<8x8xbf16>, vector<8x8xbf16>, vector<8x8xf32> -> vector<8x8xf32>
      %cst_93 = arith.constant dense<0xFF800000> : vector<8xf32>
      %219 = vector.multi_reduction <maximumf>, %218, %cst_93 [1] : vector<8x8xf32> to vector<8xf32>
      %220 = vector.shape_cast %219 : vector<8xf32> to vector<8x1xf32>
      %221 = vector.broadcast %220 : vector<8x1xf32> to vector<8x8xf32>
      %222 = arith.subf %218, %221 : vector<8x8xf32>
      %223 = math.exp %222 : vector<8x8xf32>
      %cst_94 = arith.constant dense<0.000000e+00> : vector<8xf32>
      %224 = vector.multi_reduction <add>, %223, %cst_94 [1] : vector<8x8xf32> to vector<8xf32>
      %225 = vector.shape_cast %224 : vector<8xf32> to vector<8x1xf32>
      %226 = tpu.reciprocal %225 {approx = true} : vector<8x1xf32> -> vector<8x1xf32>
      %227 = vector.broadcast %226 : vector<8x1xf32> to vector<8x8xf32>
      %228 = arith.mulf %223, %227 : vector<8x8xf32>
      %229 = arith.truncf %228 : vector<8x8xf32> to vector<8x8xbf16>
      %230 = vector.extract_strided_slice %215 {offsets = [0, 0], sizes = [8, 8], strides = [1, 1]} : vector<8x32xbf16> to vector<8x8xbf16>
      %cst_95 = arith.constant dense<0.000000e+00> : vector<8x8xf32>
      %231 = tpu.matmul %229, %230, %cst_95 {dimension_numbers = #tpu.dot_dimension_numbers<[1], [0], [0], [1], [0, 0, 1, 1], [], []>} : vector<8x8xbf16>, vector<8x8xbf16>, vector<8x8xf32> -> vector<8x8xf32>
      %232 = vector.extract_strided_slice %213 {offsets = [0, 8], sizes = [8, 8], strides = [1, 1]} : vector<8x32xbf16> to vector<8x8xbf16>
      %233 = vector.extract_strided_slice %214 {offsets = [0, 8], sizes = [8, 8], strides = [1, 1]} : vector<8x32xbf16> to vector<8x8xbf16>
      %cst_96 = arith.constant dense<0.000000e+00> : vector<8x8xf32>
      %234 = tpu.matmul %232, %233, %cst_96 {dimension_numbers = #tpu.dot_dimension_numbers<[1], [1], [0], [0], [0, 0, 1, 0], [], []>} : vector<8x8xbf16>, vector<8x8xbf16>, vector<8x8xf32> -> vector<8x8xf32>
      %cst_97 = arith.constant dense<0xFF800000> : vector<8xf32>
      %235 = vector.multi_reduction <maximumf>, %234, %cst_97 [1] : vector<8x8xf32> to vector<8xf32>
      %236 = vector.shape_cast %235 : vector<8xf32> to vector<8x1xf32>
      %237 = vector.broadcast %236 : vector<8x1xf32> to vector<8x8xf32>
      %238 = arith.subf %234, %237 : vector<8x8xf32>
      %239 = math.exp %238 : vector<8x8xf32>
      %cst_98 = arith.constant dense<0.000000e+00> : vector<8xf32>
      %240 = vector.multi_reduction <add>, %239, %cst_98 [1] : vector<8x8xf32> to vector<8xf32>
      %241 = vector.shape_cast %240 : vector<8xf32> to vector<8x1xf32>
      %242 = tpu.reciprocal %241 {approx = true} : vector<8x1xf32> -> vector<8x1xf32>
      %243 = vector.broadcast %242 : vector<8x1xf32> to vector<8x8xf32>
      %244 = arith.mulf %239, %243 : vector<8x8xf32>
      %245 = arith.truncf %244 : vector<8x8xf32> to vector<8x8xbf16>
      %246 = vector.extract_strided_slice %215 {offsets = [0, 8], sizes = [8, 8], strides = [1, 1]} : vector<8x32xbf16> to vector<8x8xbf16>
      %cst_99 = arith.constant dense<0.000000e+00> : vector<8x8xf32>
      %247 = tpu.matmul %245, %246, %cst_99 {dimension_numbers = #tpu.dot_dimension_numbers<[1], [0], [0], [1], [0, 0, 1, 1], [], []>} : vector<8x8xbf16>, vector<8x8xbf16>, vector<8x8xf32> -> vector<8x8xf32>
      %248 = vector.extract_strided_slice %213 {offsets = [0, 16], sizes = [8, 8], strides = [1, 1]} : vector<8x32xbf16> to vector<8x8xbf16>
      %249 = vector.extract_strided_slice %214 {offsets = [0, 16], sizes = [8, 8], strides = [1, 1]} : vector<8x32xbf16> to vector<8x8xbf16>
      %cst_100 = arith.constant dense<0.000000e+00> : vector<8x8xf32>
      %250 = tpu.matmul %248, %249, %cst_100 {dimension_numbers = #tpu.dot_dimension_numbers<[1], [1], [0], [0], [0, 0, 1, 0], [], []>} : vector<8x8xbf16>, vector<8x8xbf16>, vector<8x8xf32> -> vector<8x8xf32>
      %cst_101 = arith.constant dense<0xFF800000> : vector<8xf32>
      %251 = vector.multi_reduction <maximumf>, %250, %cst_101 [1] : vector<8x8xf32> to vector<8xf32>
      %252 = vector.shape_cast %251 : vector<8xf32> to vector<8x1xf32>
      %253 = vector.broadcast %252 : vector<8x1xf32> to vector<8x8xf32>
      %254 = arith.subf %250, %253 : vector<8x8xf32>
      %255 = math.exp %254 : vector<8x8xf32>
      %cst_102 = arith.constant dense<0.000000e+00> : vector<8xf32>
      %256 = vector.multi_reduction <add>, %255, %cst_102 [1] : vector<8x8xf32> to vector<8xf32>
      %257 = vector.shape_cast %256 : vector<8xf32> to vector<8x1xf32>
      %258 = tpu.reciprocal %257 {approx = true} : vector<8x1xf32> -> vector<8x1xf32>
      %259 = vector.broadcast %258 : vector<8x1xf32> to vector<8x8xf32>
      %260 = arith.mulf %255, %259 : vector<8x8xf32>
      %261 = arith.truncf %260 : vector<8x8xf32> to vector<8x8xbf16>
      %262 = vector.extract_strided_slice %215 {offsets = [0, 16], sizes = [8, 8], strides = [1, 1]} : vector<8x32xbf16> to vector<8x8xbf16>
      %cst_103 = arith.constant dense<0.000000e+00> : vector<8x8xf32>
      %263 = tpu.matmul %261, %262, %cst_103 {dimension_numbers = #tpu.dot_dimension_numbers<[1], [0], [0], [1], [0, 0, 1, 1], [], []>} : vector<8x8xbf16>, vector<8x8xbf16>, vector<8x8xf32> -> vector<8x8xf32>
      %264 = vector.extract_strided_slice %213 {offsets = [0, 24], sizes = [8, 8], strides = [1, 1]} : vector<8x32xbf16> to vector<8x8xbf16>
      %265 = vector.extract_strided_slice %214 {offsets = [0, 24], sizes = [8, 8], strides = [1, 1]} : vector<8x32xbf16> to vector<8x8xbf16>
      %cst_104 = arith.constant dense<0.000000e+00> : vector<8x8xf32>
      %266 = tpu.matmul %264, %265, %cst_104 {dimension_numbers = #tpu.dot_dimension_numbers<[1], [1], [0], [0], [0, 0, 1, 0], [], []>} : vector<8x8xbf16>, vector<8x8xbf16>, vector<8x8xf32> -> vector<8x8xf32>
      %cst_105 = arith.constant dense<0xFF800000> : vector<8xf32>
      %267 = vector.multi_reduction <maximumf>, %266, %cst_105 [1] : vector<8x8xf32> to vector<8xf32>
      %268 = vector.shape_cast %267 : vector<8xf32> to vector<8x1xf32>
      %269 = vector.broadcast %268 : vector<8x1xf32> to vector<8x8xf32>
      %270 = arith.subf %266, %269 : vector<8x8xf32>
      %271 = math.exp %270 : vector<8x8xf32>
      %cst_106 = arith.constant dense<0.000000e+00> : vector<8xf32>
      %272 = vector.multi_reduction <add>, %271, %cst_106 [1] : vector<8x8xf32> to vector<8xf32>
      %273 = vector.shape_cast %272 : vector<8xf32> to vector<8x1xf32>
      %274 = tpu.reciprocal %273 {approx = true} : vector<8x1xf32> -> vector<8x1xf32>
      %275 = vector.broadcast %274 : vector<8x1xf32> to vector<8x8xf32>
      %276 = arith.mulf %271, %275 : vector<8x8xf32>
      %277 = arith.truncf %276 : vector<8x8xf32> to vector<8x8xbf16>
      %278 = vector.extract_strided_slice %215 {offsets = [0, 24], sizes = [8, 8], strides = [1, 1]} : vector<8x32xbf16> to vector<8x8xbf16>
      %cst_107 = arith.constant dense<0.000000e+00> : vector<8x8xf32>
      %279 = tpu.matmul %277, %278, %cst_107 {dimension_numbers = #tpu.dot_dimension_numbers<[1], [0], [0], [1], [0, 0, 1, 1], [], []>} : vector<8x8xbf16>, vector<8x8xbf16>, vector<8x8xf32> -> vector<8x8xf32>
      %280 = tpu.concatenate %231, %247, %263, %279 in 1 : vector<8x8xf32>, vector<8x8xf32>, vector<8x8xf32>, vector<8x8xf32> -> vector<8x32xf32>
      %281 = arith.truncf %280 : vector<8x32xf32> to vector<8x32xbf16>
      %c0_108 = arith.constant 0 : index
      %c0_109 = arith.constant 0 : index
      %282 = vector.load %arg23[%c0_108, %c0_109] : memref<32x32xbf16, #tpu.memory_space<vmem>>, vector<32x32xbf16>
      %cst_110 = arith.constant dense<0.000000e+00> : vector<8x32xf32>
      %283 = tpu.matmul %281, %282, %cst_110 {dimension_numbers = #tpu.dot_dimension_numbers<[1], [0], [0], [1], [0, 0, 1, 1], [], []>} : vector<8x32xbf16>, vector<32x32xbf16>, vector<8x32xf32> -> vector<8x32xf32>
      %c0_111 = arith.constant 0 : index
      %c0_112 = arith.constant 0 : index
      %284 = vector.load %arg24[%c0_111, %c0_112] : memref<1x32xf32, #tpu.memory_space<vmem>>, vector<1x32xf32>
      %285 = vector.broadcast %284 : vector<1x32xf32> to vector<8x32xf32>
      %286 = arith.addf %283, %285 : vector<8x32xf32>
      %287 = arith.addf %179, %286 : vector<8x32xf32>
      %c0_113 = arith.constant 0 : index
      %c0_114 = arith.constant 0 : index
      %288 = vector.load %arg25[%c0_113, %c0_114] : memref<1x32xf32, #tpu.memory_space<vmem>>, vector<1x32xf32>
      %c0_115 = arith.constant 0 : index
      %c0_116 = arith.constant 0 : index
      %289 = vector.load %arg26[%c0_115, %c0_116] : memref<1x32xf32, #tpu.memory_space<vmem>>, vector<1x32xf32>
      %cst_117 = arith.constant dense<0.000000e+00> : vector<8xf32>
      %290 = vector.multi_reduction <add>, %287, %cst_117 [1] : vector<8x32xf32> to vector<8xf32>
      %291 = vector.shape_cast %290 : vector<8xf32> to vector<8x1xf32>
      %cst_118 = arith.constant 3.200000e+01 : f32
      %292 = vector.broadcast %cst_118 : f32 to vector<8x1xf32>
      %293 = arith.divf %291, %292 : vector<8x1xf32>
      %294 = vector.broadcast %293 : vector<8x1xf32> to vector<8x32xf32>
      %295 = arith.subf %287, %294 : vector<8x32xf32>
      %296 = arith.mulf %295, %295 : vector<8x32xf32>
      %cst_119 = arith.constant dense<0.000000e+00> : vector<8xf32>
      %297 = vector.multi_reduction <add>, %296, %cst_119 [1] : vector<8x32xf32> to vector<8xf32>
      %298 = vector.shape_cast %297 : vector<8xf32> to vector<8x1xf32>
      %cst_120 = arith.constant 3.200000e+01 : f32
      %299 = vector.broadcast %cst_120 : f32 to vector<8x1xf32>
      %300 = arith.divf %298, %299 : vector<8x1xf32>
      %301 = vector.broadcast %293 : vector<8x1xf32> to vector<8x32xf32>
      %302 = arith.subf %287, %301 : vector<8x32xf32>
      %cst_121 = arith.constant 9.99999974E-6 : f32
      %303 = vector.broadcast %cst_121 : f32 to vector<8x1xf32>
      %304 = arith.addf %300, %303 : vector<8x1xf32>
      %305 = math.rsqrt %304 : vector<8x1xf32>
      %306 = vector.broadcast %305 : vector<8x1xf32> to vector<8x32xf32>
      %307 = arith.mulf %302, %306 : vector<8x32xf32>
      %308 = vector.broadcast %288 : vector<1x32xf32> to vector<8x32xf32>
      %309 = arith.mulf %307, %308 : vector<8x32xf32>
      %310 = vector.broadcast %289 : vector<1x32xf32> to vector<8x32xf32>
      %311 = arith.addf %309, %310 : vector<8x32xf32>
      %312 = arith.truncf %311 : vector<8x32xf32> to vector<8x32xbf16>
      %c0_122 = arith.constant 0 : index
      %c0_123 = arith.constant 0 : index
      %313 = vector.load %arg27[%c0_122, %c0_123] : memref<32x32xbf16, #tpu.memory_space<vmem>>, vector<32x32xbf16>
      %cst_124 = arith.constant dense<0.000000e+00> : vector<8x32xf32>
      %314 = tpu.matmul %312, %313, %cst_124 {dimension_numbers = #tpu.dot_dimension_numbers<[1], [0], [0], [1], [0, 0, 1, 1], [], []>} : vector<8x32xbf16>, vector<32x32xbf16>, vector<8x32xf32> -> vector<8x32xf32>
      %c0_125 = arith.constant 0 : index
      %c0_126 = arith.constant 0 : index
      %315 = vector.load %arg28[%c0_125, %c0_126] : memref<1x32xf32, #tpu.memory_space<vmem>>, vector<1x32xf32>
      %316 = vector.broadcast %315 : vector<1x32xf32> to vector<8x32xf32>
      %317 = arith.addf %314, %316 : vector<8x32xf32>
      %318 = arith.truncf %178 : vector<16x32xf32> to vector<16x32xbf16>
      %c0_127 = arith.constant 0 : index
      %c0_128 = arith.constant 0 : index
      %319 = vector.load %arg29[%c0_127, %c0_128] : memref<32x64xbf16, #tpu.memory_space<vmem>>, vector<32x64xbf16>
      %cst_129 = arith.constant dense<0.000000e+00> : vector<16x64xf32>
      %320 = tpu.matmul %318, %319, %cst_129 {dimension_numbers = #tpu.dot_dimension_numbers<[1], [0], [0], [1], [0, 0, 1, 1], [], []>} : vector<16x32xbf16>, vector<32x64xbf16>, vector<16x64xf32> -> vector<16x64xf32>
      %c0_130 = arith.constant 0 : index
      %c0_131 = arith.constant 0 : index
      %321 = vector.load %arg30[%c0_130, %c0_131] : memref<1x64xf32, #tpu.memory_space<vmem>>, vector<1x64xf32>
      %322 = vector.broadcast %321 : vector<1x64xf32> to vector<16x64xf32>
      %323 = arith.addf %320, %322 : vector<16x64xf32>
      %324 = vector.extract_strided_slice %323 {offsets = [0, 0], sizes = [16, 32], strides = [1, 1]} : vector<16x64xf32> to vector<16x32xf32>
      %325 = vector.extract_strided_slice %323 {offsets = [0, 32], sizes = [16, 32], strides = [1, 1]} : vector<16x64xf32> to vector<16x32xf32>
      %326 = arith.truncf %317 : vector<8x32xf32> to vector<8x32xbf16>
      %327 = arith.truncf %324 : vector<16x32xf32> to vector<16x32xbf16>
      %328 = arith.truncf %325 : vector<16x32xf32> to vector<16x32xbf16>
      %329 = vector.extract_strided_slice %326 {offsets = [0, 0], sizes = [8, 8], strides = [1, 1]} : vector<8x32xbf16> to vector<8x8xbf16>
      %330 = vector.extract_strided_slice %327 {offsets = [0, 0], sizes = [16, 8], strides = [1, 1]} : vector<16x32xbf16> to vector<16x8xbf16>
      %cst_132 = arith.constant dense<0.000000e+00> : vector<8x16xf32>
      %331 = tpu.matmul %329, %330, %cst_132 {dimension_numbers = #tpu.dot_dimension_numbers<[1], [1], [0], [0], [0, 0, 1, 0], [], []>} : vector<8x8xbf16>, vector<16x8xbf16>, vector<8x16xf32> -> vector<8x16xf32>
      %cst_133 = arith.constant dense<0xFF800000> : vector<8xf32>
      %332 = vector.multi_reduction <maximumf>, %331, %cst_133 [1] : vector<8x16xf32> to vector<8xf32>
      %333 = vector.shape_cast %332 : vector<8xf32> to vector<8x1xf32>
      %334 = vector.broadcast %333 : vector<8x1xf32> to vector<8x16xf32>
      %335 = arith.subf %331, %334 : vector<8x16xf32>
      %336 = math.exp %335 : vector<8x16xf32>
      %cst_134 = arith.constant dense<0.000000e+00> : vector<8xf32>
      %337 = vector.multi_reduction <add>, %336, %cst_134 [1] : vector<8x16xf32> to vector<8xf32>
      %338 = vector.shape_cast %337 : vector<8xf32> to vector<8x1xf32>
      %339 = tpu.reciprocal %338 {approx = true} : vector<8x1xf32> -> vector<8x1xf32>
      %340 = vector.broadcast %339 : vector<8x1xf32> to vector<8x16xf32>
      %341 = arith.mulf %336, %340 : vector<8x16xf32>
      %342 = arith.truncf %341 : vector<8x16xf32> to vector<8x16xbf16>
      %343 = vector.extract_strided_slice %328 {offsets = [0, 0], sizes = [16, 8], strides = [1, 1]} : vector<16x32xbf16> to vector<16x8xbf16>
      %cst_135 = arith.constant dense<0.000000e+00> : vector<8x8xf32>
      %344 = tpu.matmul %342, %343, %cst_135 {dimension_numbers = #tpu.dot_dimension_numbers<[1], [0], [0], [1], [0, 0, 1, 1], [], []>} : vector<8x16xbf16>, vector<16x8xbf16>, vector<8x8xf32> -> vector<8x8xf32>
      %345 = vector.extract_strided_slice %326 {offsets = [0, 8], sizes = [8, 8], strides = [1, 1]} : vector<8x32xbf16> to vector<8x8xbf16>
      %346 = vector.extract_strided_slice %327 {offsets = [0, 8], sizes = [16, 8], strides = [1, 1]} : vector<16x32xbf16> to vector<16x8xbf16>
      %cst_136 = arith.constant dense<0.000000e+00> : vector<8x16xf32>
      %347 = tpu.matmul %345, %346, %cst_136 {dimension_numbers = #tpu.dot_dimension_numbers<[1], [1], [0], [0], [0, 0, 1, 0], [], []>} : vector<8x8xbf16>, vector<16x8xbf16>, vector<8x16xf32> -> vector<8x16xf32>
      %cst_137 = arith.constant dense<0xFF800000> : vector<8xf32>
      %348 = vector.multi_reduction <maximumf>, %347, %cst_137 [1] : vector<8x16xf32> to vector<8xf32>
      %349 = vector.shape_cast %348 : vector<8xf32> to vector<8x1xf32>
      %350 = vector.broadcast %349 : vector<8x1xf32> to vector<8x16xf32>
      %351 = arith.subf %347, %350 : vector<8x16xf32>
      %352 = math.exp %351 : vector<8x16xf32>
      %cst_138 = arith.constant dense<0.000000e+00> : vector<8xf32>
      %353 = vector.multi_reduction <add>, %352, %cst_138 [1] : vector<8x16xf32> to vector<8xf32>
      %354 = vector.shape_cast %353 : vector<8xf32> to vector<8x1xf32>
      %355 = tpu.reciprocal %354 {approx = true} : vector<8x1xf32> -> vector<8x1xf32>
      %356 = vector.broadcast %355 : vector<8x1xf32> to vector<8x16xf32>
      %357 = arith.mulf %352, %356 : vector<8x16xf32>
      %358 = arith.truncf %357 : vector<8x16xf32> to vector<8x16xbf16>
      %359 = vector.extract_strided_slice %328 {offsets = [0, 8], sizes = [16, 8], strides = [1, 1]} : vector<16x32xbf16> to vector<16x8xbf16>
      %cst_139 = arith.constant dense<0.000000e+00> : vector<8x8xf32>
      %360 = tpu.matmul %358, %359, %cst_139 {dimension_numbers = #tpu.dot_dimension_numbers<[1], [0], [0], [1], [0, 0, 1, 1], [], []>} : vector<8x16xbf16>, vector<16x8xbf16>, vector<8x8xf32> -> vector<8x8xf32>
      %361 = vector.extract_strided_slice %326 {offsets = [0, 16], sizes = [8, 8], strides = [1, 1]} : vector<8x32xbf16> to vector<8x8xbf16>
      %362 = vector.extract_strided_slice %327 {offsets = [0, 16], sizes = [16, 8], strides = [1, 1]} : vector<16x32xbf16> to vector<16x8xbf16>
      %cst_140 = arith.constant dense<0.000000e+00> : vector<8x16xf32>
      %363 = tpu.matmul %361, %362, %cst_140 {dimension_numbers = #tpu.dot_dimension_numbers<[1], [1], [0], [0], [0, 0, 1, 0], [], []>} : vector<8x8xbf16>, vector<16x8xbf16>, vector<8x16xf32> -> vector<8x16xf32>
      %cst_141 = arith.constant dense<0xFF800000> : vector<8xf32>
      %364 = vector.multi_reduction <maximumf>, %363, %cst_141 [1] : vector<8x16xf32> to vector<8xf32>
      %365 = vector.shape_cast %364 : vector<8xf32> to vector<8x1xf32>
      %366 = vector.broadcast %365 : vector<8x1xf32> to vector<8x16xf32>
      %367 = arith.subf %363, %366 : vector<8x16xf32>
      %368 = math.exp %367 : vector<8x16xf32>
      %cst_142 = arith.constant dense<0.000000e+00> : vector<8xf32>
      %369 = vector.multi_reduction <add>, %368, %cst_142 [1] : vector<8x16xf32> to vector<8xf32>
      %370 = vector.shape_cast %369 : vector<8xf32> to vector<8x1xf32>
      %371 = tpu.reciprocal %370 {approx = true} : vector<8x1xf32> -> vector<8x1xf32>
      %372 = vector.broadcast %371 : vector<8x1xf32> to vector<8x16xf32>
      %373 = arith.mulf %368, %372 : vector<8x16xf32>
      %374 = arith.truncf %373 : vector<8x16xf32> to vector<8x16xbf16>
      %375 = vector.extract_strided_slice %328 {offsets = [0, 16], sizes = [16, 8], strides = [1, 1]} : vector<16x32xbf16> to vector<16x8xbf16>
      %cst_143 = arith.constant dense<0.000000e+00> : vector<8x8xf32>
      %376 = tpu.matmul %374, %375, %cst_143 {dimension_numbers = #tpu.dot_dimension_numbers<[1], [0], [0], [1], [0, 0, 1, 1], [], []>} : vector<8x16xbf16>, vector<16x8xbf16>, vector<8x8xf32> -> vector<8x8xf32>
      %377 = vector.extract_strided_slice %326 {offsets = [0, 24], sizes = [8, 8], strides = [1, 1]} : vector<8x32xbf16> to vector<8x8xbf16>
      %378 = vector.extract_strided_slice %327 {offsets = [0, 24], sizes = [16, 8], strides = [1, 1]} : vector<16x32xbf16> to vector<16x8xbf16>
      %cst_144 = arith.constant dense<0.000000e+00> : vector<8x16xf32>
      %379 = tpu.matmul %377, %378, %cst_144 {dimension_numbers = #tpu.dot_dimension_numbers<[1], [1], [0], [0], [0, 0, 1, 0], [], []>} : vector<8x8xbf16>, vector<16x8xbf16>, vector<8x16xf32> -> vector<8x16xf32>
      %cst_145 = arith.constant dense<0xFF800000> : vector<8xf32>
      %380 = vector.multi_reduction <maximumf>, %379, %cst_145 [1] : vector<8x16xf32> to vector<8xf32>
      %381 = vector.shape_cast %380 : vector<8xf32> to vector<8x1xf32>
      %382 = vector.broadcast %381 : vector<8x1xf32> to vector<8x16xf32>
      %383 = arith.subf %379, %382 : vector<8x16xf32>
      %384 = math.exp %383 : vector<8x16xf32>
      %cst_146 = arith.constant dense<0.000000e+00> : vector<8xf32>
      %385 = vector.multi_reduction <add>, %384, %cst_146 [1] : vector<8x16xf32> to vector<8xf32>
      %386 = vector.shape_cast %385 : vector<8xf32> to vector<8x1xf32>
      %387 = tpu.reciprocal %386 {approx = true} : vector<8x1xf32> -> vector<8x1xf32>
      %388 = vector.broadcast %387 : vector<8x1xf32> to vector<8x16xf32>
      %389 = arith.mulf %384, %388 : vector<8x16xf32>
      %390 = arith.truncf %389 : vector<8x16xf32> to vector<8x16xbf16>
      %391 = vector.extract_strided_slice %328 {offsets = [0, 24], sizes = [16, 8], strides = [1, 1]} : vector<16x32xbf16> to vector<16x8xbf16>
      %cst_147 = arith.constant dense<0.000000e+00> : vector<8x8xf32>
      %392 = tpu.matmul %390, %391, %cst_147 {dimension_numbers = #tpu.dot_dimension_numbers<[1], [0], [0], [1], [0, 0, 1, 1], [], []>} : vector<8x16xbf16>, vector<16x8xbf16>, vector<8x8xf32> -> vector<8x8xf32>
      %393 = tpu.concatenate %344, %360, %376, %392 in 1 : vector<8x8xf32>, vector<8x8xf32>, vector<8x8xf32>, vector<8x8xf32> -> vector<8x32xf32>
      %394 = arith.truncf %393 : vector<8x32xf32> to vector<8x32xbf16>
      %c0_148 = arith.constant 0 : index
      %c0_149 = arith.constant 0 : index
      %395 = vector.load %arg31[%c0_148, %c0_149] : memref<32x32xbf16, #tpu.memory_space<vmem>>, vector<32x32xbf16>
      %cst_150 = arith.constant dense<0.000000e+00> : vector<8x32xf32>
      %396 = tpu.matmul %394, %395, %cst_150 {dimension_numbers = #tpu.dot_dimension_numbers<[1], [0], [0], [1], [0, 0, 1, 1], [], []>} : vector<8x32xbf16>, vector<32x32xbf16>, vector<8x32xf32> -> vector<8x32xf32>
      %c0_151 = arith.constant 0 : index
      %c0_152 = arith.constant 0 : index
      %397 = vector.load %arg32[%c0_151, %c0_152] : memref<1x32xf32, #tpu.memory_space<vmem>>, vector<1x32xf32>
      %398 = vector.broadcast %397 : vector<1x32xf32> to vector<8x32xf32>
      %399 = arith.addf %396, %398 : vector<8x32xf32>
      %400 = arith.addf %287, %399 : vector<8x32xf32>
      %c0_153 = arith.constant 0 : index
      %c0_154 = arith.constant 0 : index
      %401 = vector.load %arg33[%c0_153, %c0_154] : memref<1x32xf32, #tpu.memory_space<vmem>>, vector<1x32xf32>
      %c0_155 = arith.constant 0 : index
      %c0_156 = arith.constant 0 : index
      %402 = vector.load %arg34[%c0_155, %c0_156] : memref<1x32xf32, #tpu.memory_space<vmem>>, vector<1x32xf32>
      %cst_157 = arith.constant dense<0.000000e+00> : vector<8xf32>
      %403 = vector.multi_reduction <add>, %400, %cst_157 [1] : vector<8x32xf32> to vector<8xf32>
      %404 = vector.shape_cast %403 : vector<8xf32> to vector<8x1xf32>
      %cst_158 = arith.constant 3.200000e+01 : f32
      %405 = vector.broadcast %cst_158 : f32 to vector<8x1xf32>
      %406 = arith.divf %404, %405 : vector<8x1xf32>
      %407 = vector.broadcast %406 : vector<8x1xf32> to vector<8x32xf32>
      %408 = arith.subf %400, %407 : vector<8x32xf32>
      %409 = arith.mulf %408, %408 : vector<8x32xf32>
      %cst_159 = arith.constant dense<0.000000e+00> : vector<8xf32>
      %410 = vector.multi_reduction <add>, %409, %cst_159 [1] : vector<8x32xf32> to vector<8xf32>
      %411 = vector.shape_cast %410 : vector<8xf32> to vector<8x1xf32>
      %cst_160 = arith.constant 3.200000e+01 : f32
      %412 = vector.broadcast %cst_160 : f32 to vector<8x1xf32>
      %413 = arith.divf %411, %412 : vector<8x1xf32>
      %414 = vector.broadcast %406 : vector<8x1xf32> to vector<8x32xf32>
      %415 = arith.subf %400, %414 : vector<8x32xf32>
      %cst_161 = arith.constant 9.99999974E-6 : f32
      %416 = vector.broadcast %cst_161 : f32 to vector<8x1xf32>
      %417 = arith.addf %413, %416 : vector<8x1xf32>
      %418 = math.rsqrt %417 : vector<8x1xf32>
      %419 = vector.broadcast %418 : vector<8x1xf32> to vector<8x32xf32>
      %420 = arith.mulf %415, %419 : vector<8x32xf32>
      %421 = vector.broadcast %401 : vector<1x32xf32> to vector<8x32xf32>
      %422 = arith.mulf %420, %421 : vector<8x32xf32>
      %423 = vector.broadcast %402 : vector<1x32xf32> to vector<8x32xf32>
      %424 = arith.addf %422, %423 : vector<8x32xf32>
      %425 = arith.truncf %424 : vector<8x32xf32> to vector<8x32xbf16>
      %c0_162 = arith.constant 0 : index
      %c0_163 = arith.constant 0 : index
      %426 = vector.load %arg35[%c0_162, %c0_163] : memref<32x64xbf16, #tpu.memory_space<vmem>>, vector<32x64xbf16>
      %cst_164 = arith.constant dense<0.000000e+00> : vector<8x64xf32>
      %427 = tpu.matmul %425, %426, %cst_164 {dimension_numbers = #tpu.dot_dimension_numbers<[1], [0], [0], [1], [0, 0, 1, 1], [], []>} : vector<8x32xbf16>, vector<32x64xbf16>, vector<8x64xf32> -> vector<8x64xf32>
      %c0_165 = arith.constant 0 : index
      %c0_166 = arith.constant 0 : index
      %428 = vector.load %arg36[%c0_165, %c0_166] : memref<1x64xf32, #tpu.memory_space<vmem>>, vector<1x64xf32>
      %429 = vector.broadcast %428 : vector<1x64xf32> to vector<8x64xf32>
      %430 = arith.addf %427, %429 : vector<8x64xf32>
      %cst_167 = arith.constant 5.000000e-01 : f32
      %431 = vector.broadcast %cst_167 : f32 to vector<8x64xf32>
      %432 = arith.mulf %431, %430 : vector<8x64xf32>
      %cst_168 = arith.constant 4.471500e-02 : f32
      %433 = vector.broadcast %cst_168 : f32 to vector<8x64xf32>
      %434 = arith.mulf %433, %430 : vector<8x64xf32>
      %435 = arith.mulf %434, %430 : vector<8x64xf32>
      %436 = arith.mulf %435, %430 : vector<8x64xf32>
      %437 = arith.addf %430, %436 : vector<8x64xf32>
      %cst_169 = arith.constant 0.797884583 : f32
      %438 = vector.broadcast %cst_169 : f32 to vector<8x64xf32>
      %439 = arith.mulf %438, %437 : vector<8x64xf32>
      %440 = math.tanh %439 : vector<8x64xf32>
      %cst_170 = arith.constant 1.000000e+00 : f32
      %441 = vector.broadcast %cst_170 : f32 to vector<8x64xf32>
      %442 = arith.addf %441, %440 : vector<8x64xf32>
      %443 = arith.mulf %432, %442 : vector<8x64xf32>
      %444 = arith.truncf %443 : vector<8x64xf32> to vector<8x64xbf16>
      %c0_171 = arith.constant 0 : index
      %c0_172 = arith.constant 0 : index
      %445 = vector.load %arg37[%c0_171, %c0_172] : memref<64x32xbf16, #tpu.memory_space<vmem>>, vector<64x32xbf16>
      %cst_173 = arith.constant dense<0.000000e+00> : vector<8x32xf32>
      %446 = tpu.matmul %444, %445, %cst_173 {dimension_numbers = #tpu.dot_dimension_numbers<[1], [0], [0], [1], [0, 0, 1, 1], [], []>} : vector<8x64xbf16>, vector<64x32xbf16>, vector<8x32xf32> -> vector<8x32xf32>
      %c0_174 = arith.constant 0 : index
      %c0_175 = arith.constant 0 : index
      %447 = vector.load %arg38[%c0_174, %c0_175] : memref<1x32xf32, #tpu.memory_space<vmem>>, vector<1x32xf32>
      %448 = vector.broadcast %447 : vector<1x32xf32> to vector<8x32xf32>
      %449 = arith.addf %446, %448 : vector<8x32xf32>
      %450 = arith.addf %400, %449 : vector<8x32xf32>
      %c0_176 = arith.constant 0 : index
      %c0_177 = arith.constant 0 : index
      %451 = vector.load %arg41[%c0_176, %c0_177] : memref<8x32xf32, #tpu.memory_space<vmem>>, vector<8x32xf32>
      tpu.vector_store %arg41[%c0_176, %c0_177], %450 {strides = array<i32>} : memref<8x32xf32, #tpu.memory_space<vmem>>, vector<8x32xf32>,
      %452 = arith.truncf %450 : vector<8x32xf32> to vector<8x32xbf16>
      %c0_178 = arith.constant 0 : index
      %c0_179 = arith.constant 0 : index
      %453 = vector.load %arg39[%c0_178, %c0_179] : memref<32x128xbf16, #tpu.memory_space<vmem>>, vector<32x128xbf16>
      %cst_180 = arith.constant dense<0.000000e+00> : vector<8x128xf32>
      %454 = tpu.matmul %452, %453, %cst_180 {dimension_numbers = #tpu.dot_dimension_numbers<[1], [0], [0], [1], [0, 0, 1, 1], [], []>} : vector<8x32xbf16>, vector<32x128xbf16>, vector<8x128xf32> -> vector<8x128xf32>
      %c0_181 = arith.constant 0 : index
      %c0_182 = arith.constant 0 : index
      %455 = vector.load %arg40[%c0_181, %c0_182] : memref<1x128xf32, #tpu.memory_space<vmem>>, vector<1x128xf32>
      %456 = vector.broadcast %455 : vector<1x128xf32> to vector<8x128xf32>
      %457 = arith.addf %454, %456 : vector<8x128xf32>
      %c0_183 = arith.constant 0 : index
      %c0_184 = arith.constant 0 : index
      %458 = vector.load %arg42[%c0_183, %c0_184] : memref<8x128xf32, #tpu.memory_space<vmem>>, vector<8x128xf32>
      tpu.vector_store %arg42[%c0_183, %c0_184], %457 {strides = array<i32>} : memref<8x128xf32, #tpu.memory_space<vmem>>, vector<8x128xf32>,
    } else {
    }
    return
  }
  func.func @transform_0(%arg0: i32, %arg1: i32) -> (i32, i32) {
    %c0_i32 = arith.constant 0 : i32
    %c0_i32_0 = arith.constant 0 : i32
    return %arg0, %c0_i32 : i32, i32
  }
  func.func @transform_1(%arg0: i32, %arg1: i32) -> (i32, i32) {
    %c0_i32 = arith.constant 0 : i32
    %c0_i32_0 = arith.constant 0 : i32
    %c0_i32_1 = arith.constant 0 : i32
    return %c0_i32, %c0_i32_0 : i32, i32
  }
  func.func @transform_2(%arg0: i32, %arg1: i32) -> (i32, i32) {
    %c0_i32 = arith.constant 0 : i32
    %c0_i32_0 = arith.constant 0 : i32
    %c0_i32_1 = arith.constant 0 : i32
    return %c0_i32, %c0_i32_0 : i32, i32
  }
  func.func @transform_3(%arg0: i32, %arg1: i32) -> (i32, i32) {
    %c0_i32 = arith.constant 0 : i32
    %c0_i32_0 = arith.constant 0 : i32
    %c0_i32_1 = arith.constant 0 : i32
    return %c0_i32, %c0_i32_0 : i32, i32
  }
  func.func @transform_4(%arg0: i32, %arg1: i32) -> (i32, i32, i32) {
    %c0_i32 = arith.constant 0 : i32
    %c0_i32_0 = arith.constant 0 : i32
    %c0_i32_1 = arith.constant 0 : i32
    return %arg1, %c0_i32, %c0_i32_0 : i32, i32, i32
  }
  func.func @transform_5(%arg0: i32, %arg1: i32) -> (i32, i32, i32) {
    %c0_i32 = arith.constant 0 : i32
    %c0_i32_0 = arith.constant 0 : i32
    %c0_i32_1 = arith.constant 0 : i32
    return %arg1, %c0_i32, %c0_i32_0 : i32, i32, i32
  }
  func.func @transform_6(%arg0: i32, %arg1: i32) -> (i32, i32, i32) {
    %c0_i32 = arith.constant 0 : i32
    %c0_i32_0 = arith.constant 0 : i32
    %c0_i32_1 = arith.constant 0 : i32
    return %arg1, %c0_i32, %c0_i32_0 : i32, i32, i32
  }
  func.func @transform_7(%arg0: i32, %arg1: i32) -> (i32, i32, i32) {
    %c0_i32 = arith.constant 0 : i32
    %c0_i32_0 = arith.constant 0 : i32
    %c0_i32_1 = arith.constant 0 : i32
    return %arg1, %c0_i32, %c0_i32_0 : i32, i32, i32
  }
  func.func @transform_8(%arg0: i32, %arg1: i32) -> (i32, i32, i32) {
    %c0_i32 = arith.constant 0 : i32
    %c0_i32_0 = arith.constant 0 : i32
    %c0_i32_1 = arith.constant 0 : i32
    return %arg1, %c0_i32, %c0_i32_0 : i32, i32, i32
  }
  func.func @transform_9(%arg0: i32, %arg1: i32) -> (i32, i32, i32) {
    %c0_i32 = arith.constant 0 : i32
    %c0_i32_0 = arith.constant 0 : i32
    %c0_i32_1 = arith.constant 0 : i32
    return %arg1, %c0_i32, %c0_i32_0 : i32, i32, i32
  }
  func.func @transform_10(%arg0: i32, %arg1: i32) -> (i32, i32, i32) {
    %c0_i32 = arith.constant 0 : i32
    %c0_i32_0 = arith.constant 0 : i32
    %c0_i32_1 = arith.constant 0 : i32
    return %arg1, %c0_i32, %c0_i32_0 : i32, i32, i32
  }
  func.func @transform_11(%arg0: i32, %arg1: i32) -> (i32, i32, i32) {
    %c0_i32 = arith.constant 0 : i32
    %c0_i32_0 = arith.constant 0 : i32
    %c0_i32_1 = arith.constant 0 : i32
    return %arg1, %c0_i32, %c0_i32_0 : i32, i32, i32
  }
  func.func @transform_12(%arg0: i32, %arg1: i32) -> (i32, i32, i32) {
    %c0_i32 = arith.constant 0 : i32
    %c0_i32_0 = arith.constant 0 : i32
    %c0_i32_1 = arith.constant 0 : i32
    return %arg1, %c0_i32, %c0_i32_0 : i32, i32, i32
  }
  func.func @transform_13(%arg0: i32, %arg1: i32) -> (i32, i32, i32) {
    %c0_i32 = arith.constant 0 : i32
    %c0_i32_0 = arith.constant 0 : i32
    %c0_i32_1 = arith.constant 0 : i32
    return %arg1, %c0_i32, %c0_i32_0 : i32, i32, i32
  }
  func.func @transform_14(%arg0: i32, %arg1: i32) -> (i32, i32, i32) {
    %c0_i32 = arith.constant 0 : i32
    %c0_i32_0 = arith.constant 0 : i32
    %c0_i32_1 = arith.constant 0 : i32
    return %arg1, %c0_i32, %c0_i32_0 : i32, i32, i32
  }
  func.func @transform_15(%arg0: i32, %arg1: i32) -> (i32, i32, i32) {
    %c0_i32 = arith.constant 0 : i32
    %c0_i32_0 = arith.constant 0 : i32
    %c0_i32_1 = arith.constant 0 : i32
    return %arg1, %c0_i32, %c0_i32_0 : i32, i32, i32
  }
  func.func @transform_16(%arg0: i32, %arg1: i32) -> (i32, i32) {
    %c0_i32 = arith.constant 0 : i32
    %c0_i32_0 = arith.constant 0 : i32
    %c0_i32_1 = arith.constant 0 : i32
    return %c0_i32, %c0_i32_0 : i32, i32
  }
  func.func @transform_17(%arg0: i32, %arg1: i32) -> (i32, i32) {
    %c0_i32 = arith.constant 0 : i32
    %c0_i32_0 = arith.constant 0 : i32
    %c0_i32_1 = arith.constant 0 : i32
    return %c0_i32, %c0_i32_0 : i32, i32
  }
  func.func @transform_18(%arg0: i32, %arg1: i32) -> (i32, i32) {
    %c0_i32 = arith.constant 0 : i32
    %c0_i32_0 = arith.constant 0 : i32
    %c0_i32_1 = arith.constant 0 : i32
    return %c0_i32, %c0_i32_0 : i32, i32
  }
  func.func @transform_19(%arg0: i32, %arg1: i32) -> (i32, i32) {
    %c0_i32 = arith.constant 0 : i32
    %c0_i32_0 = arith.constant 0 : i32
    %c0_i32_1 = arith.constant 0 : i32
    return %c0_i32, %c0_i32_0 : i32, i32
  }
  func.func @transform_20(%arg0: i32, %arg1: i32) -> (i32, i32) {
    %c0_i32 = arith.constant 0 : i32
    %c0_i32_0 = arith.constant 0 : i32
    %c0_i32_1 = arith.constant 0 : i32
    return %c0_i32, %c0_i32_0 : i32, i32
  }
  func.func @transform_21(%arg0: i32, %arg1: i32) -> (i32, i32) {
    %c0_i32 = arith.constant 0 : i32
    %c0_i32_0 = arith.constant 0 : i32
    %c0_i32_1 = arith.constant 0 : i32
    return %c0_i32, %c0_i32_0 : i32, i32
  }
  func.func @transform_22(%arg0: i32, %arg1: i32) -> (i32, i32) {
    %c0_i32 = arith.constant 0 : i32
    %c0_i32_0 = arith.constant 0 : i32
    %c0_i32_1 = arith.constant 0 : i32
    return %c0_i32, %c0_i32_0 : i32, i32
  }
  func.func @transform_23(%arg0: i32, %arg1: i32) -> (i32, i32) {
    %c0_i32 = arith.constant 0 : i32
    %c0_i32_0 = arith.constant 0 : i32
    %c0_i32_1 = arith.constant 0 : i32
    return %c0_i32, %c0_i32_0 : i32, i32
  }
  func.func @transform_24(%arg0: i32, %arg1: i32) -> (i32, i32) {
    %c0_i32 = arith.constant 0 : i32
    %c0_i32_0 = arith.constant 0 : i32
    %c0_i32_1 = arith.constant 0 : i32
    return %c0_i32, %c0_i32_0 : i32, i32
  }
  func.func @transform_25(%arg0: i32, %arg1: i32) -> (i32, i32) {
    %c0_i32 = arith.constant 0 : i32
    %c0_i32_0 = arith.constant 0 : i32
    %c0_i32_1 = arith.constant 0 : i32
    return %c0_i32, %c0_i32_0 : i32, i32
  }
  func.func @transform_26(%arg0: i32, %arg1: i32) -> (i32, i32) {
    %c0_i32 = arith.constant 0 : i32
    %c0_i32_0 = arith.constant 0 : i32
    %c0_i32_1 = arith.constant 0 : i32
    return %c0_i32, %c0_i32_0 : i32, i32
  }
  func.func @transform_27(%arg0: i32, %arg1: i32) -> (i32, i32) {
    %c0_i32 = arith.constant 0 : i32
    %c0_i32_0 = arith.constant 0 : i32
    %c0_i32_1 = arith.constant 0 : i32
    return %c0_i32, %c0_i32_0 : i32, i32
  }
  func.func @transform_28(%arg0: i32, %arg1: i32) -> (i32, i32) {
    %c0_i32 = arith.constant 0 : i32
    %c0_i32_0 = arith.constant 0 : i32
    %c0_i32_1 = arith.constant 0 : i32
    return %c0_i32, %c0_i32_0 : i32, i32
  }
  func.func @transform_29(%arg0: i32, %arg1: i32) -> (i32, i32) {
    %c0_i32 = arith.constant 0 : i32
    %c0_i32_0 = arith.constant 0 : i32
    %c0_i32_1 = arith.constant 0 : i32
    return %c0_i32, %c0_i32_0 : i32, i32
  }
  func.func @transform_30(%arg0: i32, %arg1: i32) -> (i32, i32) {
    %c0_i32 = arith.constant 0 : i32
    %c0_i32_0 = arith.constant 0 : i32
    %c0_i32_1 = arith.constant 0 : i32
    return %c0_i32, %c0_i32_0 : i32, i32
  }
  func.func @transform_31(%arg0: i32, %arg1: i32) -> (i32, i32) {
    %c0_i32 = arith.constant 0 : i32
    %c0_i32_0 = arith.constant 0 : i32
    %c0_i32_1 = arith.constant 0 : i32
    return %c0_i32, %c0_i32_0 : i32, i32
  }
  func.func @transform_32(%arg0: i32, %arg1: i32) -> (i32, i32) {
    %c0_i32 = arith.constant 0 : i32
    %c0_i32_0 = arith.constant 0 : i32
    %c0_i32_1 = arith.constant 0 : i32
    return %c0_i32, %c0_i32_0 : i32, i32
  }
  func.func @transform_33(%arg0: i32, %arg1: i32) -> (i32, i32) {
    %c0_i32 = arith.constant 0 : i32
    %c0_i32_0 = arith.constant 0 : i32
    %c0_i32_1 = arith.constant 0 : i32
    return %c0_i32, %c0_i32_0 : i32, i32
  }
  func.func @transform_34(%arg0: i32, %arg1: i32) -> (i32, i32) {
    %c0_i32 = arith.constant 0 : i32
    %c0_i32_0 = arith.constant 0 : i32
    %c0_i32_1 = arith.constant 0 : i32
    return %c0_i32, %c0_i32_0 : i32, i32
  }
  func.func @transform_35(%arg0: i32, %arg1: i32) -> (i32, i32) {
    %c0_i32 = arith.constant 0 : i32
    %c0_i32_0 = arith.constant 0 : i32
    %c0_i32_1 = arith.constant 0 : i32
    return %c0_i32, %c0_i32_0 : i32, i32
  }
  func.func @transform_36(%arg0: i32, %arg1: i32) -> (i32, i32) {
    %c0_i32 = arith.constant 0 : i32
    %c0_i32_0 = arith.constant 0 : i32
    %c0_i32_1 = arith.constant 0 : i32
    return %c0_i32, %c0_i32_0 : i32, i32
  }
  func.func @transform_37(%arg0: i32, %arg1: i32) -> (i32, i32) {
    %c0_i32 = arith.constant 0 : i32
    %c0_i32_0 = arith.constant 0 : i32
    %c0_i32_1 = arith.constant 0 : i32
    return %c0_i32, %c0_i32_0 : i32, i32
  }
  func.func @transform_38(%arg0: i32, %arg1: i32) -> (i32, i32) {
    %c0_i32 = arith.constant 0 : i32
    %c0_i32_0 = arith.constant 0 : i32
    %c0_i32_1 = arith.constant 0 : i32
    return %c0_i32, %c0_i32_0 : i32, i32
  }
  func.func @transform_39(%arg0: i32, %arg1: i32) -> (i32, i32) {
    %c0_i32 = arith.constant 0 : i32
    %c0_i32_0 = arith.constant 0 : i32
    return %arg0, %c0_i32 : i32, i32
  }
  func.func @transform_40(%arg0: i32, %arg1: i32) -> (i32, i32) {
    %c0_i32 = arith.constant 0 : i32
    %c0_i32_0 = arith.constant 0 : i32
    return %arg0, %c0_i32 : i32, i32
  }
}

</mosaic_0001>

<bundles_post_ra>
// kernel: bsi_block_pred_forward.1
= control target key start
LH: loop header
LB: loop body
LE: loop exit
PB: predicated region body
PF: predicated region fallthrough
CT: control target
= control target key end

     0   :  { %s6720_s6 = smov 1   ;;  %s6721_s10 = smov 2   ;;  %s7948_s0 = inlined_call_operand.smem [shape: u32[41], index: -1, kind: input, shape index: {}] }
   0x1   :  { %s6830_s5 = sld [smem:[%s7948_s0]]   ;;  %s6722_s14 = smov 3  }
   0x2   :  { %s6835_s9 = sld [smem:[%s7948_s0 + %s6720_s6]]   ;;  %s6723_s18 = smov 4  }
   0x3   :  { %s6840_s13 = sld [smem:[%s7948_s0 + %s6721_s10]]   ;;  %s6724_s22 = smov 5  }
   0x4   :  { %s6845_s17 = sld [smem:[%s7948_s0 + %s6722_s14]]   ;;  %s6725_s26 = smov 6  }
   0x5   :  { %s6850_s21 = sld [smem:[%s7948_s0 + %s6723_s18]]   ;;  %s6726_s30 = smov 7  }
   0x6   :  { %s6855_s25 = sld [smem:[%s7948_s0 + %s6724_s22]]   ;;  %s6727_s4 = smov 8  }
   0x7   :  { %7991 = sst [smem:[#allocation58_spill]] %s6830_s5  ;;  %s6728_s10 = smov 9  }
   0x8   :  { %7992 = sst [smem:[#allocation59_spill]] %s6835_s9  ;;  %s6729_s15 = smov 10  }
   0x9   :  { %7993 = sst [smem:[#allocation60_spill]] %s6840_s13  ;;  %s6730_s20 = smov 11  }
   0xa   :  { %7994 = sst [smem:[#allocation61_spill]] %s6845_s17  ;;  %s6732_s1 = smov 13  }
   0xb   :  { %7995 = sst [smem:[#allocation62_spill]] %s6850_s21  ;;  %s6733_s7 = smov 14  }
   0xc   :  { %7996 = sst [smem:[#allocation63_spill]] %s6855_s25  ;;  %s6735_s22 = smov 16  }
   0xd   :  { %s6860_s29 = sld [smem:[%s7948_s0 + %s6725_s26]]   ;;  %s6731_s26 = smov 12  }
   0xe   :  { %s6865_s3 = sld [smem:[%s7948_s0 + %s6726_s30]]   ;;  %s6736_s28 = smov 17  }
   0xf   :  { %s6870_s8 = sld [smem:[%s7948_s0 + %s6727_s4]]  }
  0x10   :  { %s6875_s14 = sld [smem:[%s7948_s0 + %s6728_s10]]  }
  0x11   :  { %s6880_s19 = sld [smem:[%s7948_s0 + %s6729_s15]]   ;;  %s6734_s15 = smov 15  }
  0x12   :  { %s6885_s24 = sld [smem:[%s7948_s0 + %s6730_s20]]  }
  0x13   :  { %7997 = sst [smem:[#allocation64_spill]] %s6860_s29 }
  0x14   :  { %7998 = sst [smem:[#allocation65_spill]] %s6865_s3 }
  0x15   :  { %7999 = sst [smem:[#allocation66_spill]] %s6870_s8 }
  0x16   :  { %8000 = sst [smem:[#allocation67_spill]] %s6875_s14 }
  0x17   :  { %8001 = sst [smem:[#allocation68_spill]] %s6880_s19 }
  0x18   :  { %8002 = sst [smem:[#allocation69_spill]] %s6885_s24 }
  0x19   :  { %s6890_s30 = sld [smem:[%s7948_s0 + %s6731_s26]]  }
  0x1a   :  { %s6895_s6 = sld [smem:[%s7948_s0 + %s6732_s1]]  }
  0x1b   :  { %s6900_s12 = sld [smem:[%s7948_s0 + %s6733_s7]]   ;;  %s6737_s7 = smov 18  }
  0x1c   :  { %s6905_s20 = sld [smem:[%s7948_s0 + %s6734_s15]]   ;;  %s6738_s15 = smov 19  }
  0x1d   :  { %s6910_s27 = sld [smem:[%s7948_s0 + %s6735_s22]]   ;;  %s6739_s22 = smov 20  }
  0x1e   :  { %s6915_s4 = sld [smem:[%s7948_s0 + %s6736_s28]]   ;;  %s6740_s28 = smov 21  }
  0x1f   :  { %8003 = sst [smem:[#allocation70_spill]] %s6890_s30 }
  0x20   :  { %8004 = sst [smem:[#allocation71_spill]] %s6895_s6 }
  0x21   :  { %8005 = sst [smem:[#allocation72_spill]] %s6900_s12 }
  0x22   :  { %8006 = sst [smem:[#allocation73_spill]] %s6905_s20 }
  0x23   :  { %8007 = sst [smem:[#allocation74_spill]] %s6910_s27 }
  0x24   :  { %8008 = sst [smem:[#allocation75_spill]] %s6915_s4 }
  0x25   :  { %s6920_s9 = sld [smem:[%s7948_s0 + %s6737_s7]]   ;;  %s6741_s7 = smov 22  }
  0x26   :  { %s6925_s17 = sld [smem:[%s7948_s0 + %s6738_s15]]   ;;  %s6742_s15 = smov 23  }
  0x27   :  { %s6930_s13 = sld [smem:[%s7948_s0 + %s6739_s22]]   ;;  %s6743_s22 = smov 24  }
  0x28   :  { %s6935_s12 = sld [smem:[%s7948_s0 + %s6740_s28]]   ;;  %s6744_s28 = smov 25  }
  0x29   :  { %s6940_s30 = sld [smem:[%s7948_s0 + %s6741_s7]]   ;;  %s6745_s7 = smov 26  }
  0x2a   :  { %s6950_s8 = sld [smem:[%s7948_s0 + %s6743_s22]]   ;;  %s6747_s22 = smov 28  }
  0x2b   :  { %8009 = sst [smem:[#allocation76_spill]] %s6920_s9 }
  0x2c   :  { %8010 = sst [smem:[#allocation77_spill]] %s6925_s17 }
  0x2d   :  { %8011 = sst [smem:[#allocation78_spill]] %s6930_s13 }
  0x2e   :  { %8012 = sst [smem:[#allocation79_spill]] %s6935_s12 }
  0x2f   :  { %8013 = sst [smem:[#allocation80_spill]] %s6940_s30 }
  0x30   :  { %s6945_s17 = sld [smem:[%s7948_s0 + %s6742_s15]]   ;;  %s6746_s15 = smov 27  }
  0x31   :  { %8015 = sst [smem:[#allocation82_spill]] %s6950_s8 }
  0x32   :  { %s6955_s12 = sld [smem:[%s7948_s0 + %s6744_s28]]   ;;  %s6748_s28 = smov 29  }
  0x33   :  { %s6960_s29 = sld [smem:[%s7948_s0 + %s6745_s7]]   ;;  %s6749_s7 = smov 30  }
  0x34   :  { %s6965_s5 = sld [smem:[%s7948_s0 + %s6746_s15]]   ;;  %s6750_s15 = smov 31  }
  0x35   :  { %s6970_s20 = sld [smem:[%s7948_s0 + %s6747_s22]]   ;;  %s6751_s22 = smov 32  }
  0x36   :  { %8014 = sst [smem:[#allocation81_spill]] %s6945_s17 }
  0x37   :  { %s6980_s6 = sld [smem:[%s7948_s0 + %s6749_s7]]   ;;  %s6753_s7 = smov 34  }
  0x38   :  { %8016 = sst [smem:[#allocation83_spill]] %s6955_s12 }
  0x39   :  { %8017 = sst [smem:[#allocation84_spill]] %s6960_s29 }
  0x3a   :  { %8018 = sst [smem:[#allocation85_spill]] %s6965_s5 }
  0x3b   :  { %8019 = sst [smem:[#allocation86_spill]] %s6970_s20 }
  0x3c   :  { %s6975_s12 = sld [smem:[%s7948_s0 + %s6748_s28]]   ;;  %s6752_s28 = smov 33  }
  0x3d   :  { %8021 = sst [smem:[#allocation88_spill]] %s6980_s6 }
  0x3e   :  { %s6985_s19 = sld [smem:[%s7948_s0 + %s6750_s15]]   ;;  %s6754_s15 = smov 35  }
  0x3f   :  { %s6990_s3 = sld [smem:[%s7948_s0 + %s6751_s22]]   ;;  %s6755_s22 = smov 36  }
  0x40   :  { %s6995_s21 = sld [smem:[%s7948_s0 + %s6752_s28]]   ;;  %s6756_s28 = smov 37  }
  0x41   :  { %s7010_s5 = sld [smem:[%s7948_s0 + %s6755_s22]]   ;;  %s6759_s22 = smov 40  }
  0x42   :  { %8020 = sst [smem:[#allocation87_spill]] %s6975_s12 }
  0x43   :  { %s7000_s12 = sld [smem:[%s7948_s0 + %s6753_s7]]   ;;  %s6757_s7 = smov 38  }
  0x44   :  { %8022 = sst [smem:[#allocation89_spill]] %s6985_s19 }
  0x45   :  { %8023 = sst [smem:[#allocation90_spill]] %s6990_s3 }
  0x46   :  { %8024 = sst [smem:[#allocation91_spill]] %s6995_s21 }
  0x47   :  { %s7005_s19 = sld [smem:[%s7948_s0 + %s6754_s15]]   ;;  %s6758_s15 = smov 39  }
  0x48   :  { %8027 = sst [smem:[#allocation94_spill]] %s7010_s5 }
  0x49   :  { %8025 = sst [smem:[#allocation92_spill]] %s7000_s12 }
  0x4a   :  { %s7015_s21 = sld [smem:[%s7948_s0 + %s6756_s28]]  }
  0x4b   :  { %s7020_s8 = sld [smem:[%s7948_s0 + %s6757_s7]]  }
  0x4c   :  { %s7030_s5 = sld [smem:[%s7948_s0 + %s6759_s22]]  }
  0x4d   :  { %8026 = sst [smem:[#allocation93_spill]] %s7005_s19 }
  0x4e   :  { %s7025_s19 = sld [smem:[%s7948_s0 + %s6758_s15]]  }
  0x50   :  { %8028 = sst [smem:[#allocation95_spill]] %s7015_s21 }
  0x51   :  { %8029 = sst [smem:[#allocation96_spill]] %s7020_s8 }
  0x52   :  { %8031 = sst [smem:[#allocation98_spill]] %s7030_s5 }
  0x54   :  { %8030 = sst [smem:[#allocation97_spill]] %s7025_s19 }
  0x55   :  { %87 = vsyncpa [#allocation4], 0 }
  0x56   :  { %89 = vsyncpa [#allocation4 + $0x1], 0 }
  0x57   :  { %90 = vsyncpa [#allocation7], 0 }
  0x58   :  { %92 = vsyncpa [#allocation7 + $0x1], 0 }
  0x59   :  { %93 = vsyncpa [#allocation10], 0 }
  0x5a   :  { %95 = vsyncpa [#allocation10 + $0x1], 0 }
  0x5b   :  { %96 = vsyncpa [#allocation13], 0 }
  0x5c   :  { %98 = vsyncpa [#allocation13 + $0x1], 0 }
  0x5d   :  { %99 = vsyncpa [#allocation16], 0 }
  0x5e   :  { %101 = vsyncpa [#allocation16 + $0x1], 0 }
  0x5f   :  { %102 = vsyncpa [#allocation19], 0 }
  0x60   :  { %103 = vsyncpa [#allocation22], 0 }
  0x61   :  { %104 = vsyncpa [#allocation25], 0 }
  0x62   :  { %105 = vsyncpa [#allocation28], 0 }
  0x63   :  { %106 = vsyncpa [#allocation31], 0 }
  0x64   :  { %107 = vsyncpa [#allocation34], 0 }
  0x65   :  { %108 = vsyncpa [#allocation37], 0 }
  0x66   :  { %109 = vsyncpa [#allocation40], 0 }
  0x67   :  { %110 = vsyncpa [#allocation5], 0 }
  0x68   :  { %112 = vsyncpa [#allocation5 + $0x1], 0  ;;  %s7032_s0 = smov 0   ;;  %s7034_s28 = smov 0  }
  0x69   :  { %s7036_s1 = smov 0   ;;  %s7038_s2 = smov 0  }
  0x6a   :  { %s7040_s7 = smov 0   ;;  %s7042_s10 = smov 0  }
  0x6b   :  { %s7044_s11 = smov 0   ;;  %s7046_s15 = smov 0  }
  0x6c   :  { %s7048_s16 = smov 0   ;;  %s7050_s18 = smov 0  }
  0x6d   :  { %s7052_s22 = smov 0  }
  0x6e LB: > { %s8032_s24 = sld [smem:[#allocation69_spill]]  ;;  %s7088_s23 = sadd.s32 4294967295, %s6718_s22   ;;  %s6686_s1 = sphi %s7036_s1, %s8144_s1   ;;  %s6682_s28 = sphi %s7034_s28, %s8143_s28   ;;  %s6678_s0 = sphi %s7032_s0, %s8142_s0   ;;  %s6718_s22 = sphi %s7052_s22, %s118_s22   ;;  %s6714_s18 = sphi %s7050_s18, %s8141_s18   ;;  %s6710_s16 = sphi %s7048_s16, %s8140_s16   ;;  %s6706_s15 = sphi %s7046_s15, %s8139_s15   ;;  %s6702_s11 = sphi %s7044_s11, %s8138_s11   ;;  %s6698_s10 = sphi %s7042_s10, %s8137_s10   ;;  %s6694_s7 = sphi %s7040_s7, %s8146_s7   ;;  %s6690_s2 = sphi %s7038_s2, %s8145_s2  }
  0x6f   : > { %s8033_s14 = sld [smem:[#allocation67_spill]]  ;;  %p4870_p0 = scmp.ge.s32.totalorder %s6718_s22, 1 }
  0x70   : > { %s8034_s25 = sld [smem:[#allocation63_spill]]  ;;  %p7963_p1 = scmp.eq.s32.totalorder %s7088_s23, 0 }
  0x71   : > { %8035 = sst [smem:[#allocation99_spill]] %s6698_s10  ;;  %p1071_p2 = scmp.lt.s32.totalorder %s6718_s22, 5 }
  0x72   : > { %8036 = sst [smem:[#allocation100_spill]] %s6702_s11  ;;  %s6760_s19 = smov [#allocation17]  }
  0x73   : > { %8037 = sst [smem:[#allocation101_spill]] %s6706_s15  ;;  %p7093_p3 = pnand %p4870_p0, %p1071_p2 }
  0x74   : > { %8038 = sst [smem:[#allocation102_spill]] %s6710_s16  ;;  %s1093_s8 = sshll.u32 %s6760_s19, 4  ;;  %s1094_s8 = int_to_ptr.vmem [resolvable:$true] %s1093_s8 }
  0x75   : > { %8039 = sst [smem:[#allocation103_spill]] %s6714_s18  ;;  %p5455_p4 = pneg %p7093_p3 }
  0x76   : > { %s8040_s26 = scalar_select %p7093_p3, 1, 0 }
  0x77   : > { %s6761_s21 = smov [#allocation18]   ;;  %p7101_p5 = pnand %p5455_p4, %p7963_p1 }
  0x78   : > { %s1104_s5 = sshll.u32 %s6761_s21, 4  ;;  %s6762_s15 = smov [#allocation21]   ;;  %s1105_s5 = int_to_ptr.vmem [resolvable:$true] %s1104_s5 }
  0x79   : > { %s8041_s11 = scalar_select %p7101_p5, 1, 0 }
  0x7a   : > { %s1129_s30 = sshll.u32 %s6762_s15, 4  ;;  %p7109_p6 = pneg %p7101_p5  ;;  %s7105_s30 = int_to_ptr.vmem [resolvable:$true] %s1129_s30 }
  0x7b   : > { %s5891_s19 = scalar_lea.vmem %s1094_s8, 128  ;;  %p5899_p10 = scmp.lt.s32.totalorder %s1094_s8, %s1094_s8 }
  0x7c   : > { %s8042_s9 = scalar_select %p7109_p6, 1, 0 }
  0x7d   : > { %p5892_p7 = scmp.ne.s32.totalorder %s1094_s8, %s5891_s19  ;;  %p5900_p11 = scmp.lt.s32.totalorder %s5891_s19, %s5891_s19 }
  0x7f   : > { %p5894_p8 = pnand %p5892_p7, %p7109_p6  ;;  %p5901_p12 = por %p5900_p11, %p5899_p10 }
  0x81   : > { %p5895_p9 = pneg %p5894_p8 }
  0x83   : > { %p5902_p13 = pnand %p5901_p12, %p5895_p9 }
  0x85   : > { %5905 = shalt.err (!%p5902_p13)
}
  0x86   : > { %s8043_s27 = sld [smem:[#allocation74_spill]]  ;;  %s5917_s21 = scalar_lea.vmem %s1105_s5, 16 }
  0x87   : > { %p5918_p0 = scmp.ne.s32.totalorder %s1105_s5, %s5917_s21  ;;  %s5924_s15 = scalar_lea.vmem %s1105_s5, 32 }
  0x88   : > { %p5925_p1 = scmp.lt.s32.totalorder %s1105_s5, %s1105_s5  ;;  %p5926_p3 = scmp.lt.s32.totalorder %s5924_s15, %s5917_s21 }
  0x89   : > { %p5920_p2 = pnand %p5918_p0, %p7109_p6 }
  0x8a   : > { %p5927_p7 = por %p5926_p3, %p5925_p1 }
  0x8b   : > { %p5921_p4 = pneg %p5920_p2 }
  0x8c   : > { %5458 = dma.hbm_to_vmem [thread:$0]  (!%p7101_p5), %s8043_s27, 128, %s1094_s8, [#allocation16]  }
  0x8d   : > { %p5928_p8 = pnand %p5927_p7, %p5921_p4 }
  0x8f   : > { %5931 = shalt.err (!%p5928_p8)
}
  0x90   : > { %s8044_s4 = sld [smem:[#allocation75_spill]]  ;;  %s5943_s8 = scalar_lea.vmem %s7105_s30, 16 }
  0x91   : > { %p5944_p9 = scmp.ne.s32.totalorder %s7105_s30, %s5943_s8  ;;  %s5950_s19 = scalar_lea.vmem %s7105_s30, 32 }
  0x92   : > { %p5951_p12 = scmp.lt.s32.totalorder %s7105_s30, %s7105_s30  ;;  %p5952_p1 = scmp.lt.s32.totalorder %s5950_s19, %s5943_s8 }
  0x93   : > { %p5946_p10 = pnand %p5944_p9, %p7109_p6 }
  0x94   : > { %p5953_p3 = por %p5952_p1, %p5951_p12 }
  0x95   : > { %p5947_p11 = pneg %p5946_p10 }
  0x96   : > { %5461 = dma.hbm_to_vmem [thread:$0]  (!%p7101_p5), %s8044_s4, 16, %s1105_s5, [#allocation19]  }
  0x97   : > { %p5954_p13 = pnand %p5953_p3, %p5947_p11 }
  0x99   : > { %5957 = shalt.err (!%p5954_p13)
}
  0x9a   : > { %s8045_s13 = sld [smem:[#allocation78_spill]]  ;;  %s6763_s21 = smov [#allocation24]  }
  0x9b   : > { %s1154_s5 = sshll.u32 %s6763_s21, 4  ;;  %s6764_s15 = smov [#allocation27]   ;;  %s1155_s5 = int_to_ptr.vmem [resolvable:$true] %s1154_s5 }
  0x9c   : > { %s1179_s4 = sshll.u32 %s6764_s15, 4  ;;  %s5969_s27 = scalar_lea.vmem %s1155_s5, 16  ;;  %s1180_s4 = int_to_ptr.vmem [resolvable:$true] %s1179_s4 }
  0x9d   : > { %p5970_p0 = scmp.ne.s32.totalorder %s1155_s5, %s5969_s27  ;;  %s5976_s8 = scalar_lea.vmem %s1155_s5, 32 }
  0x9e   : > { %p5977_p7 = scmp.lt.s32.totalorder %s1155_s5, %s1155_s5  ;;  %p5978_p8 = scmp.lt.s32.totalorder %s5976_s8, %s5969_s27 }
  0x9f   : > { %p5972_p2 = pnand %p5970_p0, %p7109_p6 }
  0xa0   : > { %5467 = dma.hbm_to_vmem [thread:$0]  (!%p7101_p5), %s8045_s13, 16, %s7105_s30, [#allocation22]  }
  0xa1   : > { %p5973_p4 = pneg %p5972_p2  ;;  %p5979_p9 = por %p5978_p8, %p5977_p7 }
  0xa3   : > { %p5980_p10 = pnand %p5979_p9, %p5973_p4 }
  0xa5   : > { %5983 = shalt.err (!%p5980_p10)
}
  0xa6   : > { %s8046_s17 = sld [smem:[#allocation81_spill]]  ;;  %s5995_s30 = scalar_lea.vmem %s1180_s4, 16 }
  0xa7   : > { %p5996_p11 = scmp.ne.s32.totalorder %s1180_s4, %s5995_s30  ;;  %s6002_s19 = scalar_lea.vmem %s1180_s4, 32 }
  0xa8   : > { %p6003_p3 = scmp.lt.s32.totalorder %s1180_s4, %s1180_s4  ;;  %p6004_p13 = scmp.lt.s32.totalorder %s6002_s19, %s5995_s30 }
  0xa9   : > { %p5998_p12 = pnand %p5996_p11, %p7109_p6 }
  0xaa   : > { %p6005_p0 = por %p6004_p13, %p6003_p3 }
  0xab   : > { %p5999_p1 = pneg %p5998_p12 }
  0xac   : > { %5473 = dma.hbm_to_vmem [thread:$0]  (!%p7101_p5), %s8046_s17, 16, %s1155_s5, [#allocation25]  }
  0xad   : > { %p6006_p2 = pnand %p6005_p0, %p5999_p1 }
  0xaf   : > { %6009 = shalt.err (!%p6006_p2)
}
  0xb0   : > { %s8047_s29 = sld [smem:[#allocation84_spill]]  ;;  %s6765_s27 = smov [#allocation30]  }
  0xb1   : > { %s1203_s21 = sshll.u32 %s6765_s27, 4  ;;  %s6766_s5 = smov [#allocation33]   ;;  %s1204_s21 = int_to_ptr.vmem [resolvable:$true] %s1203_s21 }
  0xb2   : > { %s1227_s15 = sshll.u32 %s6766_s5, 4  ;;  %s6021_s8 = scalar_lea.vmem %s1204_s21, 16  ;;  %s1228_s15 = int_to_ptr.vmem [resolvable:$true] %s1227_s15 }
  0xb3   : > { %p6022_p4 = scmp.ne.s32.totalorder %s1204_s21, %s6021_s8  ;;  %s6028_s13 = scalar_lea.vmem %s1204_s21, 32 }
  0xb4   : > { %p6029_p9 = scmp.lt.s32.totalorder %s1204_s21, %s1204_s21  ;;  %p6030_p10 = scmp.lt.s32.totalorder %s6028_s13, %s6021_s8 }
  0xb5   : > { %p6024_p7 = pnand %p6022_p4, %p7109_p6 }
  0xb6   : > { %5479 = dma.hbm_to_vmem [thread:$0]  (!%p7101_p5), %s8047_s29, 16, %s1180_s4, [#allocation28]  }
  0xb7   : > { %p6025_p8 = pneg %p6024_p7  ;;  %p6031_p11 = por %p6030_p10, %p6029_p9 }
  0xb9   : > { %p6032_p12 = pnand %p6031_p11, %p6025_p8 }
  0xbb   : > { %6035 = shalt.err (!%p6032_p12)
}
  0xbc   : > { %s8048_s20 = sld [smem:[#allocation86_spill]]  ;;  %s6047_s4 = scalar_lea.vmem %s1228_s15, 16 }
  0xbd   : > { %p6048_p1 = scmp.ne.s32.totalorder %s1228_s15, %s6047_s4  ;;  %s6054_s30 = scalar_lea.vmem %s1228_s15, 32 }
  0xbe   : > { %p6055_p0 = scmp.lt.s32.totalorder %s1228_s15, %s1228_s15  ;;  %p6056_p2 = scmp.lt.s32.totalorder %s6054_s30, %s6047_s4 }
  0xbf   : > { %p6050_p3 = pnand %p6048_p1, %p7109_p6 }
  0xc0   : > { %p6057_p4 = por %p6056_p2, %p6055_p0 }
  0xc1   : > { %p6051_p13 = pneg %p6050_p3 }
  0xc2   : > { %5485 = dma.hbm_to_vmem [thread:$0]  (!%p7101_p5), %s8048_s20, 16, %s1204_s21, [#allocation31]  }
  0xc3   : > { %p6058_p7 = pnand %p6057_p4, %p6051_p13 }
  0xc5   : > { %6061 = shalt.err (!%p6058_p7)
}
  0xc6   : > { %s8049_s6 = sld [smem:[#allocation88_spill]]  ;;  %s6767_s13 = smov [#allocation36]  }
  0xc7   : > { %s1249_s19 = sshll.u32 %s6767_s13, 4  ;;  %s6768_s27 = smov [#allocation39]   ;;  %s1250_s19 = int_to_ptr.vmem [resolvable:$true] %s1249_s19 }
  0xc8   : > { %s1273_s21 = sshll.u32 %s6768_s27, 4  ;;  %s6073_s5 = scalar_lea.vmem %s1250_s19, 16  ;;  %s1274_s21 = int_to_ptr.vmem [resolvable:$true] %s1273_s21 }
  0xc9   : > { %p6074_p8 = scmp.ne.s32.totalorder %s1250_s19, %s6073_s5  ;;  %s6080_s8 = scalar_lea.vmem %s1250_s19, 32 }
  0xca   : > { %p6081_p11 = scmp.lt.s32.totalorder %s1250_s19, %s1250_s19  ;;  %p6082_p12 = scmp.lt.s32.totalorder %s6080_s8, %s6073_s5 }
  0xcb   : > { %p6076_p9 = pnand %p6074_p8, %p7109_p6 }
  0xcc   : > { %5491 = dma.hbm_to_vmem [thread:$0]  (!%p7101_p5), %s8049_s6, 16, %s1228_s15, [#allocation34]  }
  0xcd   : > { %p6077_p10 = pneg %p6076_p9  ;;  %p6083_p1 = por %p6082_p12, %p6081_p11 }
  0xcf   : > { %p6084_p3 = pnand %p6083_p1, %p6077_p10 }
  0xd1   : > { %6087 = shalt.err (!%p6084_p3)
}
  0xd2   : > { %s8050_s3 = sld [smem:[#allocation90_spill]]  ;;  %s6099_s15 = scalar_lea.vmem %s1274_s21, 16 }
  0xd3   : > { %p6100_p13 = scmp.ne.s32.totalorder %s1274_s21, %s6099_s15  ;;  %s6106_s4 = scalar_lea.vmem %s1274_s21, 32 }
  0xd4   : > { %p6107_p4 = scmp.lt.s32.totalorder %s1274_s21, %s1274_s21  ;;  %p6108_p7 = scmp.lt.s32.totalorder %s6106_s4, %s6099_s15 }
  0xd5   : > { %p6102_p0 = pnand %p6100_p13, %p7109_p6 }
  0xd6   : > { %p6109_p8 = por %p6108_p7, %p6107_p4 }
  0xd7   : > { %p6103_p2 = pneg %p6102_p0 }
  0xd8   : > { %5497 = dma.hbm_to_vmem [thread:$0]  (!%p7101_p5), %s8050_s3, 16, %s1250_s19, [#allocation37]  }
  0xd9   : > { %p6110_p9 = pnand %p6109_p8, %p6103_p2 }
  0xdb   : > { %6113 = shalt.err (!%p6110_p9)
}
  0xdc   : > { %s8051_s12 = sld [smem:[#allocation92_spill]]  ;;  %s4869_s30 = sadd.s32 4294967294, %s6718_s22  }
  0xdd   : > { %s127_s13 = sadd.s32 1, %s6710_s16  ;;  %s130_s19 = sadd.s32 1, %s6714_s18 }
  0xde   : > { %p128_p10 = scmp.ge.s32.totalorder %s127_s13, 2  ;;  %s226_s27 = sadd.s32 1, %s6698_s10 }
  0xdf   : > { %p233_p11 = scmp.ne.s32.totalorder %s6698_s10, %s6694_s7  ;;  %p234_p12 = scmp.eq.s32.totalorder %s6718_s22, 0 }
  0xe0   : > { %s8148_s13 = smov (%p128_p10, %s127_s13), 0  ;;  %s8150_s19 = smov (!%p128_p10, %s130_s19), %s6714_s18 }
  0xe1   : > { %8052 = sst [smem:[#allocation104_spill]] %s8148_s13  ;;  %p7176_p1 = por %p234_p12, %p233_p11 }
  0xe2   : > { %5503 = dma.hbm_to_vmem [thread:$0]  (!%p7101_p5), %s8051_s12, 16, %s1274_s21, [#allocation40]  }
  0xe3   : > { %s223_s21 = ssub.s32 %s6710_s16, %s8148_s13  ;;  %p132_p3 = scmp.ge.s32.totalorder %s8150_s19, 2 }
  0xe4   : > { %p224_p13 = scmp.eq.s32.totalorder %s223_s21, 0  ;;  %p239_p0 = scmp.ne.s32.totalorder %s6694_s7, %s6690_s2 }
  0xe5   : > { %s1021_s8 = sadd.s32 1, %s6686_s1  ;;  %s8152_s19 = smov (%p132_p3, %s8150_s19), 0 }
  0xe6   : > { %8054 = sst [smem:[#allocation105_spill]] %s8152_s19  ;;  %p8056_p2 = scmp.eq.s32.totalorder %s7088_s23, 0 }
  0xe7   : > { %s7186_s15 = scalar_select %p224_p13, %s6698_s10, %s226_s27  }
  0xe8   : > { %p7190_p4 = por %p8056_p2, %p239_p0  ;;  %s1018_s3 = ssub.s32 %s6714_s18, %s8152_s19 }
  0xe9   : > { %8055 = sst [smem:[#allocation106_spill]] %s7186_s15  ;;  %p1019_p7 = scmp.eq.s32.totalorder %s1018_s3, 0 }
  0xea   : > { %s8057_s4 = scalar_select %p7190_p4, 1, 0 }
  0xeb   : > { %p1031_p8 = scmp.ne.s32.totalorder %s6686_s1, %s6682_s28  ;;  %p1032_p9 = scmp.eq.s32.totalorder %s7088_s23, 3 }
  0xec   : > { %p1037_p10 = scmp.ne.s32.totalorder %s6682_s28, %s6678_s0  ;;  %p1038_p12 = scmp.eq.s32.totalorder %s4869_s30, 3 }
  0xed   : > { %s7202_s2 = scalar_select %p1019_p7, %s6686_s1, %s1021_s8  }
  0xee   : > { %p7204_p11 = por %p1032_p9, %p1031_p8  ;;  %p5553_p3 = scmp.lt.s32.totalorder %s6718_s22, 4 }
  0xef   : > { %s7210_s27 = sand.u32 1, %s6698_s10   ;;  %p7212_p13 = por %p1038_p12, %p1037_p10 }
  0xf0   : > { %s8058_s21 = scalar_select %p7204_p11, 1, 0 }
  0xf1   : > { %s8059_s6 = scalar_select %p7212_p13, 1, 0 }
  0xf2   : > { %s7217_s3 = sshll.u32 %s6710_s16, 4  ;;  %p7221_p0 = pnand %p5553_p3, %p7176_p1 }
  0xf3   : > { %s7226_s30 = sand.u32 1, %s6718_s22   ;;  %s7230_s12 = scalar_lea.hbm %s8034_s25, %s7217_s3 }
  0xf4   : > { %s8060_s8 = scalar_select %p7221_p0, 1, 0 }
  0xf5   : > { %s1333_s17 = scalar_lea.vmem [#allocation6], %s7210_s27  ;;  %s6114_s19 = scalar_lea.hbm %s7230_s12, 16 }
  0xf6   : > { %s1340_s20 = sshll.u32 %s1333_s17, 4  ;;  %p6115_p2 = scmp.ne.s32.totalorder %s7230_s12, %s6114_s19  ;;  %s1341_s20 = int_to_ptr.vmem [resolvable:$true] %s1340_s20 }
  0xf7   : > { %p7238_p1 = pneg %p7221_p0  ;;  %s6119_s13 = scalar_lea.hbm %s8034_s25, 32 }
  0xf8   : > { %p6120_p9 = scmp.lt.s32.totalorder %s7230_s12, %s8034_s25  ;;  %p6121_p10 = scmp.lt.s32.totalorder %s6119_s13, %s6114_s19 }
  0xf9   : > { %s8061_s5 = scalar_select %p7238_p1, 1, 0 }
  0xfa   : > { %p6117_p7 = pnand %p7238_p1, %p6115_p2  ;;  %p6122_p12 = por %p6121_p10, %p6120_p9 }
  0xfc   : > { %p6118_p8 = pneg %p6117_p7 }
  0xfe   : > { %p6123_p3 = pnand %p6122_p12, %p6118_p8 }
 0x100   : > { %6126 = shalt.err (!%p6123_p3)
}
 0x101   : > { %s6127_s17 = scalar_lea.vmem %s1341_s20, 16  ;;  %s6769_s29 = smov [#allocation6]  }
 0x102   : > { %p6128_p13 = scmp.ne.s32.totalorder %s1341_s20, %s6127_s17  ;;  %s6132_s18 = sshll.u32 %s6769_s29, 4  ;;  %s6133_s18 = int_to_ptr.vmem [resolvable:$false] %s6132_s18 }
 0x103   : > { %s6134_s16 = scalar_lea.vmem %s6133_s18, 32  ;;  %p6135_p5 = scmp.lt.s32.totalorder %s1341_s20, %s6133_s18 }
 0x104   : > { %p6130_p11 = pnand %p6128_p13, %p7238_p1  ;;  %p6136_p6 = scmp.lt.s32.totalorder %s6134_s16, %s6127_s17 }
 0x106   : > { %p6131_p4 = pneg %p6130_p11  ;;  %p6137_p2 = por %p6136_p6, %p6135_p5 }
 0x108   : > { %p6138_p7 = pnand %p6137_p2, %p6131_p4 }
 0x10a   : > { %6141 = shalt.err (!%p6138_p7)
}
 0x10b   : > { %s8062_s13 = scalar_lea.sflag [#allocation7], %s7226_s30  ;;  %s7256_s29 = scalar_lea.hbm %s8033_s14, %s7217_s3 }
 0x10c   : > { %5513 = dma.hbm_to_vmem [thread:$0]  (!%p7221_p0), %s7230_s12, 16, %s1341_s20, %s8062_s13  }
 0x10d   : > { %s1383_s16 = scalar_lea.vmem [#allocation9], %s7210_s27  ;;  %s7982_s19 = scalar_lea.sflag [#allocation10], %s7226_s30 }
 0x10e   : > { %s1390_s18 = sshll.u32 %s1383_s16, 4  ;;  %s6142_s17 = scalar_lea.hbm %s7256_s29, 16  ;;  %s1391_s18 = int_to_ptr.vmem [resolvable:$true] %s1390_s18 }
 0x10f   : > { %p6143_p5 = scmp.ne.s32.totalorder %s7256_s29, %s6142_s17  ;;  %s6147_s25 = scalar_lea.hbm %s8033_s14, 32 }
 0x110   : > { %p6148_p11 = scmp.lt.s32.totalorder %s7256_s29, %s8033_s14  ;;  %p6149_p13 = scmp.lt.s32.totalorder %s6147_s25, %s6142_s17 }
 0x111   : > { %p6145_p6 = pnand %p6143_p5, %p7238_p1 }
 0x112   : > { %p6150_p8 = por %p6149_p13, %p6148_p11 }
 0x113   : > { %p6146_p4 = pneg %p6145_p6 }
 0x115   : > { %p6151_p9 = pnand %p6150_p8, %p6146_p4 }
 0x117   : > { %6154 = shalt.err (!%p6151_p9)
}
 0x118   : > { %s6155_s12 = scalar_lea.vmem %s1391_s18, 16  ;;  %s6770_s20 = smov [#allocation9]  }
 0x119   : > { %p6156_p10 = scmp.ne.s32.totalorder %s1391_s18, %s6155_s12  ;;  %s6160_s13 = sshll.u32 %s6770_s20, 4  ;;  %s6161_s13 = int_to_ptr.vmem [resolvable:$false] %s6160_s13 }
 0x11a   : > { %s6162_s16 = scalar_lea.vmem %s6161_s13, 32  ;;  %p6163_p2 = scmp.lt.s32.totalorder %s1391_s18, %s6161_s13 }
 0x11b   : > { %p6158_p12 = pnand %p6156_p10, %p7238_p1  ;;  %p6164_p7 = scmp.lt.s32.totalorder %s6162_s16, %s6155_s12 }
 0x11d   : > { %p6159_p3 = pneg %p6158_p12  ;;  %p6165_p5 = por %p6164_p7, %p6163_p2 }
 0x11f   : > { %p6166_p6 = pnand %p6165_p5, %p6159_p3 }
 0x121   : > { %6169 = shalt.err (!%p6166_p6)
}
 0x122   : > { %5519 = dma.hbm_to_vmem [thread:$0]  (!%p7221_p0), %s7256_s29, 16, %s1391_s18, %s7982_s19  }
 0x123   : > { %s7276_s25 = scalar_lea.hbm %s8032_s24, %s7217_s3  ;;  %s1417_s17 = scalar_lea.vmem [#allocation12], %s7210_s27 }
 0x124   : > { %s1424_s12 = sshll.u32 %s1417_s17, 4  ;;  %s6771_s20 = smov [#allocation20]   ;;  %s1425_s12 = int_to_ptr.vmem [resolvable:$true] %s1424_s12 }
 0x125   : > { %s1115_s13 = sshll.u32 %s6771_s20, 4  ;;  %s7977_s16 = scalar_lea.sflag [#allocation13], %s7226_s30  ;;  %s1116_s13 = int_to_ptr.vmem [resolvable:$true] %s1115_s13 }
 0x126   : > { %s6170_s14 = scalar_lea.hbm %s7276_s25, 16  ;;  %s6175_s15 = scalar_lea.hbm %s8032_s24, 32 }
 0x127   : > { %p6171_p4 = scmp.ne.s32.totalorder %s7276_s25, %s6170_s14  ;;  %p6176_p8 = scmp.lt.s32.totalorder %s7276_s25, %s8032_s24 }
 0x128   : > { %p6177_p9 = scmp.lt.s32.totalorder %s6175_s15, %s6170_s14 }
 0x129   : > { %p6173_p11 = pnand %p6171_p4, %p7238_p1 }
 0x12a   : > { %p6178_p10 = por %p6177_p9, %p6176_p8 }
 0x12b   : > { %p6174_p13 = pneg %p6173_p11 }
 0x12d   : > { %p6179_p12 = pnand %p6178_p10, %p6174_p13 }
 0x12f   : > { %6182 = shalt.err (!%p6179_p12)
}
 0x130   : > { %s6183_s29 = scalar_lea.vmem %s1425_s12, 16  ;;  %s6772_s18 = smov [#allocation12]  }
 0x131   : > { %p6184_p3 = scmp.ne.s32.totalorder %s1425_s12, %s6183_s29  ;;  %s6188_s17 = sshll.u32 %s6772_s18, 4  ;;  %s6189_s17 = int_to_ptr.vmem [resolvable:$false] %s6188_s17 }
 0x132   : > { %s6190_s20 = scalar_lea.vmem %s6189_s17, 32  ;;  %p6191_p5 = scmp.lt.s32.totalorder %s1425_s12, %s6189_s17 }
 0x133   : > { %p6186_p2 = pnand %p6184_p3, %p7238_p1  ;;  %p6192_p6 = scmp.lt.s32.totalorder %s6190_s20, %s6183_s29 }
 0x135   : > { %p6187_p7 = pneg %p6186_p2  ;;  %p6193_p4 = por %p6192_p6, %p6191_p5 }
 0x137   : > { %p6194_p11 = pnand %p6193_p4, %p6187_p7 }
 0x139   : > { %6197 = shalt.err (!%p6194_p11)
}
 0x13a   : > { %5525 = dma.hbm_to_vmem [thread:$0]  (!%p7221_p0), %s7276_s25, 16, %s1425_s12, %s7977_s16  }
 0x13b   : > { %s6209_s14 = scalar_lea.vmem %s1116_s13, 16  ;;  %p8063_p8 = scmp.ne.s32.totalorder %s8042_s9, 0 }
 0x13c   : > { %p6210_p13 = scmp.ne.s32.totalorder %s1116_s13, %s6209_s14  ;;  %s6216_s15 = scalar_lea.vmem %s1116_s13, 32 }
 0x13d   : > { %p6217_p12 = scmp.lt.s32.totalorder %s1116_s13, %s1116_s13  ;;  %p6218_p3 = scmp.lt.s32.totalorder %s6216_s15, %s6209_s14 }
 0x13e   : > { %p6212_p9 = pnand %p6210_p13, %p8063_p8 }
 0x13f   : > { %p6219_p2 = por %p6218_p3, %p6217_p12 }
 0x140   : > { %p6213_p10 = pneg %p6212_p9 }
 0x142   : > { %p6220_p5 = pnand %p6219_p2, %p6213_p10 }
 0x144   : > { %6223 = shalt.err (!%p6220_p5)
}
 0x145   : > { %p8064_p7 = scmp.ne.s32.totalorder %s8041_s11, 0  ;;  %s8065_s29 = sld [smem:[#allocation76_spill]] }
 0x146   : > { %s6773_s18 = smov [#allocation23]   ;;  %s6774_s25 = smov [#allocation26]  }
 0x147   : > { %s1143_s17 = sshll.u32 %s6773_s18, 4  ;;  %s1165_s12 = sshll.u32 %s6774_s25, 4  ;;  %s1144_s17 = int_to_ptr.vmem [resolvable:$true] %s1143_s17  ;;  %s1166_s12 = int_to_ptr.vmem [resolvable:$true] %s1165_s12 }
 0x148   : > { %s6235_s20 = scalar_lea.vmem %s1144_s17, 16  ;;  %s6242_s16 = scalar_lea.vmem %s1144_s17, 32 }
 0x149   : > { %p6236_p6 = scmp.ne.s32.totalorder %s1144_s17, %s6235_s20  ;;  %p6243_p13 = scmp.lt.s32.totalorder %s1144_s17, %s1144_s17 }
 0x14a   : > { %p6244_p9 = scmp.lt.s32.totalorder %s6242_s16, %s6235_s20 }
 0x14b   : > { %5464 = dma.hbm_to_vmem [thread:$0]  (!%p8064_p7), %s8065_s29, 16, %s1116_s13, [#allocation19]  }
 0x14c   : > { %p6238_p4 = pnand %p6236_p6, %p8063_p8  ;;  %p6245_p10 = por %p6244_p9, %p6243_p13 }
 0x14e   : > { %p6239_p11 = pneg %p6238_p4 }
 0x150   : > { %p6246_p12 = pnand %p6245_p10, %p6239_p11 }
 0x152   : > { %6249 = shalt.err (!%p6246_p12)
}
 0x153   : > { %s8066_s14 = sld [smem:[#allocation80_spill]]  ;;  %s6261_s13 = scalar_lea.vmem %s1166_s12, 16 }
 0x154   : > { %p6262_p3 = scmp.ne.s32.totalorder %s1166_s12, %s6261_s13  ;;  %s6268_s15 = scalar_lea.vmem %s1166_s12, 32 }
 0x155   : > { %p6269_p6 = scmp.lt.s32.totalorder %s1166_s12, %s1166_s12  ;;  %p6270_p4 = scmp.lt.s32.totalorder %s6268_s15, %s6261_s13 }
 0x156   : > { %p6264_p2 = pnand %p6262_p3, %p8063_p8 }
 0x157   : > { %p6271_p0 = por %p6270_p4, %p6269_p6 }
 0x158   : > { %p6265_p5 = pneg %p6264_p2 }
 0x159   : > { %5470 = dma.hbm_to_vmem [thread:$0]  (!%p8064_p7), %s8066_s14, 16, %s1144_s17, [#allocation22]  }
 0x15a   : > { %p6272_p1 = pnand %p6271_p0, %p6265_p5 }
 0x15c   : > { %6275 = shalt.err (!%p6272_p1)
}
 0x15d   : > { %s8067_s16 = sld [smem:[#allocation82_spill]]  ;;  %s6775_s29 = smov [#allocation29]  }
 0x15e   : > { %s1189_s18 = sshll.u32 %s6775_s29, 4  ;;  %s1190_s18 = int_to_ptr.vmem [resolvable:$true] %s1189_s18 }
 0x15f   : > { %s6287_s17 = scalar_lea.vmem %s1190_s18, 256  ;;  %p6295_p10 = scmp.lt.s32.totalorder %s1190_s18, %s1190_s18 }
 0x160   : > { %p6288_p11 = scmp.ne.s32.totalorder %s1190_s18, %s6287_s17  ;;  %p6296_p12 = scmp.lt.s32.totalorder %s6287_s17, %s6287_s17 }
 0x162   : > { %p6290_p13 = pnand %p6288_p11, %p8063_p8  ;;  %p6297_p3 = por %p6296_p12, %p6295_p10 }
 0x163   : > { %5476 = dma.hbm_to_vmem [thread:$0]  (!%p8064_p7), %s8067_s16, 16, %s1166_s12, [#allocation25]  }
 0x164   : > { %p6291_p9 = pneg %p6290_p13 }
 0x166   : > { %p6298_p2 = pnand %p6297_p3, %p6291_p9 }
 0x168   : > { %6301 = shalt.err (!%p6298_p2)
}
 0x169   : > { %s6776_s25 = smov 64   ;;  %s8068_s20 = sld [smem:[#allocation85_spill]] }
 0x16a   : > { %s6777_s14 = smov 4   ;;  %s6778_s12 = smov [#allocation32]  }
 0x16b   : > { %s1213_s13 = sshll.u32 %s6778_s12, 4  ;;  %s6779_s15 = smov [#allocation35]   ;;  %s1214_s13 = int_to_ptr.vmem [resolvable:$true] %s1213_s13 }
 0x16c   : > { %s1238_s16 = sshll.u32 %s6779_s15, 4  ;;  %s6313_s29 = scalar_lea.vmem %s1214_s13, 256  ;;  %s1239_s16 = int_to_ptr.vmem [resolvable:$true] %s1238_s16 }
 0x16d   : > { %p6314_p0 = scmp.ne.s32.totalorder %s1214_s13, %s6313_s29  ;;  %p6321_p6 = scmp.lt.s32.totalorder %s1214_s13, %s1214_s13 }
 0x16e   : > { %p6322_p4 = scmp.lt.s32.totalorder %s6313_s29, %s6313_s29 }
 0x16f   : > { %5482 = dma.hbm_to_vmem [thread:$0]  (!%p8064_p7), %s8068_s20, 256, %s1190_s18, [#allocation28], %s6776_s25, %s6776_s25, %s6777_s14  }
 0x170   : > { %p6316_p1 = pnand %p6314_p0, %p8063_p8  ;;  %p6323_p11 = por %p6322_p4, %p6321_p6 }
 0x172   : > { %p6317_p5 = pneg %p6316_p1 }
 0x174   : > { %p6324_p13 = pnand %p6323_p11, %p6317_p5 }
 0x176   : > { %6327 = shalt.err (!%p6324_p13)
}
 0x177   : > { %s8069_s18 = sld [smem:[#allocation87_spill]]  ;;  %s6339_s17 = scalar_lea.vmem %s1239_s16, 16 }
 0x178   : > { %p6340_p9 = scmp.ne.s32.totalorder %s1239_s16, %s6339_s17  ;;  %s6346_s20 = scalar_lea.vmem %s1239_s16, 32 }
 0x179   : > { %p6347_p3 = scmp.lt.s32.totalorder %s1239_s16, %s1239_s16  ;;  %p6348_p2 = scmp.lt.s32.totalorder %s6346_s20, %s6339_s17 }
 0x17a   : > { %p6342_p10 = pnand %p6340_p9, %p8063_p8 }
 0x17b   : > { %p6349_p0 = por %p6348_p2, %p6347_p3 }
 0x17c   : > { %p6343_p12 = pneg %p6342_p10 }
 0x17d   : > { %5488 = dma.hbm_to_vmem [thread:$0]  (!%p8064_p7), %s8069_s18, 256, %s1214_s13, [#allocation31], %s6776_s25, %s6776_s25, %s6777_s14  }
 0x17e   : > { %p6350_p1 = pnand %p6349_p0, %p6343_p12 }
 0x180   : > { %6353 = shalt.err (!%p6350_p1)
}
 0x181   : > { %s8070_s12 = sld [smem:[#allocation89_spill]]  ;;  %s6780_s15 = smov [#allocation38]  }
 0x182   : > { %s1259_s29 = sshll.u32 %s6780_s15, 4  ;;  %s6781_s19 = smov [#allocation41]   ;;  %s1260_s29 = int_to_ptr.vmem [resolvable:$true] %s1259_s29 }
 0x183   : > { %s1287_s13 = sshll.u32 %s6781_s19, 4  ;;  %s6365_s18 = scalar_lea.vmem %s1260_s29, 256  ;;  %s1288_s13 = int_to_ptr.vmem [resolvable:$true] %s1287_s13 }
 0x184   : > { %p6366_p5 = scmp.ne.s32.totalorder %s1260_s29, %s6365_s18  ;;  %p6373_p11 = scmp.lt.s32.totalorder %s1260_s29, %s1260_s29 }
 0x185   : > { %p6374_p13 = scmp.lt.s32.totalorder %s6365_s18, %s6365_s18 }
 0x186   : > { %p6368_p6 = pnand %p6366_p5, %p8063_p8 }
 0x187   : > { %5494 = dma.hbm_to_vmem [thread:$0]  (!%p8064_p7), %s8070_s12, 16, %s1239_s16, [#allocation34]  }
 0x188   : > { %p6369_p4 = pneg %p6368_p6  ;;  %p6375_p9 = por %p6374_p13, %p6373_p11 }
 0x18a   : > { %p6376_p10 = pnand %p6375_p9, %p6369_p4 }
 0x18c   : > { %6379 = shalt.err (!%p6376_p10)
}
 0x18d   : > { %s8071_s16 = sld [smem:[#allocation91_spill]]  ;;  %s6391_s19 = scalar_lea.vmem %s1288_s13, 16 }
 0x18e   : > { %p6392_p12 = scmp.ne.s32.totalorder %s1288_s13, %s6391_s19  ;;  %s6398_s17 = scalar_lea.vmem %s1288_s13, 32 }
 0x18f   : > { %p6399_p0 = scmp.lt.s32.totalorder %s1288_s13, %s1288_s13  ;;  %p6400_p1 = scmp.lt.s32.totalorder %s6398_s17, %s6391_s19 }
 0x190   : > { %p6394_p3 = pnand %p6392_p12, %p8063_p8 }
 0x191   : > { %p6401_p5 = por %p6400_p1, %p6399_p0 }
 0x192   : > { %p6395_p2 = pneg %p6394_p3 }
 0x193   : > { %5500 = dma.hbm_to_vmem [thread:$0]  (!%p8064_p7), %s8071_s16, 256, %s1260_s29, [#allocation37], %s6776_s25, %s6776_s25, %s6777_s14  }
 0x194   : > { %p6402_p6 = pnand %p6401_p5, %p6395_p2 }
 0x196   : > { %6405 = shalt.err (!%p6402_p6)
}
 0x197   : > { %s8072_s20 = sld [smem:[#allocation94_spill]]  ;;  %s1316_s25 = scalar_lea.vmem [#allocation3], %s7210_s27 }
 0x198   : > { %s8073_s12 = sld [smem:[#allocation62_spill]]  ;;  %s1323_s14 = sshll.u32 %s1316_s25, 4  ;;  %s1324_s14 = int_to_ptr.vmem [resolvable:$true] %s1323_s14 }
 0x199   : > { %s1314_s15 = scalar_lea.sflag [#allocation4], %s7210_s27  ;;  %p8074_p4 = scmp.ne.s32.totalorder %s8061_s5, 0 }
 0x19d   : > { %5506 = dma.hbm_to_vmem [thread:$0]  (!%p8064_p7), %s8072_s20, 16, %s1288_s13, [#allocation40]  }
 0x19e   : > { %s7345_s9 = scalar_lea.hbm %s8073_s12, %s7217_s3  ;;  %s6411_s11 = scalar_lea.hbm %s8073_s12, 32 }
 0x19f   : > { %s6406_s29 = scalar_lea.hbm %s7345_s9, 16  ;;  %p6412_p9 = scmp.lt.s32.totalorder %s7345_s9, %s8073_s12 }
 0x1a0   : > { %p6407_p8 = scmp.ne.s32.totalorder %s7345_s9, %s6406_s29  ;;  %p6413_p10 = scmp.lt.s32.totalorder %s6411_s11, %s6406_s29 }
 0x1a2   : > { %p6409_p11 = pnand %p6407_p8, %p8074_p4  ;;  %p6414_p12 = por %p6413_p10, %p6412_p9 }
 0x1a4   : > { %p6410_p13 = pneg %p6409_p11 }
 0x1a6   : > { %p6415_p3 = pnand %p6414_p12, %p6410_p13 }
 0x1a8   : > { %6418 = shalt.err (!%p6415_p3)
}
 0x1a9   : > { %s6419_s13 = scalar_lea.vmem %s1324_s14, 16  ;;  %s6782_s18 = smov [#allocation3]  }
 0x1aa   : > { %p6420_p7 = scmp.ne.s32.totalorder %s1324_s14, %s6419_s13  ;;  %s6424_s16 = sshll.u32 %s6782_s18, 4  ;;  %s6425_s16 = int_to_ptr.vmem [resolvable:$false] %s6424_s16 }
 0x1ab   : > { %s6426_s19 = scalar_lea.vmem %s6425_s16, 32  ;;  %p6427_p1 = scmp.lt.s32.totalorder %s1324_s14, %s6425_s16 }
 0x1ac   : > { %p6422_p2 = pnand %p6420_p7, %p8074_p4  ;;  %p6428_p5 = scmp.lt.s32.totalorder %s6426_s19, %s6419_s13 }
 0x1ae   : > { %p6423_p0 = pneg %p6422_p2  ;;  %p6429_p6 = por %p6428_p5, %p6427_p1 }
 0x1b0   : > { %p6430_p8 = pnand %p6429_p6, %p6423_p0 }
 0x1b2   : > { %6433 = shalt.err (!%p6430_p8)
}
 0x1b3   : > { %p8075_p11 = scmp.ne.s32.totalorder %s8060_s8, 0  ;;  %s8076_s17 = sld [smem:[#allocation65_spill]] }
 0x1b4   : > { %s1358_s25 = scalar_lea.vmem [#allocation8], %s7210_s27 }
 0x1b5   : > { %5510 = dma.hbm_to_vmem [thread:$0]  (!%p8075_p11), %s7345_s9, 16, %s1324_s14, %s1314_s15  }
 0x1b6   : > { %s1365_s29 = sshll.u32 %s1358_s25, 4  ;;  %s1366_s29 = int_to_ptr.vmem [resolvable:$true] %s1365_s29 }
 0x1b9   : > { %s1363_s20 = scalar_lea.hbm %s8076_s17, %s7217_s3  ;;  %s6439_s13 = scalar_lea.hbm %s8076_s17, 32 }
 0x1ba   : > { %s6434_s11 = scalar_lea.hbm %s1363_s20, 16  ;;  %p6440_p12 = scmp.lt.s32.totalorder %s1363_s20, %s8076_s17 }
 0x1bb   : > { %p6435_p13 = scmp.ne.s32.totalorder %s1363_s20, %s6434_s11  ;;  %p6441_p3 = scmp.lt.s32.totalorder %s6439_s13, %s6434_s11 }
 0x1bd   : > { %p6437_p9 = pnand %p6435_p13, %p8074_p4  ;;  %p6442_p7 = por %p6441_p3, %p6440_p12 }
 0x1bf   : > { %p6438_p10 = pneg %p6437_p9 }
 0x1c1   : > { %p6443_p2 = pnand %p6442_p7, %p6438_p10 }
 0x1c3   : > { %6446 = shalt.err (!%p6443_p2)
}
 0x1c4   : > { %s6447_s18 = scalar_lea.vmem %s1366_s29, 16  ;;  %s6783_s9 = smov [#allocation8]  }
 0x1c5   : > { %p6448_p0 = scmp.ne.s32.totalorder %s1366_s29, %s6447_s18  ;;  %s6452_s14 = sshll.u32 %s6783_s9, 4  ;;  %s6453_s14 = int_to_ptr.vmem [resolvable:$false] %s6452_s14 }
 0x1c6   : > { %s6454_s15 = scalar_lea.vmem %s6453_s14, 32  ;;  %p6455_p6 = scmp.lt.s32.totalorder %s1366_s29, %s6453_s14 }
 0x1c7   : > { %p6450_p1 = pnand %p6448_p0, %p8074_p4  ;;  %p6456_p8 = scmp.lt.s32.totalorder %s6454_s15, %s6447_s18 }
 0x1c9   : > { %p6451_p5 = pneg %p6450_p1  ;;  %p6457_p13 = por %p6456_p8, %p6455_p6 }
 0x1cb   : > { %p6458_p9 = pnand %p6457_p13, %p6451_p5 }
 0x1cd   : > { %6461 = shalt.err (!%p6458_p9)
}
 0x1ce   : > { %s8077_s16 = scalar_lea.sflag [#allocation7], %s7226_s30  ;;  %s8078_s19 = sld [smem:[#allocation68_spill]] }
 0x1cf   : > { %5516 = dma.hbm_to_vmem [thread:$0]  (!%p8075_p11), %s1363_s20, 16, %s1366_s29, %s8077_s16  }
 0x1d0   : > { %s1400_s11 = scalar_lea.vmem [#allocation11], %s7210_s27 }
 0x1d1   : > { %s1407_s13 = sshll.u32 %s1400_s11, 4  ;;  %s1408_s13 = int_to_ptr.vmem [resolvable:$true] %s1407_s13 }
 0x1d4   : > { %s1405_s25 = scalar_lea.hbm %s8078_s19, %s7217_s3  ;;  %s6467_s18 = scalar_lea.hbm %s8078_s19, 32 }
 0x1d5   : > { %s6462_s9 = scalar_lea.hbm %s1405_s25, 16  ;;  %p6468_p7 = scmp.lt.s32.totalorder %s1405_s25, %s8078_s19 }
 0x1d6   : > { %p6463_p10 = scmp.ne.s32.totalorder %s1405_s25, %s6462_s9  ;;  %p6469_p2 = scmp.lt.s32.totalorder %s6467_s18, %s6462_s9 }
 0x1d8   : > { %p6465_p12 = pnand %p6463_p10, %p8074_p4  ;;  %p6470_p0 = por %p6469_p2, %p6468_p7 }
 0x1da   : > { %p6466_p3 = pneg %p6465_p12 }
 0x1dc   : > { %p6471_p1 = pnand %p6470_p0, %p6466_p3 }
 0x1de   : > { %6474 = shalt.err (!%p6471_p1)
}
 0x1df   : > { %s6475_s14 = scalar_lea.vmem %s1408_s13, 16  ;;  %s6784_s20 = smov [#allocation11]  }
 0x1e0   : > { %p6476_p5 = scmp.ne.s32.totalorder %s1408_s13, %s6475_s14  ;;  %s6480_s29 = sshll.u32 %s6784_s20, 4  ;;  %s6481_s29 = int_to_ptr.vmem [resolvable:$false] %s6480_s29 }
 0x1e1   : > { %s6482_s15 = scalar_lea.vmem %s6481_s29, 32  ;;  %p6483_p13 = scmp.lt.s32.totalorder %s1408_s13, %s6481_s29 }
 0x1e2   : > { %p6478_p6 = pnand %p6476_p5, %p8074_p4  ;;  %p6484_p9 = scmp.lt.s32.totalorder %s6482_s15, %s6475_s14 }
 0x1e4   : > { %p6479_p8 = pneg %p6478_p6  ;;  %p6485_p10 = por %p6484_p9, %p6483_p13 }
 0x1e6   : > { %p6486_p12 = pnand %p6485_p10, %p6479_p8 }
 0x1e8   : > { %6489 = shalt.err (!%p6486_p12)
}
 0x1e9   : > { %s8079_s16 = scalar_lea.sflag [#allocation10], %s7226_s30  ;;  %s8080_s11 = sld [smem:[#allocation71_spill]] }
 0x1ea   : > { %5522 = dma.hbm_to_vmem [thread:$0]  (!%p8075_p11), %s1405_s25, 16, %s1408_s13, %s8079_s16  }
 0x1eb   : > { %s1442_s20 = scalar_lea.vmem [#allocation14], %s7210_s27 }
 0x1ec   : > { %s1449_s12 = sshll.u32 %s1442_s20, 4  ;;  %s1450_s12 = int_to_ptr.vmem [resolvable:$true] %s1449_s12 }
 0x1ef   : > { %s8081_s9 = smov %s8080_s11  ;;  %s1447_s18 = scalar_lea.hbm %s8080_s11, %s7217_s3 }
 0x1f0   : > { %s6490_s29 = scalar_lea.hbm %s1447_s18, 16  ;;  %s6495_s14 = scalar_lea.hbm %s8081_s9, 32 }
 0x1f1   : > { %p6491_p3 = scmp.ne.s32.totalorder %s1447_s18, %s6490_s29  ;;  %p6496_p0 = scmp.lt.s32.totalorder %s1447_s18, %s8081_s9 }
 0x1f2   : > { %p6497_p1 = scmp.lt.s32.totalorder %s6495_s14, %s6490_s29 }
 0x1f3   : > { %p6493_p7 = pnand %p6491_p3, %p8074_p4 }
 0x1f4   : > { %p6498_p5 = por %p6497_p1, %p6496_p0 }
 0x1f5   : > { %p6494_p2 = pneg %p6493_p7 }
 0x1f7   : > { %p6499_p6 = pnand %p6498_p5, %p6494_p2 }
 0x1f9   : > { %6502 = shalt.err (!%p6499_p6)
}
 0x1fa   : > { %s6503_s15 = scalar_lea.vmem %s1450_s12, 16  ;;  %s6785_s25 = smov [#allocation14]  }
 0x1fb   : > { %p6504_p8 = scmp.ne.s32.totalorder %s1450_s12, %s6503_s15  ;;  %s6508_s13 = sshll.u32 %s6785_s25, 4  ;;  %s6509_s13 = int_to_ptr.vmem [resolvable:$false] %s6508_s13 }
 0x1fc   : > { %s6510_s16 = scalar_lea.vmem %s6509_s13, 32  ;;  %p6511_p10 = scmp.lt.s32.totalorder %s1450_s12, %s6509_s13 }
 0x1fd   : > { %p6506_p13 = pnand %p6504_p8, %p8074_p4  ;;  %p6512_p12 = scmp.lt.s32.totalorder %s6510_s16, %s6503_s15 }
 0x1ff   : > { %p6507_p9 = pneg %p6506_p13  ;;  %p6513_p3 = por %p6512_p12, %p6511_p10 }
 0x201   : > { %p6514_p7 = pnand %p6513_p3, %p6507_p9 }
 0x203   : > { %6517 = shalt.err (!%p6514_p7)
}
 0x204   : > { %s8082_s11 = scalar_lea.sflag [#allocation13], %s7226_s30  ;;  %s8083_s20 = sld [smem:[#allocation73_spill]] }
 0x205   : > { %5528 = dma.hbm_to_vmem [thread:$0]  (!%p8075_p11), %s1447_s18, 16, %s1450_s12, %s8082_s11  }
 0x206   : > { %s1467_s14 = scalar_lea.vmem [#allocation15], %s7210_s27  ;;  %s1465_s25 = scalar_lea.sflag [#allocation16], %s7226_s30 }
 0x207   : > { %s1474_s15 = sshll.u32 %s1467_s14, 4  ;;  %s1475_s15 = int_to_ptr.vmem [resolvable:$true] %s1474_s15 }
 0x20a   : > { %s7402_s29 = scalar_lea.hbm %s8083_s20, %s7217_s3  ;;  %s6523_s16 = scalar_lea.hbm %s8083_s20, 32 }
 0x20b   : > { %s6518_s13 = scalar_lea.hbm %s7402_s29, 16  ;;  %p6524_p5 = scmp.lt.s32.totalorder %s7402_s29, %s8083_s20 }
 0x20c   : > { %p6519_p2 = scmp.ne.s32.totalorder %s7402_s29, %s6518_s13  ;;  %p6525_p6 = scmp.lt.s32.totalorder %s6523_s16, %s6518_s13 }
 0x20e   : > { %p6521_p0 = pnand %p6519_p2, %p8074_p4  ;;  %p6526_p8 = por %p6525_p6, %p6524_p5 }
 0x210   : > { %p6522_p1 = pneg %p6521_p0 }
 0x212   : > { %p6527_p13 = pnand %p6526_p8, %p6522_p1 }
 0x214   : > { %6530 = shalt.err (!%p6527_p13)
}
 0x215   : > { %s6531_s3 = scalar_lea.vmem %s1475_s15, 16  ;;  %s6786_s27 = smov [#allocation15]  }
 0x216   : > { %p6532_p9 = scmp.ne.s32.totalorder %s1475_s15, %s6531_s3  ;;  %s6536_s12 = sshll.u32 %s6786_s27, 4  ;;  %s6537_s12 = int_to_ptr.vmem [resolvable:$false] %s6536_s12 }
 0x217   : > { %s6538_s30 = scalar_lea.vmem %s6537_s12, 32  ;;  %p6539_p3 = scmp.lt.s32.totalorder %s1475_s15, %s6537_s12 }
 0x218   : > { %p6534_p10 = pnand %p6532_p9, %p8074_p4  ;;  %p6540_p7 = scmp.lt.s32.totalorder %s6538_s30, %s6531_s3 }
 0x21a   : > { %p6535_p12 = pneg %p6534_p10  ;;  %p6541_p2 = por %p6540_p7, %p6539_p3 }
 0x21c   : > { %p6542_p0 = pnand %p6541_p2, %p6535_p12 }
 0x21e   : > { %6545 = shalt.err (!%p6542_p0)
}
 0x21f   : > { %5531 = dma.hbm_to_vmem [thread:$0]  (!%p8075_p11), %s7402_s29, 16, %s1475_s15, %s1465_s25  }
 0x220   : > { %p8084_p1 = scmp.ne.s32.totalorder %s8040_s26, 0 }
 0x221   : > { %s7421_s5 = sand.u32 (!%p8084_p1), 1, %s6694_s7   ;;  %p8085_p4 = scmp.ne.s32.totalorder (!%p8084_p1), %s8057_s4, 0 }
 0x222   : > { %1483 = sbr.rel (%p8084_p1) target bundleno = 7618 (0x1dc2), region = 176  ;;  %s1486_s18 = scalar_lea.sflag (!%p8084_p1), [#allocation4], %s7421_s5 }
 0x227   : > { %6617 = dma.done.wait (%p8085_p4), %s1486_s18, 16  }
 0x228   : > { %6619 = vsyncadd (%p8085_p4), %s1486_s18, 4294967280  ;;  %s1493_s8 = sand.u32 1, %s7088_s23  }
 0x229   : > { %s1494_s29 = scalar_lea.sflag [#allocation7], %s1493_s8 }
 0x22a   : > { %6621 = dma.done.wait (%p8085_p4), %s1494_s29, 32  }
 0x22b   : > { %6623 = vsyncadd (%p8085_p4), %s1494_s29, 4294967264  ;;  %s1510_s15 = scalar_lea.sflag [#allocation10], %s1493_s8 }
 0x22c   : > { %6625 = dma.done.wait (%p8085_p4), %s1510_s15, 32  }
 0x22d   : > { %6627 = vsyncadd (%p8085_p4), %s1510_s15, 4294967264  ;;  %s1526_s16 = scalar_lea.sflag [#allocation13], %s1493_s8 }
 0x22e   : > { %6629 = dma.done.wait (%p8085_p4), %s1526_s16, 32  }
 0x22f   : > { %6631 = vsyncadd (%p8085_p4), %s1526_s16, 4294967264  ;;  %s1542_s12 = scalar_lea.sflag [#allocation16], %s1493_s8 }
 0x230   : > { %6633 = dma.done.wait (%p8085_p4), %s1542_s12, 16  }
 0x231   : > { %6635 = vsyncadd (%p8085_p4), %s1542_s12, 4294967280  ;;  %p8086_p11 = scmp.eq.s32.totalorder %s7088_s23, 0 }
 0x233   : > { %6637 = dma.done.wait (%p8086_p11), [#allocation16], 128   ;;  %p8087_p5 = pmov %p8086_p11 }
 0x235   : > { %6639 = vsyncadd (%p8087_p5), [#allocation16], 4294967168  ;;  %p8088_p6 = pmov %p8087_p5 }
 0x236   : > { %p8089_p8 = pmov %p8087_p5 }
 0x237   : > { %6641 = dma.done.wait (%p8088_p6), [#allocation19], 32  }
 0x238   : > { %6643 = vsyncadd (%p8089_p8), [#allocation19], 4294967264  ;;  %p8090_p13 = pmov %p8087_p5 }
 0x239   : > { %p8091_p9 = pmov %p8087_p5 }
 0x23a   : > { %6645 = dma.done.wait (%p8090_p13), [#allocation22], 32  }
 0x23b   : > { %6647 = vsyncadd (%p8091_p9), [#allocation22], 4294967264  ;;  %p8092_p10 = pmov %p8087_p5 }
 0x23c   : > { %p8093_p12 = pmov %p8087_p5 }
 0x23d   : > { %6649 = dma.done.wait (%p8092_p10), [#allocation25], 32  }
 0x23e   : > { %6651 = vsyncadd (%p8093_p12), [#allocation25], 4294967264  ;;  %p8094_p3 = pmov %p8087_p5 }
 0x240   : > { %6653 = dma.done.wait (%p8094_p3), [#allocation28], 272   ;;  %p8095_p7 = pmov %p8094_p3 }
 0x241   : > { %p8096_p2 = pmov %p8094_p3 }
 0x242   : > { %6655 = vsyncadd (%p8095_p7), [#allocation28], 4294967024 }
 0x243   : > { %6657 = dma.done.wait (%p8096_p2), [#allocation31], 272   ;;  %p8097_p0 = pmov %p8096_p2 }
 0x245   : > { %6659 = vsyncadd (%p8097_p0), [#allocation31], 4294967024  ;;  %p8098_p1 = pmov %p8097_p0 }
 0x246   : > { %p8099_p4 = pmov %p8097_p0 }
 0x247   : > { %6661 = dma.done.wait (%p8098_p1), [#allocation34], 32  }
 0x248   : > { %6663 = vsyncadd (%p8099_p4), [#allocation34], 4294967264  ;;  %p8100_p11 = pmov %p8097_p0 }
 0x249   : > { %p8101_p5 = pmov %p8097_p0 }
 0x24a   : > { %6665 = dma.done.wait (%p8100_p11), [#allocation37], 272  }
 0x24b   : > { %6667 = vsyncadd (%p8101_p5), [#allocation37], 4294967024  ;;  %p8102_p6 = pmov %p8097_p0 }
 0x24c   : > { %p8103_p8 = pmov %p8097_p0 }
 0x24d   : > { %6669 = dma.done.wait (%p8102_p6), [#allocation40], 32  }
 0x24e   : > { %6671 = vsyncadd (%p8103_p8), [#allocation40], 4294967264  ;;  %s8104_s4 = sld [smem:[#allocation101_spill]]  ;;  %s7988_s30 = sand.u32 1, %s6682_s28  }
 0x24f   : > { %s8105_s18 = sld [smem:[#allocation100_spill]]  ;;  %s7493_s3 = sshll.u32 %s7988_s30, 3 }
 0x250   : > { %s8106_s8 = sld [smem:[#allocation58_spill]]  ;;  %s1758_s10 = scalar_lea.vmem [#allocation42], %s7493_s3 }
 0x251   : > { %s8107_s29 = sld [smem:[#allocation64_spill]] }
 0x252   : > { %s8108_s15 = sld [smem:[#allocation66_spill]] }
 0x253   : > { %s8109_s16 = sld [smem:[#allocation70_spill]] }
 0x254   : > { %s8110_s12 = sld [smem:[#allocation72_spill]]  ;;  %s4916_s27 = sshll.u32 %s8104_s4, 1 }
 0x255   : > { %s8111_s13 = sld [smem:[#allocation98_spill]]  ;;  %p1766_p13 = scmp.lt.s32.totalorder %s4916_s27, 3 }
 0x256   : > { %p1771_p9 = scmp.lt.s32.totalorder %s8105_s18, 1  ;;  %p1791_p10 = scmp.lt.s32.totalorder %s8104_s4, 1 }
 0x257   : > { %s8154_s27 = smov (!%p1766_p13, %s4916_s27), 3  ;;  %p4927_p12 = scmp.ne.s32.totalorder %s8105_s18, 0 }
 0x258   : > { %s1772_s23 = scalar_select %p1771_p9, %s8105_s18, 1 }
 0x259   : > { %s4917_s25 = sshll.u32 %s8154_s27, 3  ;;  %s8156_s4 = smov (!%p1791_p10, %s8104_s4), 1 }
 0x25a   : > { %s1769_s14 = scalar_lea.vmem %s8106_s8, %s4917_s25  ;;  %s5021_s26 = sshll.u32 %s1772_s23, 4 }
 0x25b   : > { %s7500_s11 = scalar_lea.vmem %s8107_s29, %s5021_s26  ;;  %s7503_s9 = scalar_lea.vmem %s8108_s15, %s5021_s26 }
 0x25c   : > { %s7506_s17 = scalar_lea.vmem %s8109_s16, %s5021_s26  ;;  %s5024_s19 = sshll.u32 %s1772_s23, 5 }
 0x25d   : > { %s7509_s20 = scalar_lea.vmem %s8110_s12, %s5024_s19  ;;  %s4926_s30 = sshll.u32 %s8156_s4, 3 }
 0x25e   : > { %s7513_s24 = scalar_lea.vmem %s8111_s13, %s4926_s30  ;;  %1799 = sbr.rel (%p4927_p12) target bundleno = 820 (0x334), region = 280 }
 0x25f   : > { %s8112_s27 = sld [smem:[#allocation60_spill]] (!%p4927_p12) }
 0x260   : > { %s8113_s25 = sld [smem:[#allocation61_spill]] (!%p4927_p12) }
 0x261   : > { %s8114_s8 = sld [smem:[#allocation59_spill]] (!%p4927_p12) }
 0x263   : > { %vm1815_vm0 = vcmask 1043456   ;;  %v1800_v1 = vld [vmem:[%s1769_s14] sm:$0xff]  ;;  %v6787_v2 = vmov 0.0   ;;  %vm6788_vm1 = vmmov 0   ;;  %v1801_v4 = vld [vmem:[%s1769_s14 + $0x8] sm:$0xff]  ;;  %vm1811_vm2 = vcmask 64512  }
 0x264   : > { %5115 = vmatprep.subr.bf16.mxu0 %v6787_v2  ;;  %5117 = vmatprep.mubr.msk.bf16.mxu0 %vm6788_vm1, %v6787_v2  ;;  %v1802_v5 = vpack.c.bf16 %v1801_v4, %v1800_v1  ;;  %vm1864_vm3 = vcmask 261120  }
 0x265   : > { %v1803_v0 = vld [vmem:[%s8112_s27] sm:$0xf] }
 0x266   : > { %v1817_v3 = vsel %vm1815_vm0, %v1803_v0, 0  ;;  %v4928_v6 = vld [vmem:[%s8113_s25] ss:$0 sm:$0xff] }
 0x267   : > { %5116 = vmatpush3.bf16.msra.mxu0 %v1817_v3  ;;  %v1860_v8 = vld [vmem:[%s8114_s8] sm:$0xff]  ;;  %v1861_v13 = vld [vmem:[%s8114_s8 + $0x8] sm:$0xff] }
 0x26a   : > { %5118 = vmatmul.mubr.msk.bf16.vlgmr.msra.gmra.mxu0 %vm1811_vm2, %v1802_v5 }
 0x32a   : > { %v1853_v7 = vpop.f32.mrf.mxu0 }
 0x32b   : > { %v1854_v9 = vadd.f32 %v4928_v6, %v1853_v7 }
 0x32c   : > { %v5119_v10 = vpop.f32.mrf.mxu0 }
 0x32d   : > { %v1862_v11 = vadd.f32 %v1860_v8, %v1854_v9 }
 0x32e   : > { %v1856_v12 = vpop.f32.mrf.mxu0 }
 0x32f   : > { %1865 = vst.msk [vmem:[#allocation2] sm:$0xff] %vm1864_vm3, %v1862_v11  ;;  %v1857_v14 = vadd.f32 %v4928_v6, %v1856_v12 }
 0x330   : > { %v5120_v15 = vpop.f32.mrf.mxu0 }
 0x331   : > { %v1863_v16 = vadd.f32 %v1861_v13, %v1857_v14 }
 0x333   : > { %1866 = vst.msk [vmem:[#allocation2 + $0x8] sm:$0xff] %vm1864_vm3, %v1863_v16 }
 0x334 PF: > { %vm1871_vm4 = vcmask 261120   ;;  %v5768_v31 = vld [vmem:[%s7500_s11 + $0x8] sm:$0xff]   ;;  %v6789_v32 = vmov 0.0   ;;  %vm6790_vm5 = vmmov 0   ;;  %v5769_v33 = vld [vmem:[%s7500_s11] sm:$0xff]   ;;  %s8115_s19 = scalar_lea.vmem [#allocation3], %s7421_s5 }
 0x335   : > { %5121 = vmatprep.subr.bf16.mxu0 %v6789_v32  ;;  %5125 = vmatprep.mubr.msk.bf16.mxu0 %vm6790_vm5, %v6789_v32  ;;  %v4930_v42 = vld [vmem:[%s8115_s19] ss:$0 sm:$0xff]  ;;  %s8116_s11 = scalar_lea.vmem [#allocation6], %s7421_s5  ;;  %s8117_s26 = scalar_lea.vmem [#allocation8], %s7421_s5  ;;  %vm1987_vm6 = vcmask 64512   ;;  %vm2035_vm7 = vcmask 130048  }
 0x336   : > { %v7521_v17 = vld [vmem:[#allocation2] sm:$0xff]  ;;  %5122 = vmatpush3.bf16.msra.mxu0 %v5768_v31  ;;  %5129 = vmatprep.subr.bf16.mxu1 %v6789_v32  ;;  %s6791_s14 = smov 88   ;;  %s6792_s13 = smov 96   ;;  %vm2497_vm8 = vcmask 195584   ;;  %vm2740_vm9 = vcmask 523264  }
 0x337   : > { %v1872_v19 = vsel %vm1871_vm4, %v7521_v17, 0.0  ;;  %5123 = vmatprep.subr.bf16.mxu0 %v6789_v32  ;;  %5131 = vmatprep.mubr.msk.bf16.mxu1 %vm6790_vm5, %v6789_v32  ;;  %v4931_v46 = vld [vmem:[%s8116_s11] ss:$0 sm:$0xff]  ;;  %s6793_s30 = smov 120   ;;  %s6794_s4 = smov 112  }
 0x338   : > { %1873 = vadd.xlane.f32.xlu0 %v1872_v19  ;;  %v4932_v52 = vld [vmem:[%s8117_s26] ss:$0 sm:$0xff]  ;;  %s6795_s18 = smov 80   ;;  %s6796_s29 = smov 104  }
 0x339   : > { %s6797_s15 = smov 72   ;;  %s6798_s16 = smov 64  }
 0x33a   : > { %v7523_v18 = vld [vmem:[#allocation2 + $0x8] sm:$0xff]  ;;  %5124 = vmatpush3.bf16.msra.mxu0 %v5769_v33  ;;  %s6799_s12 = smov 48   ;;  %s6800_s23 = smov 40  }
 0x33b   : > { %v1875_v20 = vsel %vm1871_vm4, %v7523_v18, 0.0  ;;  %5135 = vmatprep.subr.bf16.mxu0 %v6789_v32  ;;  %s6801_s27 = smov 56   ;;  %s6802_s25 = smov 8  }
 0x33c   : > { %1876 = vadd.xlane.f32.xlu0 %v1875_v20  ;;  %s6803_s19 = smov 16   ;;  %s6804_s11 = smov 24  }
 0x33d   : > { %s8119_s26 = scalar_lea.vmem [#allocation11], %s7421_s5 }
 0x3c1   : > { %v1874_v21 = vpop.xlane.xlu0 %1873 }
 0x3c2   : > { %v1879_v22 = vmul.f32 0.03125, %v1874_v21 }
 0x3c4   : > { %v1881_v23 = vsub.f32 %v7521_v17, %v1879_v22 }
 0x3c5   : > { %v1877_v24 = vpop.xlane.xlu0 %1876 }
 0x3c6   : > { %v1880_v25 = vmul.f32 0.03125, %v1877_v24  ;;  %v1883_v26 = vmul.f32 %v1881_v23, %v1881_v23 }
 0x3c8   : > { %v1882_v27 = vsub.f32 %v7523_v18, %v1880_v25  ;;  %v1885_v28 = vsel %vm1871_vm4, %v1883_v26, 0.0 }
 0x3c9   : > { %1886 = vadd.xlane.f32.xlu1 %v1885_v28 }
 0x3ca   : > { %v1884_v29 = vmul.f32 %v1882_v27, %v1882_v27 }
 0x3cc   : > { %v1888_v30 = vsel %vm1871_vm4, %v1884_v29, 0.0 }
 0x3cd   : > { %1889 = vadd.xlane.f32.xlu1 %v1888_v30 }
 0x452   : > { %v1887_v34 = vpop.xlane.xlu1 %1886 }
 0x453   : > { %v1891_v35 = vmul.f32 0.03125, %v1887_v34 }
 0x455   : > { %v1893_v36 = vadd.f32 1e-05, %v1891_v35 }
 0x456   : > { %v1890_v37 = vpop.xlane.xlu1 %1889 }
 0x457   : > { %5778 = vrsqrt.f32 %v1893_v36  ;;  %v1892_v38 = vmul.f32 0.03125, %v1890_v37 }
 0x459   : > { %v1894_v39 = vadd.f32 1e-05, %v1892_v38 }
 0x45b   : > { %5780 = vrsqrt.f32 %v1894_v39 }
 0x464   : > { %v5779_v40 = vpop.eup %5778 }
 0x465   : > { %v1897_v41 = vmul.f32 %v5779_v40, %v1881_v23 }
 0x467   : > { %v1905_v45 = vmul.f32 %v4930_v42, %v1897_v41 }
 0x468   : > { %v5781_v43 = vpop.eup %5780 }
 0x469   : > { %v1898_v44 = vmul.f32 %v5781_v43, %v1882_v27  ;;  %v1913_v48 = vadd.f32 %v4931_v46, %v1905_v45 }
 0x46b   : > { %v1906_v47 = vmul.f32 %v4930_v42, %v1898_v44 }
 0x46d   : > { %v1914_v49 = vadd.f32 %v4931_v46, %v1906_v47 }
 0x46f   : > { %v1915_v50 = vpack.c.bf16 %v1914_v49, %v1913_v48 }
 0x471   : > { %5126 = vmatmul.mubr.msk.bf16.vlgmr.msra.gmra.mxu0 %vm1871_vm4, %v1915_v50 }
 0x472   : > { %5137 = vmatprep.mubr.msk.bf16.mxu0 %vm6790_vm5, %v6789_v32 }
 0x531   : > { %v1976_v51 = vpop.f32.mrf.mxu0 }
 0x532   : > { %v1977_v55 = vadd.f32 %v4932_v52, %v1976_v51 }
 0x533   : > { %v5127_v53 = vpop.f32.mrf.mxu0 }
 0x535   : > { %v1979_v54 = vpop.f32.mrf.mxu0 }
 0x536   : > { %v1980_v56 = vadd.f32 %v4932_v52, %v1979_v54 }
 0x537   : > { %v5128_v57 = vpop.f32.mrf.mxu0 }
 0x538   : > { %v7552_v58 = vpack.c.bf16 %v1980_v56, %v1977_v55 }
 0x53a   : > { %2108 = vrot.lane.b32.xlu1 %v7552_v58, %s6791_s14  ;;  %1985 = vrot.lane.b32.xlu0 %v7552_v58, %s6792_s13  ;;  %s8121_s14 = scalar_lea.vmem [#allocation14], %s7421_s5  ;;  %s8123_s13 = sld [smem:[#allocation100_spill]] }
 0x53e   : > { %2106 = vrot.lane.b32.xlu1 %v7552_v58, %s6793_s30  ;;  %2227 = vrot.lane.b32.xlu0 %v7552_v58, %s6794_s4 }
 0x540   : > { %p4960_p3 = scmp.ne.s32.totalorder %s8123_s13, 1 }
 0x541   : > { %s6807_s30 = smov (!%p4960_p3), 120   ;;  %s6808_s4 = smov (!%p4960_p3), 96  }
 0x542   : > { %2229 = vrot.lane.b32.xlu1 %v7552_v58, %s6795_s18  ;;  %2348 = vrot.lane.b32.xlu0 %v7552_v58, %s6796_s29  ;;  %s6809_s18 = smov (!%p4960_p3), 88   ;;  %s6810_s29 = smov (!%p4960_p3), 80  }
 0x543   : > { %s8128_s13 = sld [smem:[#allocation93_spill]] (!%p4960_p3) }
 0x546   : > { %2350 = vrot.lane.b32.xlu1 %v7552_v58, %s6797_s15  ;;  %s6811_s15 = smov (!%p4960_p3), 112  }
 0x5ac   : > { %v1986_v59 = vpop.permute.xlu0 %1985  ;;  %v2109_v61 = vpop.permute.xlu1 %2108 }
 0x5ad   : > { %v1992_v60 = vsel %vm1987_vm6, %v1986_v59, 0  ;;  %v2114_v63 = vsel %vm1987_vm6, %v2109_v61, 0 }
 0x5ae   : > { %5130 = vmatpush3.bf16.xpose.msra.mxu1 %v1992_v60 }
 0x5af   : > { %5141 = vmatprep.subr.bf16.mxu1 %v6789_v32 }
 0x5b0   : > { %v2107_v62 = vpop.permute.xlu1 %2106  ;;  %v2228_v3 = vpop.permute.xlu0 %2227 }
 0x5b4   : > { %v2230_v0 = vpop.permute.xlu1 %2229  ;;  %v2349_v5 = vpop.permute.xlu0 %2348 }
 0x5b5   : > { %5132 = vmatmul.mubr.msk.bf16.vlgmr.msra.gmra.mxu1 %vm1987_vm6, %v7552_v58  ;;  %v2235_v1 = vsel %vm1987_vm6, %v2230_v0, 0 }
 0x5b6   : > { %5142 = vmatpush3.bf16.xpose.msra.mxu1 %v2114_v63  ;;  %5143 = vmatprep.mubr.msk.bf16.mxu1 %vm6790_vm5, %v6789_v32 }
 0x5b7   : > { %5153 = vmatprep.subr.bf16.mxu1 %v6789_v32 }
 0x5b8   : > { %v2351_v2 = vpop.permute.xlu1 %2350 }
 0x5b9   : > { %v2356_v4 = vsel %vm1987_vm6, %v2351_v2, 0 }
 0x5bd   : > { %5144 = vmatmul.mubr.msk.bf16.vlgmr.msra.gmra.mxu1 %vm1987_vm6, %v2107_v62 }
 0x5be   : > { %5154 = vmatpush3.bf16.xpose.msra.mxu1 %v2235_v1  ;;  %5155 = vmatprep.mubr.msk.bf16.mxu1 %vm6790_vm5, %v6789_v32 }
 0x5bf   : > { %5165 = vmatprep.subr.bf16.mxu1 %v6789_v32 }
 0x5c5   : > { %5156 = vmatmul.mubr.msk.bf16.vlgmr.msra.gmra.mxu1 %vm1987_vm6, %v2228_v3 }
 0x5c6   : > { %5166 = vmatpush3.bf16.xpose.msra.mxu1 %v2356_v4  ;;  %5167 = vmatprep.mubr.msk.bf16.mxu1 %vm6790_vm5, %v6789_v32 }
 0x5c7   : > { %5177 = vmatprep.subr.bf16.mxu1 %v6789_v32 }
 0x5cd   : > { %5168 = vmatmul.mubr.msk.bf16.vlgmr.msra.gmra.mxu1 %vm1987_vm6, %v2349_v5 }
 0x5ce   : > { %5181 = vmatprep.mubr.msk.bf16.mxu1 %vm6790_vm5, %v6789_v32 }
 0x675   : > { %v2028_v6 = vpop.f32.mrf.mxu1 }
 0x676   : > { %v2036_v7 = vsel %vm2035_vm7, %v2028_v6, -inf }
 0x677   : > { %2037 = vmax.xlane.f32.xlu1 %v2036_v7  ;;  %v5133_v8 = vpop.f32.mrf.mxu1 }
 0x679   : > { %v2031_v9 = vpop.f32.mrf.mxu1 }
 0x67a   : > { %v2039_v10 = vsel %vm2035_vm7, %v2031_v9, -inf }
 0x67b   : > { %2040 = vmax.xlane.f32.xlu0 %v2039_v10  ;;  %v5134_v11 = vpop.f32.mrf.mxu1 }
 0x67d   : > { %v2150_v12 = vpop.f32.mrf.mxu1 }
 0x67e   : > { %v2157_v13 = vsel %vm2035_vm7, %v2150_v12, -inf }
 0x67f   : > { %2158 = vmax.xlane.f32.xlu0 %v2157_v13  ;;  %v5145_v14 = vpop.f32.mrf.mxu1 }
 0x681   : > { %v2153_v15 = vpop.f32.mrf.mxu1 }
 0x682   : > { %v2160_v16 = vsel %vm2035_vm7, %v2153_v15, -inf }
 0x683   : > { %2161 = vmax.xlane.f32.xlu0 %v2160_v16  ;;  %v5146_v19 = vpop.f32.mrf.mxu1 }
 0x685   : > { %v2271_v20 = vpop.f32.mrf.mxu1 }
 0x686   : > { %v2278_v21 = vsel %vm2035_vm7, %v2271_v20, -inf }
 0x687   : > { %2279 = vmax.xlane.f32.xlu1 %v2278_v21  ;;  %v5157_v22 = vpop.f32.mrf.mxu1 }
 0x689   : > { %v2274_v23 = vpop.f32.mrf.mxu1 }
 0x68a   : > { %v2281_v24 = vsel %vm2035_vm7, %v2274_v23, -inf }
 0x68b   : > { %2282 = vmax.xlane.f32.xlu0 %v2281_v24  ;;  %v5158_v25 = vpop.f32.mrf.mxu1 }
 0x68d   : > { %v2392_v26 = vpop.f32.mrf.mxu1 }
 0x68e   : > { %v2399_v27 = vsel %vm2035_vm7, %v2392_v26, -inf }
 0x68f   : > { %2400 = vmax.xlane.f32.xlu1 %v2399_v27  ;;  %v5169_v28 = vpop.f32.mrf.mxu1 }
 0x691   : > { %v2395_v29 = vpop.f32.mrf.mxu1 }
 0x692   : > { %v2402_v30 = vsel %vm2035_vm7, %v2395_v29, -inf }
 0x693   : > { %2403 = vmax.xlane.f32.xlu0 %v2402_v30  ;;  %v5170_v31 = vpop.f32.mrf.mxu1 }
 0x6a0   : > { %2059 = vrot.lane.b32.xlu1 %v7552_v58, %s6798_s16  ;;  %s6812_s16 = smov (!%p4960_p3), 72  }
 0x700   : > { %v2038_v33 = vpop.xlane.xlu1 %2037 }
 0x701   : > { %v2042_v34 = vsub.f32 %v2028_v6, %v2038_v33 }
 0x703   : > { %v2044_v35 = vmul.f32 1.442695, %v2042_v34 }
 0x704   : > { %v2041_v36 = vpop.xlane.xlu0 %2040 }
 0x705   : > { %5782 = vpow2.f32 %v2044_v35  ;;  %v2043_v37 = vsub.f32 %v2031_v9, %v2041_v36 }
 0x707   : > { %v2046_v38 = vmul.f32 1.442695, %v2043_v37 }
 0x708   : > { %v2159_v39 = vpop.xlane.xlu0 %2158 }
 0x709   : > { %5784 = vpow2.f32 %v2046_v38  ;;  %v2163_v40 = vsub.f32 %v2150_v12, %v2159_v39 }
 0x70b   : > { %v2165_v41 = vmul.f32 1.442695, %v2163_v40 }
 0x70c   : > { %v2162_v42 = vpop.xlane.xlu0 %2161 }
 0x70d   : > { %5786 = vpow2.f32 %v2165_v41  ;;  %v2164_v43 = vsub.f32 %v2153_v15, %v2162_v42 }
 0x70f   : > { %v2167_v44 = vmul.f32 1.442695, %v2164_v43 }
 0x710   : > { %v2280_v45 = vpop.xlane.xlu1 %2279 }
 0x711   : > { %5788 = vpow2.f32 %v2167_v44  ;;  %v2284_v46 = vsub.f32 %v2271_v20, %v2280_v45 }
 0x712   : > { %v5783_v47 = vpop.eup %5782 }
 0x713   : > { %v2286_v48 = vmul.f32 1.442695, %v2284_v46  ;;  %v2048_v49 = vsel %vm2035_vm7, %v5783_v47, 0.0 }
 0x714   : > { %2049 = vadd.xlane.f32.xlu1 %v2048_v49  ;;  %v2283_v50 = vpop.xlane.xlu0 %2282 }
 0x715   : > { %5790 = vpow2.f32 %v2286_v48  ;;  %v2285_v51 = vsub.f32 %v2274_v23, %v2283_v50 }
 0x716   : > { %v5785_v52 = vpop.eup %5784 }
 0x717   : > { %v2288_v53 = vmul.f32 1.442695, %v2285_v51  ;;  %v2051_v54 = vsel %vm2035_vm7, %v5785_v52, 0.0  ;;  %v5770_v51 = vld [vmem:[%s7503_s9 + $0x8] sm:$0xff]  }
 0x718   : > { %v2401_v55 = vpop.xlane.xlu1 %2400  ;;  %2052 = vadd.xlane.f32.xlu0 %v2051_v54  ;;  %5178 = vmatpush3.bf16.msra.mxu1 %v5770_v51 }
 0x719   : > { %5792 = vpow2.f32 %v2288_v53  ;;  %v2405_v56 = vsub.f32 %v2392_v26, %v2401_v55  ;;  %5179 = vmatprep.subr.bf16.mxu1 %v6789_v32 }
 0x71a   : > { %v5787_v57 = vpop.eup %5786 }
 0x71b   : > { %v2407_v59 = vmul.f32 1.442695, %v2405_v56  ;;  %v2169_v60 = vsel %vm2035_vm7, %v5787_v57, 0.0  ;;  %v5771_v56 = vld [vmem:[%s7503_s9] sm:$0xff]   ;;  %s8118_s9 = scalar_lea.vmem [#allocation9], %s7421_s5 }
 0x71c   : > { %v2060_v61 = vpop.permute.xlu1 %2059  ;;  %2170 = vadd.xlane.f32.xlu1 %v2169_v60  ;;  %v2404_v62 = vpop.xlane.xlu0 %2403  ;;  %5180 = vmatpush3.bf16.msra.mxu1 %v5771_v56 }
 0x71d   : > { %5794 = vpow2.f32 %v2407_v59  ;;  %v2406_v63 = vsub.f32 %v2395_v29, %v2404_v62  ;;  %5136 = vmatpush3.bf16.msra.mxu0 %v2060_v61  ;;  %5193 = vmatprep.subr.bf16.mxu1 %v6789_v32 }
 0x71e   : > { %v5789_v0 = vpop.eup %5788  ;;  %5147 = vmatprep.subr.bf16.mxu0 %v6789_v32 }
 0x71f   : > { %v2409_v1 = vmul.f32 1.442695, %v2406_v63  ;;  %v2172_v2 = vsel %vm2035_vm7, %v5789_v0, 0.0 }
 0x720   : > { %2173 = vadd.xlane.f32.xlu0 %v2172_v2 }
 0x721   : > { %5796 = vpow2.f32 %v2409_v1 }
 0x722   : > { %v5791_v3 = vpop.eup %5790 }
 0x723   : > { %v2290_v4 = vsel %vm2035_vm7, %v5791_v3, 0.0 }
 0x724   : > { %2291 = vadd.xlane.f32.xlu1 %v2290_v4 }
 0x726   : > { %v5793_v5 = vpop.eup %5792 }
 0x727   : > { %v2293_v6 = vsel %vm2035_vm7, %v5793_v5, 0.0 }
 0x728   : > { %2294 = vadd.xlane.f32.xlu0 %v2293_v6 }
 0x72a   : > { %v5795_v7 = vpop.eup %5794 }
 0x72b   : > { %v2411_v8 = vsel %vm2035_vm7, %v5795_v7, 0.0 }
 0x72c   : > { %2412 = vadd.xlane.f32.xlu1 %v2411_v8 }
 0x72e   : > { %v5797_v9 = vpop.eup %5796 }
 0x72f   : > { %v2414_v10 = vsel %vm2035_vm7, %v5797_v9, 0.0 }
 0x730   : > { %2415 = vadd.xlane.f32.xlu0 %v2414_v10 }
 0x73d   : > { %2301 = vrot.lane.b32.xlu1 %v7552_v58, %s6799_s12  ;;  %s6813_s12 = smov (!%p4960_p3), 104  }
 0x741   : > { %2422 = vrot.lane.b32.xlu1 %v7552_v58, %s6800_s23  ;;  %s6814_s23 = smov (!%p4960_p3), 64  }
 0x746   : > { %2180 = vrot.lane.b32.xlu0 %v7552_v58, %s6801_s27  ;;  %s6815_s27 = smov (!%p4960_p3), 56  }
 0x79d   : > { %v2050_v11 = vpop.xlane.xlu1 %2049 }
 0x79e   : > { %5798 = vrcp.f32 %v2050_v11 }
 0x7a1   : > { %v2053_v12 = vpop.xlane.xlu0 %2052 }
 0x7a2   : > { %5800 = vrcp.f32 %v2053_v12 }
 0x7a5   : > { %v2171_v14 = vpop.xlane.xlu1 %2170 }
 0x7a9   : > { %v2174_v13 = vpop.xlane.xlu0 %2173 }
 0x7aa   : > { %5802 = vrcp.f32 %v2174_v13 }
 0x7ab   : > { %v5799_v15 = vpop.eup %5798  ;;  %5804 = vrcp.f32 %v2171_v14 }
 0x7ac   : > { %v2056_v19 = vmul.f32 %v5799_v15, %v5783_v47 }
 0x7ad   : > { %v2292_v22 = vpop.xlane.xlu1 %2291 }
 0x7af   : > { %v5801_v16 = vpop.eup %5800 }
 0x7b0   : > { %v2057_v20 = vmul.f32 %v5801_v16, %v5785_v52 }
 0x7b1   : > { %v2295_v21 = vpop.xlane.xlu0 %2294 }
 0x7b2   : > { %v2058_v23 = vpack.c.bf16 %v2057_v20, %v2056_v19  ;;  %5806 = vrcp.f32 %v2295_v21  ;;  %v4944_v20 = vld [vmem:[%s8118_s9] ss:$0 sm:$0xff] }
 0x7b3   : > { %5808 = vrcp.f32 %v2292_v22 }
 0x7b4   : > { %5138 = vmatmul.mubr.msk.bf16.vlgmr.msra.gmra.mxu0 %vm2035_vm7, %v2058_v23 }
 0x7b5   : > { %5149 = vmatprep.mubr.msk.bf16.mxu0 %vm6790_vm5, %v6789_v32  ;;  %v2413_v26 = vpop.xlane.xlu1 %2412 }
 0x7b7   : > { %v5803_v58 = vpop.eup %5802 }
 0x7b8   : > { %v5805_v25 = vpop.eup %5804  ;;  %v2178_v27 = vmul.f32 %v5803_v58, %v5789_v0 }
 0x7b9   : > { %v2416_v24 = vpop.xlane.xlu0 %2415  ;;  %v2177_v29 = vmul.f32 %v5805_v25, %v5787_v57  ;;  %v2302_v33 = vpop.permute.xlu1 %2301 }
 0x7ba   : > { %5810 = vrcp.f32 %v2416_v24 }
 0x7bb   : > { %5812 = vrcp.f32 %v2413_v26  ;;  %v2179_v30 = vpack.c.bf16 %v2178_v27, %v2177_v29 }
 0x7bd   : > { %v2181_v28 = vpop.permute.xlu0 %2180  ;;  %v2423_v39 = vpop.permute.xlu1 %2422 }
 0x7be   : > { %5148 = vmatpush3.bf16.msra.mxu0 %v2181_v28 }
 0x7bf   : > { %5159 = vmatprep.subr.bf16.mxu0 %v6789_v32  ;;  %v5807_v31 = vpop.eup %5806 }
 0x7c0   : > { %v5809_v34 = vpop.eup %5808  ;;  %v2299_v35 = vmul.f32 %v5807_v31, %v5793_v5 }
 0x7c1   : > { %5150 = vmatmul.mubr.msk.bf16.vlgmr.msra.gmra.mxu0 %vm2035_vm7, %v2179_v30  ;;  %v2298_v36 = vmul.f32 %v5809_v34, %v5791_v3 }
 0x7c2   : > { %5160 = vmatpush3.bf16.msra.mxu0 %v2302_v33  ;;  %5161 = vmatprep.mubr.msk.bf16.mxu0 %vm6790_vm5, %v6789_v32 }
 0x7c3   : > { %5171 = vmatprep.subr.bf16.mxu0 %v6789_v32  ;;  %v2300_v37 = vpack.c.bf16 %v2299_v35, %v2298_v36 }
 0x7c7   : > { %v5811_v38 = vpop.eup %5810 }
 0x7c8   : > { %v5813_v40 = vpop.eup %5812  ;;  %v2420_v41 = vmul.f32 %v5811_v38, %v5797_v9 }
 0x7c9   : > { %5162 = vmatmul.mubr.msk.bf16.vlgmr.msra.gmra.mxu0 %vm2035_vm7, %v2300_v37  ;;  %v2419_v42 = vmul.f32 %v5813_v40, %v5795_v7  ;;  %v5773_v40 = vld [vmem:[%s7506_s17] sm:$0xff]  }
 0x7ca   : > { %5172 = vmatpush3.bf16.msra.mxu0 %v2423_v39  ;;  %5173 = vmatprep.mubr.msk.bf16.mxu0 %vm6790_vm5, %v6789_v32  ;;  %v5772_v39 = vld [vmem:[%s7506_s17 + $0x8] sm:$0xff]   ;;  %s8120_s17 = scalar_lea.vmem [#allocation12], %s7421_s5 }
 0x7cb   : > { %5185 = vmatprep.subr.bf16.mxu0 %v6789_v32  ;;  %v2421_v43 = vpack.c.bf16 %v2420_v41, %v2419_v42 }
 0x7d1   : > { %5174 = vmatmul.mubr.msk.bf16.vlgmr.msra.gmra.mxu0 %vm2035_vm7, %v2421_v43 }
 0x7d2   : > { %5189 = vmatprep.mubr.msk.bf16.mxu0 %vm6790_vm5, %v6789_v32  ;;  %5186 = vmatpush3.bf16.msra.mxu0 %v5772_v39 }
 0x7d3   : > { %5187 = vmatprep.subr.bf16.mxu0 %v6789_v32 }
 0x7d6   : > { %5188 = vmatpush3.bf16.msra.mxu0 %v5773_v40 }
 0x874   : > { %v2099_v44 = vpop.f32.mrf.mxu0 }
 0x876   : > { %v5139_v45 = vpop.f32.mrf.mxu0 }
 0x878   : > { %v2102_v46 = vpop.f32.mrf.mxu0 }
 0x87a   : > { %v5140_v47 = vpop.f32.mrf.mxu0 }
 0x881   : > { %v2220_v48 = vpop.f32.mrf.mxu0 }
 0x883   : > { %v5151_v49 = vpop.f32.mrf.mxu0 }
 0x884   : > { %v4948_v49 = vld [vmem:[%s8119_s26] ss:$0 sm:$0xff]  ;;  %s6818_s26 = smov (!%p4960_p3), 8  }
 0x885   : > { %v2223_v50 = vpop.f32.mrf.mxu0 }
 0x886   : > { %v5753_v52 = vpack.i.bf16 %v2223_v50, %v2220_v48 }
 0x887   : > { %v5152_v53 = vpop.f32.mrf.mxu0 }
 0x888   : > { %5754 = vrot.lane.b32.xlu1 %v5753_v52, %s6802_s25  ;;  %v4949_v53 = vld [vmem:[%s8120_s17] ss:$0 sm:$0xff]  ;;  %s6816_s25 = smov (!%p4960_p3), 48   ;;  %s6819_s17 = smov (!%p4960_p3), 16  }
 0x889   : > { %v2341_v54 = vpop.f32.mrf.mxu0 }
 0x88b   : > { %v5163_v55 = vpop.f32.mrf.mxu0 }
 0x88d   : > { %v2344_v57 = vpop.f32.mrf.mxu0 }
 0x88e   : > { %v5758_v59 = vpack.i.bf16 %v2344_v57, %v2341_v54 }
 0x88f   : > { %v5164_v60 = vpop.f32.mrf.mxu0 }
 0x890   : > { %5759 = vrot.lane.b32.xlu0 %v5758_v59, %s6803_s19  ;;  %v5774_v59 = vld [vmem:[%s7509_s20 + $0x18] sm:$0xff]   ;;  %v5775_v60 = vld [vmem:[%s7509_s20 + $0x10] sm:$0xff]   ;;  %s6817_s19 = smov (!%p4960_p3), 40  }
 0x891   : > { %v2462_v61 = vpop.f32.mrf.mxu0 }
 0x893   : > { %v5175_v62 = vpop.f32.mrf.mxu0 }
 0x894   : > { %v5777_v62 = vld [vmem:[%s7509_s20] sm:$0xff]  }
 0x895   : > { %v2465_v63 = vpop.f32.mrf.mxu0 }
 0x896   : > { %v5763_v0 = vpack.i.bf16 %v2465_v63, %v2462_v61  ;;  %v5776_v61 = vld [vmem:[%s7509_s20 + $0x8] sm:$0xff]   ;;  %v4950_v63 = vld [vmem:[%s8121_s14] ss:$0 sm:$0xff]  ;;  %s8122_s20 = scalar_lea.vmem [#allocation15], %s7421_s5  ;;  %s8124_s5 = sld [smem:[#allocation77_spill]] (!%p4960_p3) }
 0x897   : > { %v5176_v1 = vpop.f32.mrf.mxu0  ;;  %s6820_s14 = smov (!%p4960_p3), 24  }
 0x898   : > { %5764 = vrot.lane.b32.xlu1 %v5763_v0, %s6804_s11  ;;  %s8125_s11 = sld [smem:[#allocation79_spill]] (!%p4960_p3) }
 0x89e   : > { %s8126_s9 = smov (!%p4960_p3), %s8125_s11 }
 0x8fa   : > { %v5755_v2 = vpop.permute.xlu1 %5754 }
 0x8fb   : > { %v5757_v4 = vunpack.i.h.bf16 %v5755_v2  ;;  %v5756_v5 = vunpack.i.l.bf16 %v5755_v2 }
 0x8fd   : > { %v2494_v9 = vsel %vm1987_vm6, %v2102_v46, %v5757_v4  ;;  %v2493_v10 = vsel %vm1987_vm6, %v2099_v44, %v5756_v5 }
 0x902   : > { %v5760_v3 = vpop.permute.xlu0 %5759 }
 0x903   : > { %v5762_v6 = vunpack.i.h.bf16 %v5760_v3  ;;  %v5761_v7 = vunpack.i.l.bf16 %v5760_v3 }
 0x905   : > { %v2496_v13 = vsel %vm2035_vm7, %v2494_v9, %v5762_v6  ;;  %v2495_v14 = vsel %vm2035_vm7, %v2493_v10, %v5761_v7 }
 0x90a   : > { %v5765_v8 = vpop.permute.xlu1 %5764 }
 0x90b   : > { %v5767_v11 = vunpack.i.h.bf16 %v5765_v8  ;;  %v5766_v12 = vunpack.i.l.bf16 %v5765_v8 }
 0x90d   : > { %v2499_v15 = vsel %vm2497_vm8, %v2496_v13, %v5767_v11  ;;  %v2498_v16 = vsel %vm2497_vm8, %v2495_v14, %v5766_v12 }
 0x90e   : > { %v2500_v19 = vpack.c.bf16 %v2499_v15, %v2498_v16 }
 0x910   : > { %5182 = vmatmul.mubr.msk.bf16.vlgmr.msra.gmra.mxu1 %vm1871_vm4, %v2500_v19 }
 0x911   : > { %5201 = vmatprep.mubr.msk.bf16.mxu1 %vm6790_vm5, %v6789_v32  ;;  %5194 = vmatpush3.bf16.msra.mxu1 %v5774_v59 }
 0x912   : > { %5195 = vmatprep.subr.bf16.mxu1 %v6789_v32 }
 0x915   : > { %5196 = vmatpush3.bf16.msra.mxu1 %v5775_v60 }
 0x916   : > { %5197 = vmatprep.subr.bf16.mxu1 %v6789_v32 }
 0x919   : > { %5198 = vmatpush3.bf16.msra.mxu1 %v5776_v61 }
 0x91a   : > { %5199 = vmatprep.subr.bf16.mxu1 %v6789_v32 }
 0x91d   : > { %5200 = vmatpush3.bf16.msra.mxu1 %v5777_v62 }
 0x9d0   : > { %v2561_v21 = vpop.f32.mrf.mxu1 }
 0x9d1   : > { %v2562_v22 = vadd.f32 %v4944_v20, %v2561_v21 }
 0x9d2   : > { %v5183_v23 = vpop.f32.mrf.mxu1 }
 0x9d3   : > { %v7634_v58 = vadd.f32 %v2562_v22, %v7521_v17 }
 0x9d4   : > { %v2564_v24 = vpop.f32.mrf.mxu1 }
 0x9d5   : > { %v2565_v25 = vadd.f32 %v4944_v20, %v2564_v24  ;;  %v2572_v26 = vsel %vm1871_vm4, %v7634_v58, 0.0 }
 0x9d6   : > { %2573 = vadd.xlane.f32.xlu0 %v2572_v26  ;;  %v5184_v27 = vpop.f32.mrf.mxu1  ;;  %v4954_v26 = vld [vmem:[%s8122_s20] ss:$0 sm:$0xff]  ;;  %s8127_s20 = sld [smem:[#allocation83_spill]] (!%p4960_p3) }
 0x9d7   : > { %v7639_v28 = vadd.f32 %v2565_v25, %v7523_v18 }
 0x9d9   : > { %v2575_v29 = vsel %vm1871_vm4, %v7639_v28, 0.0 }
 0x9da   : > { %2576 = vadd.xlane.f32.xlu1 %v2575_v29 }
 0xa5f   : > { %v2574_v30 = vpop.xlane.xlu0 %2573 }
 0xa60   : > { %v2578_v31 = vmul.f32 0.03125, %v2574_v30 }
 0xa62   : > { %v2580_v17 = vsub.f32 %v7634_v58, %v2578_v31 }
 0xa63   : > { %v2577_v33 = vpop.xlane.xlu1 %2576 }
 0xa64   : > { %v2579_v34 = vmul.f32 0.03125, %v2577_v33  ;;  %v2582_v35 = vmul.f32 %v2580_v17, %v2580_v17 }
 0xa66   : > { %v2581_v36 = vsub.f32 %v7639_v28, %v2579_v34  ;;  %v2584_v37 = vsel %vm1871_vm4, %v2582_v35, 0.0 }
 0xa67   : > { %2585 = vadd.xlane.f32.xlu0 %v2584_v37 }
 0xa68   : > { %v2583_v38 = vmul.f32 %v2581_v36, %v2581_v36 }
 0xa6a   : > { %v2587_v18 = vsel %vm1871_vm4, %v2583_v38, 0.0 }
 0xa6b   : > { %2588 = vadd.xlane.f32.xlu0 %v2587_v18 }
 0xaf0   : > { %v2586_v41 = vpop.xlane.xlu0 %2585 }
 0xaf1   : > { %v2590_v42 = vmul.f32 0.03125, %v2586_v41 }
 0xaf3   : > { %v2592_v43 = vadd.f32 1e-05, %v2590_v42 }
 0xaf4   : > { %v2589_v44 = vpop.xlane.xlu0 %2588 }
 0xaf5   : > { %5814 = vrsqrt.f32 %v2592_v43  ;;  %v2591_v45 = vmul.f32 0.03125, %v2589_v44 }
 0xaf7   : > { %v2593_v46 = vadd.f32 1e-05, %v2591_v45 }
 0xaf9   : > { %5816 = vrsqrt.f32 %v2593_v46 }
 0xb02   : > { %v5815_v47 = vpop.eup %5814 }
 0xb03   : > { %v2596_v48 = vmul.f32 %v5815_v47, %v2580_v17 }
 0xb05   : > { %v2604_v52 = vmul.f32 %v4948_v49, %v2596_v48 }
 0xb06   : > { %v5817_v50 = vpop.eup %5816 }
 0xb07   : > { %v2597_v51 = vmul.f32 %v5817_v50, %v2581_v36  ;;  %v2612_v55 = vadd.f32 %v4949_v53, %v2604_v52 }
 0xb09   : > { %v2605_v54 = vmul.f32 %v4948_v49, %v2597_v51 }
 0xb0b   : > { %v2613_v56 = vadd.f32 %v4949_v53, %v2605_v54 }
 0xb0d   : > { %v2614_v57 = vpack.c.bf16 %v2613_v56, %v2612_v55 }
 0xb0f   : > { %5190 = vmatmul.mubr.msk.bf16.vlgmr.msra.gmra.mxu0 %vm1871_vm4, %v2614_v57 }
 0xbcf   : > { %v2675_v0 = vpop.f32.mrf.mxu0 }
 0xbd0   : > { %v2676_v1 = vadd.f32 %v4950_v63, %v2675_v0 }
 0xbd1   : > { %v5191_v2 = vpop.f32.mrf.mxu0 }
 0xbd2   : > { %v2684_v3 = vmul.f32 0.044715, %v2676_v1  ;;  %v2682_v20 = vmul.f32 0.5, %v2676_v1 }
 0xbd3   : > { %v2678_v4 = vpop.f32.mrf.mxu0 }
 0xbd4   : > { %v2686_v5 = vmul.f32 %v2684_v3, %v2676_v1  ;;  %v2679_v6 = vadd.f32 %v4950_v63, %v2678_v4 }
 0xbd5   : > { %v5192_v7 = vpop.f32.mrf.mxu0 }
 0xbd6   : > { %v2688_v8 = vmul.f32 %v2686_v5, %v2676_v1  ;;  %v2685_v9 = vmul.f32 0.044715, %v2679_v6  ;;  %v2683_v21 = vmul.f32 0.5, %v2679_v6 }
 0xbd8   : > { %v2690_v10 = vadd.f32 %v2688_v8, %v2676_v1  ;;  %v2687_v11 = vmul.f32 %v2685_v9, %v2679_v6 }
 0xbda   : > { %v2692_v12 = vmul.f32 0.7978846, %v2690_v10  ;;  %v2689_v13 = vmul.f32 %v2687_v11, %v2679_v6 }
 0xbdc   : > { %5818 = vtanh.f32 %v2692_v12  ;;  %v2691_v32 = vadd.f32 %v2689_v13, %v2679_v6 }
 0xbde   : > { %v2693_v14 = vmul.f32 0.7978846, %v2691_v32 }
 0xbe0   : > { %5820 = vtanh.f32 %v2693_v14 }
 0xbe9   : > { %v5819_v15 = vpop.eup %5818 }
 0xbea   : > { %v2696_v16 = vadd.f32 1.0, %v5819_v15 }
 0xbec   : > { %v2698_v23 = vmul.f32 %v2696_v16, %v2682_v20 }
 0xbed   : > { %v5821_v19 = vpop.eup %5820 }
 0xbee   : > { %v2697_v22 = vadd.f32 1.0, %v5821_v19 }
 0xbf0   : > { %v2699_v24 = vmul.f32 %v2697_v22, %v2683_v21 }
 0xbf2   : > { %v2700_v25 = vpack.c.bf16 %v2699_v24, %v2698_v23 }
 0xbf4   : > { %5202 = vmatmul.mubr.msk.bf16.vlgmr.msra.gmra.mxu1 %vm2740_vm9, %v2700_v25 }
 0xcb4   : > { %v2778_v27 = vpop.f32.mrf.mxu1 }
 0xcb5   : > { %v2779_v29 = vadd.f32 %v4954_v26, %v2778_v27 }
 0xcb6   : > { %v5203_v30 = vpop.f32.mrf.mxu1 }
 0xcb7   : > { %v2785_v31 = vadd.f32 %v2779_v29, %v7634_v58 }
 0xcb8   : > { %v2781_v17 = vpop.f32.mrf.mxu1 }
 0xcb9   : > { %2787 = vst.msk [vmem:[#allocation2] sm:$0xff] %vm1871_vm4, %v2785_v31  ;;  %v2782_v33 = vadd.f32 %v4954_v26, %v2781_v17  ;;  %2792 = sbr.rel (%p4960_p3) target bundleno = 7592 (0x1da8), region = 284 }
 0xcba   : > { %v5204_v34 = vpop.f32.mrf.mxu1 }
 0xcbb   : > { %v2786_v35 = vadd.f32 %v2782_v33, %v7639_v28 }
 0xcbd   : > { %2788 = vst.msk [vmem:[#allocation2 + $0x8] sm:$0xff] %vm1871_vm4, %v2786_v35 }
 0xcbe   : > { %v7672_v36 = vld [vmem:[#allocation17] sm:$0xff]  ;;  %v5822_v40 = vld [vmem:[%s8124_s5 + $0x8] sm:$0xff]   ;;  %v6805_v41 = vmov 0.0   ;;  %vm6806_vm10 = vmmov 0   ;;  %vm2959_vm11 = vcmask 1043456  }
 0xcbf   : > { %v2798_v37 = vsel %vm1871_vm4, %v7672_v36, 0.0  ;;  %5205 = vmatprep.subr.bf16.mxu0 %v6805_v41  ;;  %5209 = vmatprep.mubr.msk.bf16.mxu0 %vm6806_vm10, %v6805_v41  ;;  %v5823_v42 = vld [vmem:[%s8124_s5] sm:$0xff]   ;;  %v4961_v47 = vld [vmem:[#allocation18] ss:$0 sm:$0xff]  ;;  %v4962_v49 = vld [vmem:[#allocation20] ss:$0 sm:$0xff] }
 0xcc0   : > { %2799 = vadd.xlane.f32.xlu0 %v2798_v37  ;;  %5206 = vmatpush3.bf16.msra.mxu0 %v5822_v40  ;;  %v4963_v53 = vld [vmem:[#allocation21] ss:$0 sm:$0xff] }
 0xcc1   : > { %5213 = vmatprep.subr.bf16.mxu1 %v6805_v41  ;;  %5207 = vmatprep.subr.bf16.mxu0 %v6805_v41 }
 0xcc2   : > { %5215 = vmatprep.mubr.msk.bf16.mxu1 %vm6806_vm10, %v6805_v41 }
 0xcc4   : > { %5208 = vmatpush3.bf16.msra.mxu0 %v5823_v42 }
 0xcc5   : > { %5219 = vmatprep.subr.bf16.mxu0 %v6805_v41 }
 0xd49   : > { %v2800_v58 = vpop.xlane.xlu0 %2799 }
 0xd4a   : > { %v2801_v38 = vmul.f32 0.03125, %v2800_v58 }
 0xd4c   : > { %v2802_v18 = vsub.f32 %v7672_v36, %v2801_v38 }
 0xd4e   : > { %v2803_v39 = vmul.f32 %v2802_v18, %v2802_v18 }
 0xd50   : > { %v2804_v28 = vsel %vm1871_vm4, %v2803_v39, 0.0 }
 0xd51   : > { %2805 = vadd.xlane.f32.xlu0 %v2804_v28 }
 0xdda   : > { %v2806_v43 = vpop.xlane.xlu0 %2805 }
 0xddb   : > { %v2807_v44 = vmul.f32 0.03125, %v2806_v43 }
 0xddd   : > { %v2808_v45 = vadd.f32 1e-05, %v2807_v44 }
 0xddf   : > { %5840 = vrsqrt.f32 %v2808_v45 }
 0xdec   : > { %v5841_v46 = vpop.eup %5840 }
 0xded   : > { %v2810_v48 = vmul.f32 %v5841_v46, %v2802_v18 }
 0xdef   : > { %v2817_v50 = vmul.f32 %v4961_v47, %v2810_v48 }
 0xdf1   : > { %v2824_v51 = vadd.f32 %v4962_v49, %v2817_v50 }
 0xdf3   : > { %v2825_v52 = vpack.c.bf16 %v2824_v51, %v2824_v51 }
 0xdf5   : > { %5210 = vmatmul.mubr.msk.bf16.vlgmr.msra.gmra.mxu0 %vm1871_vm4, %v2825_v52 }
 0xdf6   : > { %5221 = vmatprep.mubr.msk.bf16.mxu0 %vm6806_vm10, %v6805_v41 }
 0xeb5   : > { %v2886_v54 = vpop.f32.mrf.mxu0 }
 0xeb6   : > { %v2887_v55 = vadd.f32 %v4963_v53, %v2886_v54 }
 0xeb7   : > { %v5211_v56 = vpop.f32.mrf.mxu0 }
 0xeb8   : > { %v7691_v57 = vpack.c.bf16 %v2887_v55, %v2887_v55 }
 0xeb9   : > { %v2889_v59 = vpop.f32.mrf.mxu0 }
 0xeba   : > { %3003 = vrot.lane.b32.xlu0 %v7691_v57, %s6807_s30  ;;  %2894 = vrot.lane.b32.xlu1 %v7691_v57, %s6808_s4 }
 0xebb   : > { %v5212_v60 = vpop.f32.mrf.mxu0 }
 0xebe   : > { %3005 = vrot.lane.b32.xlu1 %v7691_v57, %s6809_s18 }
 0xec2   : > { %3115 = vrot.lane.b32.xlu1 %v7691_v57, %s6810_s29 }
 0xec6   : > { %3113 = vrot.lane.b32.xlu1 %v7691_v57, %s6811_s15 }
 0xeca   : > { %3225 = vrot.lane.b32.xlu1 %v7691_v57, %s6812_s16 }
 0xece   : > { %3223 = vrot.lane.b32.xlu1 %v7691_v57, %s6813_s12 }
 0xf2c   : > { %v2895_v61 = vpop.permute.xlu1 %2894  ;;  %v3004_v2 = vpop.permute.xlu0 %3003 }
 0xf2d   : > { %v2900_v62 = vsel %vm1987_vm6, %v2895_v61, 0 }
 0xf2e   : > { %5214 = vmatpush3.bf16.xpose.msra.mxu1 %v2900_v62 }
 0xf2f   : > { %5225 = vmatprep.subr.bf16.mxu1 %v6805_v41 }
 0xf30   : > { %v3006_v63 = vpop.permute.xlu1 %3005 }
 0xf31   : > { %v3011_v0 = vsel %vm1987_vm6, %v3006_v63, 0 }
 0xf34   : > { %v3116_v1 = vpop.permute.xlu1 %3115 }
 0xf35   : > { %5216 = vmatmul.mubr.msk.bf16.vlgmr.msra.gmra.mxu1 %vm1987_vm6, %v7691_v57  ;;  %v3121_v4 = vsel %vm1987_vm6, %v3116_v1, 0 }
 0xf36   : > { %5226 = vmatpush3.bf16.xpose.msra.mxu1 %v3011_v0  ;;  %5227 = vmatprep.mubr.msk.bf16.mxu1 %vm6806_vm10, %v6805_v41 }
 0xf37   : > { %5237 = vmatprep.subr.bf16.mxu1 %v6805_v41 }
 0xf38   : > { %v3114_v3 = vpop.permute.xlu1 %3113 }
 0xf3c   : > { %v3226_v5 = vpop.permute.xlu1 %3225 }
 0xf3d   : > { %5228 = vmatmul.mubr.msk.bf16.vlgmr.msra.gmra.mxu1 %vm1987_vm6, %v3004_v2  ;;  %v3231_v6 = vsel %vm1987_vm6, %v3226_v5, 0 }
 0xf3e   : > { %5238 = vmatpush3.bf16.xpose.msra.mxu1 %v3121_v4  ;;  %5239 = vmatprep.mubr.msk.bf16.mxu1 %vm6806_vm10, %v6805_v41 }
 0xf3f   : > { %5249 = vmatprep.subr.bf16.mxu1 %v6805_v41 }
 0xf40   : > { %v3224_v7 = vpop.permute.xlu1 %3223 }
 0xf45   : > { %5240 = vmatmul.mubr.msk.bf16.vlgmr.msra.gmra.mxu1 %vm1987_vm6, %v3114_v3 }
 0xf46   : > { %5250 = vmatpush3.bf16.xpose.msra.mxu1 %v3231_v6  ;;  %5251 = vmatprep.mubr.msk.bf16.mxu1 %vm6806_vm10, %v6805_v41 }
 0xf47   : > { %5261 = vmatprep.subr.bf16.mxu1 %v6805_v41 }
 0xf4d   : > { %5252 = vmatmul.mubr.msk.bf16.vlgmr.msra.gmra.mxu1 %vm1987_vm6, %v3224_v7 }
 0xf4e   : > { %5265 = vmatprep.mubr.msk.bf16.mxu1 %vm6806_vm10, %v6805_v41 }
 0xff5   : > { %v2936_v8 = vpop.f32.mrf.mxu1 }
 0xff6   : > { %v2942_v9 = vsel %vm1987_vm6, %v2936_v8, -inf }
 0xff7   : > { %2943 = vmax.xlane.f32.xlu1 %v2942_v9  ;;  %v5217_v10 = vpop.f32.mrf.mxu1 }
 0xff9   : > { %v2939_v11 = vpop.f32.mrf.mxu1 }
 0xffb   : > { %v5218_v12 = vpop.f32.mrf.mxu1 }
 0xffd   : > { %v3047_v13 = vpop.f32.mrf.mxu1 }
 0xffe   : > { %v3053_v32 = vsel %vm1987_vm6, %v3047_v13, -inf }
 0xfff   : > { %3054 = vmax.xlane.f32.xlu0 %v3053_v32  ;;  %v5229_v14 = vpop.f32.mrf.mxu1 }
0x1001   : > { %v3050_v15 = vpop.f32.mrf.mxu1 }
0x1003   : > { %v5230_v16 = vpop.f32.mrf.mxu1 }
0x1005   : > { %v3157_v19 = vpop.f32.mrf.mxu1 }
0x1006   : > { %v3163_v20 = vsel %vm1987_vm6, %v3157_v19, -inf }
0x1007   : > { %3164 = vmax.xlane.f32.xlu1 %v3163_v20  ;;  %v5241_v21 = vpop.f32.mrf.mxu1  ;;  %v5825_v20 = vld [vmem:[%s8126_s9] sm:$0xff]  }
0x1009   : > { %v3160_v22 = vpop.f32.mrf.mxu1 }
0x100b   : > { %v5242_v23 = vpop.f32.mrf.mxu1 }
0x100d   : > { %v3267_v24 = vpop.f32.mrf.mxu1 }
0x100e   : > { %v3273_v25 = vsel %vm1987_vm6, %v3267_v24, -inf }
0x100f   : > { %3274 = vmax.xlane.f32.xlu0 %v3273_v25  ;;  %v5253_v26 = vpop.f32.mrf.mxu1 }
0x1011   : > { %v3270_v27 = vpop.f32.mrf.mxu1 }
0x1013   : > { %v5254_v29 = vpop.f32.mrf.mxu1 }
0x1080   : > { %v2944_v30 = vpop.xlane.xlu1 %2943 }
0x1081   : > { %v2945_v31 = vsub.f32 %v2936_v8, %v2944_v30 }
0x1083   : > { %v2946_v17 = vmul.f32 1.442695, %v2945_v31 }
0x1085   : > { %5842 = vpow2.f32 %v2946_v17 }
0x1088   : > { %v3055_v33 = vpop.xlane.xlu0 %3054 }
0x1089   : > { %v3056_v34 = vsub.f32 %v3047_v13, %v3055_v33 }
0x108b   : > { %v3057_v35 = vmul.f32 1.442695, %v3056_v34 }
0x108d   : > { %5844 = vpow2.f32 %v3057_v35 }
0x1090   : > { %v3165_v44 = vpop.xlane.xlu1 %3164 }
0x1091   : > { %v3166_v45 = vsub.f32 %v3157_v19, %v3165_v44  ;;  %v5824_v19 = vld [vmem:[%s8125_s11 + $0x8] sm:$0xff]  }
0x1092   : > { %v5843_v37 = vpop.eup %5842  ;;  %5262 = vmatpush3.bf16.msra.mxu1 %v5824_v19 }
0x1093   : > { %v2948_v58 = vsel %vm1987_vm6, %v5843_v37, 0.0  ;;  %v3167_v46 = vmul.f32 1.442695, %v3166_v45  ;;  %5263 = vmatprep.subr.bf16.mxu1 %v6805_v41 }
0x1094   : > { %2949 = vadd.xlane.f32.xlu1 %v2948_v58  ;;  %v4975_v58 = vld [vmem:[#allocation23] ss:$0 sm:$0xff] }
0x1096   : > { %5264 = vmatpush3.bf16.msra.mxu1 %v5825_v20 }
0x1097   : > { %5277 = vmatprep.subr.bf16.mxu1 %v6805_v41 }
0x1098   : > { %v3275_v38 = vpop.xlane.xlu0 %3274 }
0x1099   : > { %v3276_v18 = vsub.f32 %v3267_v24, %v3275_v38 }
0x109a   : > { %v5845_v39 = vpop.eup %5844 }
0x109b   : > { %v3277_v28 = vmul.f32 1.442695, %v3276_v18  ;;  %v3059_v40 = vsel %vm1987_vm6, %v5845_v39, 0.0 }
0x109c   : > { %3060 = vadd.xlane.f32.xlu0 %v3059_v40 }
0x109d   : > { %5846 = vpow2.f32 %v3277_v28 }
0x109e   : > { %5848 = vpow2.f32 %v3167_v46 }
0x10a5   : > { %2954 = vrot.lane.b32.xlu1 %v7691_v57, %s6814_s23 }
0x10aa   : > { %v5847_v42 = vpop.eup %5846 }
0x10ab   : > { %v3279_v43 = vsel %vm1987_vm6, %v5847_v42, 0.0  ;;  %v5849_v47 = vpop.eup %5848 }
0x10ac   : > { %3280 = vadd.xlane.f32.xlu0 %v3279_v43  ;;  %v3169_v48 = vsel %vm1987_vm6, %v5849_v47, 0.0 }
0x10c2   : > { %3065 = vrot.lane.b32.xlu0 %v7691_v57, %s6815_s27 }
0x10c9   : > { %3170 = vadd.xlane.f32.xlu1 %v3169_v48 }
0x10da   : > { %3175 = vrot.lane.b32.xlu1 %v7691_v57, %s6816_s25 }
0x10de   : > { %3285 = vrot.lane.b32.xlu1 %v7691_v57, %s6817_s19 }
0x111d   : > { %v2950_v49 = vpop.xlane.xlu1 %2949 }
0x111e   : > { %5850 = vrcp.f32 %v2950_v49  ;;  %v5826_v49 = vld [vmem:[#allocation29 + $0x8] sm:$0xff]  }
0x1121   : > { %v2955_v50 = vpop.permute.xlu1 %2954 }
0x1122   : > { %v2961_v51 = vsel %vm2959_vm11, %v2955_v50, 0  ;;  %v2793_v50 = vld [vmem:[#allocation2] sm:$0xff] }
0x1123   : > { %5220 = vmatpush3.bf16.msra.mxu0 %v2961_v51  ;;  %v2794_v51 = vld [vmem:[#allocation2 + $0x8] sm:$0xff] }
0x1124   : > { %5231 = vmatprep.subr.bf16.mxu0 %v6805_v41 }
0x1125   : > { %v3061_v52 = vpop.xlane.xlu0 %3060 }
0x1126   : > { %5852 = vrcp.f32 %v3061_v52  ;;  %v3512_v52 = vpack.c.bf16 %v2794_v51, %v2793_v50 }
0x112b   : > { %v5851_v53 = vpop.eup %5850 }
0x112c   : > { %v2952_v54 = vmul.f32 %v5851_v53, %v5843_v37  ;;  %v5828_v53 = vld [vmem:[%s8127_s20 + $0x8] sm:$0xff]  }
0x112e   : > { %v2953_v55 = vpack.c.bf16 %v2952_v54, %v2952_v54  ;;  %v5829_v54 = vld [vmem:[%s8127_s20] sm:$0xff]  }
0x1130   : > { %5222 = vmatmul.mubr.msk.bf16.vlgmr.msra.gmra.mxu0 %vm1987_vm6, %v2953_v55 }
0x1131   : > { %5233 = vmatprep.mubr.msk.bf16.mxu0 %vm6806_vm10, %v6805_v41 }
0x1133   : > { %v5853_v56 = vpop.eup %5852 }
0x1134   : > { %v3063_v59 = vmul.f32 %v5853_v56, %v5845_v39 }
0x1135   : > { %v3281_v57 = vpop.xlane.xlu0 %3280 }
0x1136   : > { %v3064_v62 = vpack.c.bf16 %v3063_v59, %v3063_v59 }
0x1139   : > { %v3066_v60 = vpop.permute.xlu0 %3065 }
0x113a   : > { %v3071_v61 = vsel %vm2959_vm11, %v3066_v60, 0  ;;  %v4979_v60 = vld [vmem:[#allocation24] ss:$0 sm:$0xff] }
0x113b   : > { %5232 = vmatpush3.bf16.msra.mxu0 %v3071_v61 }
0x113c   : > { %5243 = vmatprep.subr.bf16.mxu0 %v6805_v41 }
0x113e   : > { %5234 = vmatmul.mubr.msk.bf16.vlgmr.msra.gmra.mxu0 %vm1987_vm6, %v3064_v62  ;;  %v4980_v62 = vld [vmem:[#allocation26] ss:$0 sm:$0xff] }
0x113f   : > { %5245 = vmatprep.mubr.msk.bf16.mxu0 %vm6806_vm10, %v6805_v41 }
0x1152   : > { %v3171_v63 = vpop.xlane.xlu1 %3170 }
0x1153   : > { %5854 = vrcp.f32 %v3171_v63 }
0x1154   : > { %5856 = vrcp.f32 %v3281_v57 }
0x1156   : > { %v3176_v0 = vpop.permute.xlu1 %3175 }
0x1157   : > { %v3181_v1 = vsel %vm2959_vm11, %v3176_v0, 0 }
0x1158   : > { %5244 = vmatpush3.bf16.msra.mxu0 %v3181_v1 }
0x1159   : > { %5255 = vmatprep.subr.bf16.mxu0 %v6805_v41 }
0x115a   : > { %v3286_v4 = vpop.permute.xlu1 %3285 }
0x115b   : > { %v3291_v7 = vsel %vm2959_vm11, %v3286_v4, 0 }
0x1160   : > { %v5855_v2 = vpop.eup %5854 }
0x1161   : > { %v3173_v3 = vmul.f32 %v5855_v2, %v5849_v47  ;;  %v5857_v6 = vpop.eup %5856  ;;  %v4985_v2 = vld [vmem:[#allocation30] ss:$0 sm:$0xff] }
0x1162   : > { %v3283_v8 = vmul.f32 %v5857_v6, %v5847_v42 }
0x1163   : > { %v3174_v5 = vpack.c.bf16 %v3173_v3, %v3173_v3 }
0x1164   : > { %v3284_v9 = vpack.c.bf16 %v3283_v8, %v3283_v8 }
0x1165   : > { %5246 = vmatmul.mubr.msk.bf16.vlgmr.msra.gmra.mxu0 %vm1987_vm6, %v3174_v5 }
0x1166   : > { %5256 = vmatpush3.bf16.msra.mxu0 %v3291_v7  ;;  %5257 = vmatprep.mubr.msk.bf16.mxu0 %vm6806_vm10, %v6805_v41 }
0x1167   : > { %5269 = vmatprep.subr.bf16.mxu0 %v6805_v41 }
0x116d   : > { %5258 = vmatmul.mubr.msk.bf16.vlgmr.msra.gmra.mxu0 %vm1987_vm6, %v3284_v9 }
0x116e   : > { %5273 = vmatprep.mubr.msk.bf16.mxu0 %vm6806_vm10, %v6805_v41  ;;  %5270 = vmatpush3.bf16.msra.mxu0 %v5828_v53 }
0x116f   : > { %5271 = vmatprep.subr.bf16.mxu0 %v6805_v41 }
0x1172   : > { %5272 = vmatpush3.bf16.msra.mxu0 %v5829_v54 }
0x1173   : > { %5285 = vmatprep.subr.bf16.mxu0 %v6805_v41 }
0x11f0   : > { %v2997_v10 = vpop.f32.mrf.mxu0 }
0x11f2   : > { %v5223_v11 = vpop.f32.mrf.mxu0 }
0x11f3   : > { %v4981_v11 = vld [vmem:[#allocation27] ss:$0 sm:$0xff] }
0x11f4   : > { %v3000_v12 = vpop.f32.mrf.mxu0 }
0x11f6   : > { %v5224_v13 = vpop.f32.mrf.mxu0 }
0x11fe   : > { %v3107_v32 = vpop.f32.mrf.mxu0 }
0x11ff   : > { %3334 = vrot.lane.b32.xlu0 %v3107_v32, %s6818_s26 }
0x1200   : > { %v5235_v14 = vpop.f32.mrf.mxu0 }
0x1202   : > { %v3110_v15 = vpop.f32.mrf.mxu0 }
0x1204   : > { %v5236_v16 = vpop.f32.mrf.mxu0 }
0x1225   : > { %v3217_v21 = vpop.f32.mrf.mxu0 }
0x1226   : > { %3338 = vrot.lane.b32.xlu1 %v3217_v21, %s6819_s17 }
0x1227   : > { %v5247_v22 = vpop.f32.mrf.mxu0 }
0x1229   : > { %v3220_v23 = vpop.f32.mrf.mxu0 }
0x122b   : > { %v5248_v24 = vpop.f32.mrf.mxu0 }
0x122d   : > { %v3327_v25 = vpop.f32.mrf.mxu0 }
0x122e   : > { %3342 = vrot.lane.b32.xlu0 %v3327_v25, %s6820_s14 }
0x122f   : > { %v5259_v26 = vpop.f32.mrf.mxu0 }
0x1231   : > { %v3330_v27 = vpop.f32.mrf.mxu0 }
0x1233   : > { %v5260_v29 = vpop.f32.mrf.mxu0 }
0x1271   : > { %v3335_v30 = vpop.permute.xlu0 %3334 }
0x1272   : > { %v3345_v17 = vsel %vm1987_vm6, %v2997_v10, %v3335_v30 }
0x1298   : > { %v3339_v31 = vpop.permute.xlu1 %3338 }
0x1299   : > { %v3346_v33 = vsel %vm2035_vm7, %v3345_v17, %v3339_v31 }
0x12a0   : > { %v3343_v34 = vpop.permute.xlu0 %3342 }
0x12a1   : > { %v3347_v35 = vsel %vm2497_vm8, %v3346_v33, %v3343_v34 }
0x12a2   : > { %v3348_v37 = vpack.c.bf16 %v3347_v35, %v3347_v35 }
0x12a4   : > { %5266 = vmatmul.mubr.msk.bf16.vlgmr.msra.gmra.mxu1 %vm1871_vm4, %v3348_v37 }
0x12a5   : > { %5281 = vmatprep.mubr.msk.bf16.mxu1 %vm6806_vm10, %v6805_v41  ;;  %5278 = vmatpush3.bf16.msra.mxu1 %v5826_v49 }
0x12a6   : > { %5279 = vmatprep.subr.bf16.mxu1 %v6805_v41 }
0x1364   : > { %v3409_v38 = vpop.f32.mrf.mxu1 }
0x1365   : > { %v3410_v18 = vadd.f32 %v4975_v58, %v3409_v38 }
0x1366   : > { %v5267_v39 = vpop.f32.mrf.mxu1 }
0x1367   : > { %v7774_v28 = vadd.f32 %v3410_v18, %v7672_v36  ;;  %v5827_v36 = vld [vmem:[#allocation29] sm:$0xff]  }
0x1368   : > { %v3412_v40 = vpop.f32.mrf.mxu1  ;;  %5280 = vmatpush3.bf16.msra.mxu1 %v5827_v36 }
0x1369   : > { %v3418_v42 = vsel %vm1871_vm4, %v7774_v28, 0.0  ;;  %5291 = vmatprep.subr.bf16.mxu1 %v6805_v41 }
0x136a   : > { %3419 = vadd.xlane.f32.xlu1 %v3418_v42  ;;  %v5268_v43 = vpop.f32.mrf.mxu1 }
0x136b   : > { %5282 = vmatmul.mubr.msk.bf16.vlgmr.msra.gmra.mxu1 %vm1871_vm4, %v3512_v52 }
0x136c   : > { %5293 = vmatprep.mubr.msk.bf16.mxu1 %vm6806_vm10, %v6805_v41 }
0x13f3   : > { %v3420_v44 = vpop.xlane.xlu1 %3419 }
0x13f4   : > { %v3421_v45 = vmul.f32 0.03125, %v3420_v44 }
0x13f6   : > { %v3422_v46 = vsub.f32 %v7774_v28, %v3421_v45 }
0x13f8   : > { %v3423_v47 = vmul.f32 %v3422_v46, %v3422_v46 }
0x13fa   : > { %v3424_v48 = vsel %vm1871_vm4, %v3423_v47, 0.0 }
0x13fb   : > { %3425 = vadd.xlane.f32.xlu0 %v3424_v48 }
0x142b   : > { %v3573_v3 = vpop.f32.mrf.mxu1 }
0x142c   : > { %v3574_v5 = vadd.f32 %v4985_v2, %v3573_v3 }
0x142d   : > { %v5283_v4 = vpop.f32.mrf.mxu1 }
0x142f   : > { %v3576_v6 = vpop.f32.mrf.mxu1 }
0x1430   : > { %v3577_v7 = vadd.f32 %v4985_v2, %v3576_v6 }
0x1431   : > { %v5284_v8 = vpop.f32.mrf.mxu1 }
0x1432   : > { %v7792_v9 = vpack.c.bf16 %v3577_v7, %v3574_v5 }
0x1434   : > { %3690 = vrot.lane.b32.xlu0 %v7792_v9, %s6807_s30  ;;  %v3586_v10 = vsel %vm1987_vm6, %v7792_v9, 0 }
0x1484   : > { %v3426_v55 = vpop.xlane.xlu0 %3425 }
0x1485   : > { %v3427_v56 = vmul.f32 0.03125, %v3426_v55 }
0x1487   : > { %v3428_v57 = vadd.f32 1e-05, %v3427_v56 }
0x1489   : > { %5858 = vrsqrt.f32 %v3428_v57 }
0x1496   : > { %v5859_v59 = vpop.eup %5858 }
0x1497   : > { %v3430_v61 = vmul.f32 %v5859_v59, %v3422_v46 }
0x1499   : > { %v3437_v63 = vmul.f32 %v4979_v60, %v3430_v61 }
0x149b   : > { %v3444_v0 = vadd.f32 %v4980_v62, %v3437_v63 }
0x149d   : > { %v3445_v1 = vpack.c.bf16 %v3444_v0, %v3444_v0 }
0x149f   : > { %5274 = vmatmul.mubr.msk.bf16.vlgmr.msra.gmra.mxu0 %vm1871_vm4, %v3445_v1 }
0x14a0   : > { %5287 = vmatprep.mubr.msk.bf16.mxu0 %vm6806_vm10, %v6805_v41  ;;  %5286 = vmatpush3.bf16.xpose.msra.mxu0 %v3586_v10 }
0x14a1   : > { %5297 = vmatprep.subr.bf16.mxu0 %v6805_v41 }
0x14a6   : > { %v3691_v32 = vpop.permute.xlu0 %3690 }
0x14a7   : > { %v3696_v19 = vsel %vm1987_vm6, %v3691_v32, 0 }
0x155f   : > { %v3506_v12 = vpop.f32.mrf.mxu0 }
0x1560   : > { %v3507_v13 = vadd.f32 %v4981_v11, %v3506_v12 }
0x1561   : > { %v5275_v14 = vpop.f32.mrf.mxu0 }
0x1562   : > { %v3580_v15 = vpack.c.bf16 %v3507_v13, %v3507_v13 }
0x1563   : > { %v3509_v16 = vpop.f32.mrf.mxu0 }
0x1564   : > { %3688 = vrot.lane.b32.xlu1 %v3580_v15, %s6807_s30  ;;  %3796 = vrot.lane.b32.xlu0 %v3580_v15, %s6811_s15  ;;  %s8129_s30 = sld [smem:[#allocation95_spill]] }
0x1565   : > { %5288 = vmatmul.mubr.msk.bf16.vlgmr.msra.gmra.mxu0 %vm1987_vm6, %v3580_v15  ;;  %v5276_v20 = vpop.f32.mrf.mxu0 }
0x1566   : > { %5298 = vmatpush3.bf16.xpose.msra.mxu0 %v3696_v19  ;;  %5299 = vmatprep.mubr.msk.bf16.mxu0 %vm6806_vm10, %v6805_v41 }
0x1567   : > { %5309 = vmatprep.subr.bf16.mxu0 %v6805_v41 }
0x1568   : > { %3798 = vrot.lane.b32.xlu1 %v7792_v9, %s6811_s15  ;;  %3904 = vrot.lane.b32.xlu0 %v3580_v15, %s6813_s12 }
0x156c   : > { %3906 = vrot.lane.b32.xlu1 %v7792_v9, %s6813_s12 }
0x15d6   : > { %v3689_v21 = vpop.permute.xlu1 %3688  ;;  %v3797_v25 = vpop.permute.xlu0 %3796 }
0x15d7   : > { %5300 = vmatmul.mubr.msk.bf16.vlgmr.msra.gmra.mxu0 %vm1987_vm6, %v3689_v21 }
0x15d8   : > { %5311 = vmatprep.mubr.msk.bf16.mxu0 %vm6806_vm10, %v6805_v41 }
0x15da   : > { %v3799_v22 = vpop.permute.xlu1 %3798  ;;  %v3905_v27 = vpop.permute.xlu0 %3904 }
0x15db   : > { %v3804_v23 = vsel %vm1987_vm6, %v3799_v22, 0 }
0x15dc   : > { %5310 = vmatpush3.bf16.xpose.msra.mxu0 %v3804_v23 }
0x15dd   : > { %5321 = vmatprep.subr.bf16.mxu0 %v6805_v41 }
0x15de   : > { %v3907_v24 = vpop.permute.xlu1 %3906 }
0x15df   : > { %v3912_v26 = vsel %vm1987_vm6, %v3907_v24, 0 }
0x15e3   : > { %5312 = vmatmul.mubr.msk.bf16.vlgmr.msra.gmra.mxu0 %vm1987_vm6, %v3797_v25 }
0x15e4   : > { %5322 = vmatpush3.bf16.xpose.msra.mxu0 %v3912_v26  ;;  %5323 = vmatprep.mubr.msk.bf16.mxu0 %vm6806_vm10, %v6805_v41 }
0x15e5   : > { %5333 = vmatprep.subr.bf16.mxu0 %v6805_v41 }
0x15eb   : > { %5324 = vmatmul.mubr.msk.bf16.vlgmr.msra.gmra.mxu0 %vm1987_vm6, %v3905_v27 }
0x15ec   : > { %5337 = vmatprep.mubr.msk.bf16.mxu0 %vm6806_vm10, %v6805_v41 }
0x1625   : > { %v3622_v29 = vpop.f32.mrf.mxu0 }
0x1626   : > { %v3628_v30 = vsel %vm2035_vm7, %v3622_v29, -inf }
0x1627   : > { %3629 = vmax.xlane.f32.xlu1 %v3628_v30  ;;  %v5289_v31 = vpop.f32.mrf.mxu0 }
0x1629   : > { %v3625_v17 = vpop.f32.mrf.mxu0 }
0x162b   : > { %v5290_v33 = vpop.f32.mrf.mxu0 }
0x1697   : > { %v3732_v34 = vpop.f32.mrf.mxu0 }
0x1698   : > { %v3738_v35 = vsel %vm2035_vm7, %v3732_v34, -inf }
0x1699   : > { %3739 = vmax.xlane.f32.xlu0 %v3738_v35  ;;  %v5301_v37 = vpop.f32.mrf.mxu0  ;;  %v5830_v35 = vld [vmem:[#allocation32 + $0x8] sm:$0xff]  }
0x169a   : > { %5334 = vmatpush3.bf16.msra.mxu0 %v5830_v35  ;;  %v5831_v37 = vld [vmem:[#allocation32] sm:$0xff]   ;;  %v5839_v35 = vld [vmem:[%s8129_s30] sm:$0xff]  }
0x169b   : > { %v3735_v58 = vpop.f32.mrf.mxu0  ;;  %5335 = vmatprep.subr.bf16.mxu0 %v6805_v41 }
0x169d   : > { %v5302_v38 = vpop.f32.mrf.mxu0 }
0x169e   : > { %5336 = vmatpush3.bf16.msra.mxu0 %v5831_v37  ;;  %v5007_v37 = vld [vmem:[#allocation41] ss:$0 sm:$0xff] }
0x169f   : > { %5349 = vmatprep.subr.bf16.mxu0 %v6805_v41 }
0x16a3   : > { %v3840_v18 = vpop.f32.mrf.mxu0 }
0x16a4   : > { %v3846_v39 = vsel %vm2035_vm7, %v3840_v18, -inf }
0x16a5   : > { %3847 = vmax.xlane.f32.xlu0 %v3846_v39  ;;  %v5313_v40 = vpop.f32.mrf.mxu0 }
0x16a7   : > { %v3843_v42 = vpop.f32.mrf.mxu0 }
0x16a9   : > { %v5314_v43 = vpop.f32.mrf.mxu0 }
0x16ab   : > { %v3948_v44 = vpop.f32.mrf.mxu0 }
0x16ac   : > { %v3954_v45 = vsel %vm2035_vm7, %v3948_v44, -inf }
0x16ad   : > { %3955 = vmax.xlane.f32.xlu1 %v3954_v45  ;;  %v5325_v46 = vpop.f32.mrf.mxu0 }
0x16af   : > { %v3951_v47 = vpop.f32.mrf.mxu0 }
0x16b0   : > { %v3630_v48 = vpop.xlane.xlu1 %3629 }
0x16b1   : > { %v3631_v49 = vsub.f32 %v3622_v29, %v3630_v48  ;;  %v5326_v36 = vpop.f32.mrf.mxu0 }
0x16b3   : > { %v3632_v50 = vmul.f32 1.442695, %v3631_v49 }
0x16b5   : > { %5860 = vpow2.f32 %v3632_v50 }
0x16c2   : > { %v5861_v51 = vpop.eup %5860 }
0x16c3   : > { %v3634_v52 = vsel %vm2035_vm7, %v5861_v51, 0.0 }
0x16c4   : > { %3635 = vadd.xlane.f32.xlu0 %v3634_v52 }
0x1722   : > { %v3740_v53 = vpop.xlane.xlu0 %3739 }
0x1723   : > { %v3741_v54 = vsub.f32 %v3732_v34, %v3740_v53 }
0x1725   : > { %v3742_v55 = vmul.f32 1.442695, %v3741_v54 }
0x1727   : > { %5862 = vpow2.f32 %v3742_v55 }
0x172e   : > { %v3848_v56 = vpop.xlane.xlu0 %3847 }
0x172f   : > { %v3849_v57 = vsub.f32 %v3840_v18, %v3848_v56 }
0x1731   : > { %v3850_v59 = vmul.f32 1.442695, %v3849_v57 }
0x1733   : > { %5864 = vpow2.f32 %v3850_v59 }
0x1734   : > { %v5863_v60 = vpop.eup %5862 }
0x1735   : > { %v3744_v61 = vsel %vm2035_vm7, %v5863_v60, 0.0 }
0x1736   : > { %3745 = vadd.xlane.f32.xlu1 %v3744_v61  ;;  %v3956_v0 = vpop.xlane.xlu1 %3955 }
0x1737   : > { %v3957_v1 = vsub.f32 %v3948_v44, %v3956_v0 }
0x1739   : > { %v3958_v2 = vmul.f32 1.442695, %v3957_v1  ;;  %v5832_v1 = vld [vmem:[#allocation38 + $0x8] sm:$0xff]  }
0x173b   : > { %5866 = vpow2.f32 %v3958_v2  ;;  %v5833_v2 = vld [vmem:[#allocation38] sm:$0xff]  }
0x1740   : > { %v5865_v62 = vpop.eup %5864 }
0x1741   : > { %v3852_v63 = vsel %vm2035_vm7, %v5865_v62, 0.0 }
0x1742   : > { %3853 = vadd.xlane.f32.xlu0 %v3852_v63 }
0x1747   : > { %3750 = vrot.lane.b32.xlu1 %v7792_v9, %s6809_s18 }
0x1748   : > { %v5867_v3 = vpop.eup %5866 }
0x1749   : > { %v3960_v4 = vsel %vm2035_vm7, %v5867_v3, 0.0 }
0x174d   : > { %v3636_v5 = vpop.xlane.xlu0 %3635 }
0x174e   : > { %5868 = vrcp.f32 %v3636_v5 }
0x1758   : > { %3641 = vrot.lane.b32.xlu0 %v7792_v9, %s6808_s4  ;;  %s8130_s4 = sld [smem:[#allocation96_spill]] }
0x175b   : > { %v5869_v7 = vpop.eup %5868 }
0x175c   : > { %3966 = vrot.lane.b32.xlu0 %v7792_v9, %s6812_s16  ;;  %v3638_v10 = vmul.f32 %v5869_v7, %v5861_v51  ;;  %v4997_v51 = vld [vmem:[#allocation33] ss:$0 sm:$0xff] }
0x175e   : > { %v3639_v12 = vpack.c.bf16 %v3638_v10, %v3638_v10 }
0x176b   : > { %3961 = vadd.xlane.f32.xlu1 %v3960_v4 }
0x177c   : > { %3858 = vrot.lane.b32.xlu1 %v7792_v9, %s6810_s29 }
0x17bf   : > { %v3746_v6 = vpop.xlane.xlu1 %3745 }
0x17c0   : > { %5870 = vrcp.f32 %v3746_v6  ;;  %v5001_v6 = vld [vmem:[#allocation35] ss:$0 sm:$0xff] }
0x17c3   : > { %v3751_v32 = vpop.permute.xlu1 %3750 }
0x17cb   : > { %v3854_v8 = vpop.xlane.xlu0 %3853 }
0x17cc   : > { %5872 = vrcp.f32 %v3854_v8  ;;  %v5002_v8 = vld [vmem:[#allocation36] ss:$0 sm:$0xff] }
0x17cd   : > { %v5871_v13 = vpop.eup %5870 }
0x17ce   : > { %v3748_v9 = vmul.f32 %v5871_v13, %v5863_v60  ;;  %v5834_v13 = vld [vmem:[%s8128_s13 + $0x18] sm:$0xff]  }
0x17cf   : > { %v3642_v11 = vpop.permute.xlu0 %3641 }
0x17d0   : > { %5292 = vmatpush3.bf16.msra.mxu1 %v3642_v11  ;;  %v3749_v14 = vpack.c.bf16 %v3748_v9, %v3748_v9  ;;  %v5836_v9 = vld [vmem:[%s8128_s13 + $0x8] sm:$0xff]  }
0x17d1   : > { %5303 = vmatprep.subr.bf16.mxu1 %v6805_v41 }
0x17d3   : > { %5294 = vmatmul.mubr.msk.bf16.vlgmr.msra.gmra.mxu1 %vm2035_vm7, %v3639_v12  ;;  %v3967_v22 = vpop.permute.xlu0 %3966 }
0x17d4   : > { %5304 = vmatpush3.bf16.msra.mxu1 %v3751_v32  ;;  %5305 = vmatprep.mubr.msk.bf16.mxu1 %vm6806_vm10, %v6805_v41  ;;  %v5835_v32 = vld [vmem:[%s8128_s13 + $0x10] sm:$0xff]  }
0x17d5   : > { %5315 = vmatprep.subr.bf16.mxu1 %v6805_v41 }
0x17d9   : > { %v5873_v15 = vpop.eup %5872 }
0x17da   : > { %v3856_v19 = vmul.f32 %v5873_v15, %v5865_v62  ;;  %v5003_v15 = vld [vmem:[#allocation39] ss:$0 sm:$0xff] }
0x17db   : > { %5306 = vmatmul.mubr.msk.bf16.vlgmr.msra.gmra.mxu1 %vm2035_vm7, %v3749_v14  ;;  %v5837_v14 = vld [vmem:[%s8128_s13] sm:$0xff]  }
0x17dc   : > { %5317 = vmatprep.mubr.msk.bf16.mxu1 %vm6806_vm10, %v6805_v41  ;;  %v3857_v21 = vpack.c.bf16 %v3856_v19, %v3856_v19 }
0x17f4   : > { %v3962_v16 = vpop.xlane.xlu1 %3961 }
0x17f5   : > { %5874 = vrcp.f32 %v3962_v16 }
0x17f8   : > { %v3859_v20 = vpop.permute.xlu1 %3858 }
0x17f9   : > { %5316 = vmatpush3.bf16.msra.mxu1 %v3859_v20 }
0x17fa   : > { %5327 = vmatprep.subr.bf16.mxu1 %v6805_v41 }
0x17fc   : > { %5318 = vmatmul.mubr.msk.bf16.vlgmr.msra.gmra.mxu1 %vm2035_vm7, %v3857_v21 }
0x17fd   : > { %5328 = vmatpush3.bf16.msra.mxu1 %v3967_v22  ;;  %5329 = vmatprep.mubr.msk.bf16.mxu1 %vm6806_vm10, %v6805_v41 }
0x17fe   : > { %5341 = vmatprep.subr.bf16.mxu1 %v6805_v41 }
0x1802   : > { %v5875_v23 = vpop.eup %5874 }
0x1803   : > { %v3964_v24 = vmul.f32 %v5875_v23, %v5867_v3 }
0x1805   : > { %v3965_v25 = vpack.c.bf16 %v3964_v24, %v3964_v24 }
0x1807   : > { %5330 = vmatmul.mubr.msk.bf16.vlgmr.msra.gmra.mxu1 %vm2035_vm7, %v3965_v25 }
0x1808   : > { %5345 = vmatprep.mubr.msk.bf16.mxu1 %vm6806_vm10, %v6805_v41  ;;  %5342 = vmatpush3.bf16.msra.mxu1 %v5832_v1 }
0x1809   : > { %5343 = vmatprep.subr.bf16.mxu1 %v6805_v41 }
0x180c   : > { %5344 = vmatpush3.bf16.msra.mxu1 %v5833_v2 }
0x180d   : > { %5361 = vmatprep.subr.bf16.mxu1 %v6805_v41 }
0x1893   : > { %v3681_v26 = vpop.f32.mrf.mxu1 }
0x1895   : > { %v5295_v27 = vpop.f32.mrf.mxu1 }
0x1897   : > { %v3684_v29 = vpop.f32.mrf.mxu1 }
0x1899   : > { %v5296_v30 = vpop.f32.mrf.mxu1 }
0x189b   : > { %v3790_v31 = vpop.f32.mrf.mxu1 }
0x189c   : > { %4013 = vrot.lane.b32.xlu1 %v3790_v31, %s6818_s26 }
0x189d   : > { %v5307_v17 = vpop.f32.mrf.mxu1 }
0x189f   : > { %v3793_v33 = vpop.f32.mrf.mxu1 }
0x18a1   : > { %v5308_v34 = vpop.f32.mrf.mxu1 }
0x18a2   : > { %v5838_v34 = vld [vmem:[%s8129_s30 + $0x8] sm:$0xff]  }
0x18bc   : > { %v3898_v58 = vpop.f32.mrf.mxu1 }
0x18bd   : > { %4017 = vrot.lane.b32.xlu0 %v3898_v58, %s6819_s17 }
0x18be   : > { %v5319_v38 = vpop.f32.mrf.mxu1 }
0x18c0   : > { %v3901_v18 = vpop.f32.mrf.mxu1 }
0x18c2   : > { %v5320_v39 = vpop.f32.mrf.mxu1 }
0x18c7   : > { %v4006_v40 = vpop.f32.mrf.mxu1 }
0x18c8   : > { %4021 = vrot.lane.b32.xlu1 %v4006_v40, %s6820_s14 }
0x18c9   : > { %v5331_v42 = vpop.f32.mrf.mxu1 }
0x18cb   : > { %v4009_v43 = vpop.f32.mrf.mxu1 }
0x18cd   : > { %v5332_v44 = vpop.f32.mrf.mxu1 }
0x18ce   : > { %v5013_v44 = vld [vmem:[%s8130_s4] ss:$0 sm:$0xff] }
0x190e   : > { %v4014_v45 = vpop.permute.xlu1 %4013 }
0x190f   : > { %v4024_v47 = vsel %vm1987_vm6, %v3681_v26, %v4014_v45 }
0x192f   : > { %v4018_v46 = vpop.permute.xlu0 %4017 }
0x1930   : > { %v4025_v48 = vsel %vm2035_vm7, %v4024_v47, %v4018_v46 }
0x193a   : > { %v4022_v49 = vpop.permute.xlu1 %4021 }
0x193b   : > { %v4026_v36 = vsel %vm2497_vm8, %v4025_v48, %v4022_v49 }
0x193c   : > { %v4027_v50 = vpack.c.bf16 %v4026_v36, %v4026_v36 }
0x193e   : > { %5338 = vmatmul.mubr.msk.bf16.vlgmr.msra.gmra.mxu0 %vm1871_vm4, %v4027_v50 }
0x193f   : > { %5357 = vmatprep.mubr.msk.bf16.mxu0 %vm6806_vm10, %v6805_v41  ;;  %5350 = vmatpush3.bf16.msra.mxu0 %v5834_v13 }
0x1940   : > { %5351 = vmatprep.subr.bf16.mxu0 %v6805_v41 }
0x1943   : > { %5352 = vmatpush3.bf16.msra.mxu0 %v5835_v32 }
0x1944   : > { %5353 = vmatprep.subr.bf16.mxu0 %v6805_v41 }
0x1947   : > { %5354 = vmatpush3.bf16.msra.mxu0 %v5836_v9 }
0x1948   : > { %5355 = vmatprep.subr.bf16.mxu0 %v6805_v41 }
0x194b   : > { %5356 = vmatpush3.bf16.msra.mxu0 %v5837_v14 }
0x19fe   : > { %v4088_v52 = vpop.f32.mrf.mxu0 }
0x19ff   : > { %v4089_v53 = vadd.f32 %v4997_v51, %v4088_v52 }
0x1a00   : > { %v5339_v54 = vpop.f32.mrf.mxu0 }
0x1a01   : > { %v7868_v55 = vadd.f32 %v4089_v53, %v7774_v28 }
0x1a02   : > { %v4091_v56 = vpop.f32.mrf.mxu0 }
0x1a03   : > { %v4097_v57 = vsel %vm1871_vm4, %v7868_v55, 0.0 }
0x1a04   : > { %4098 = vadd.xlane.f32.xlu0 %v4097_v57  ;;  %v5340_v59 = vpop.f32.mrf.mxu0 }
0x1a8d   : > { %v4099_v60 = vpop.xlane.xlu0 %4098 }
0x1a8e   : > { %v4100_v61 = vmul.f32 0.03125, %v4099_v60 }
0x1a90   : > { %v4101_v62 = vsub.f32 %v7868_v55, %v4100_v61 }
0x1a92   : > { %v4102_v63 = vmul.f32 %v4101_v62, %v4101_v62 }
0x1a94   : > { %v4103_v0 = vsel %vm1871_vm4, %v4102_v63, 0.0 }
0x1a95   : > { %4104 = vadd.xlane.f32.xlu1 %v4103_v0 }
0x1b1e   : > { %v4105_v28 = vpop.xlane.xlu1 %4104 }
0x1b1f   : > { %v4106_v3 = vmul.f32 0.03125, %v4105_v28 }
0x1b21   : > { %v4107_v4 = vadd.f32 1e-05, %v4106_v3 }
0x1b23   : > { %5876 = vrsqrt.f32 %v4107_v4 }
0x1b30   : > { %v5877_v5 = vpop.eup %5876 }
0x1b31   : > { %v4109_v7 = vmul.f32 %v5877_v5, %v4101_v62 }
0x1b33   : > { %v4116_v10 = vmul.f32 %v5001_v6, %v4109_v7 }
0x1b35   : > { %v4123_v11 = vadd.f32 %v5002_v8, %v4116_v10 }
0x1b37   : > { %v4124_v12 = vpack.c.bf16 %v4123_v11, %v4123_v11 }
0x1b39   : > { %5346 = vmatmul.mubr.msk.bf16.vlgmr.msra.gmra.mxu1 %vm1871_vm4, %v4124_v12 }
0x1b3a   : > { %5365 = vmatprep.mubr.msk.bf16.mxu1 %vm6806_vm10, %v6805_v41  ;;  %5362 = vmatpush3.bf16.msra.mxu1 %v5838_v34 }
0x1b3b   : > { %5363 = vmatprep.subr.bf16.mxu1 %v6805_v41 }
0x1b3e   : > { %5364 = vmatpush3.bf16.msra.mxu1 %v5839_v35 }
0x1bf9   : > { %v4185_v16 = vpop.f32.mrf.mxu1 }
0x1bfa   : > { %v4186_v19 = vadd.f32 %v5003_v15, %v4185_v16 }
0x1bfb   : > { %v5347_v20 = vpop.f32.mrf.mxu1 }
0x1bfc   : > { %v4192_v21 = vmul.f32 0.044715, %v4186_v19  ;;  %v4191_v30 = vmul.f32 0.5, %v4186_v19 }
0x1bfd   : > { %v4188_v22 = vpop.f32.mrf.mxu1 }
0x1bfe   : > { %v4193_v23 = vmul.f32 %v4192_v21, %v4186_v19 }
0x1bff   : > { %v5348_v24 = vpop.f32.mrf.mxu1 }
0x1c00   : > { %v4194_v25 = vmul.f32 %v4193_v23, %v4186_v19 }
0x1c02   : > { %v4195_v26 = vadd.f32 %v4194_v25, %v4186_v19 }
0x1c04   : > { %v4196_v27 = vmul.f32 0.7978846, %v4195_v26 }
0x1c06   : > { %5878 = vtanh.f32 %v4196_v27 }
0x1c13   : > { %v5879_v29 = vpop.eup %5878 }
0x1c14   : > { %v4198_v31 = vadd.f32 1.0, %v5879_v29 }
0x1c16   : > { %v4199_v17 = vmul.f32 %v4198_v31, %v4191_v30 }
0x1c18   : > { %v4200_v33 = vpack.c.bf16 %v4199_v17, %v4199_v17 }
0x1c1a   : > { %5358 = vmatmul.mubr.msk.bf16.vlgmr.msra.gmra.mxu0 %vm2740_vm9, %v4200_v33 }
0x1cda   : > { %v4277_v58 = vpop.f32.mrf.mxu0 }
0x1cdb   : > { %v4278_v38 = vadd.f32 %v5007_v37, %v4277_v58 }
0x1cdc   : > { %v5359_v18 = vpop.f32.mrf.mxu0 }
0x1cdd   : > { %v4283_v39 = vadd.f32 %v4278_v38, %v7868_v55 }
0x1cde   : > { %v4280_v40 = vpop.f32.mrf.mxu0 }
0x1cdf   : > { %4284 = vst.msk [vmem:[%s1758_s10] sm:$0xff] %vm1871_vm4, %v4283_v39  ;;  %v4285_v42 = vpack.c.bf16 %v4283_v39, %v4283_v39 }
0x1ce0   : > { %v5360_v43 = vpop.f32.mrf.mxu0 }
0x1ce1   : > { %5366 = vmatmul.mubr.msk.bf16.vlgmr.msra.gmra.mxu1 %vm1871_vm4, %v4285_v42 }
0x1da1   : > { %v4346_v45 = vpop.f32.mrf.mxu1 }
0x1da2   : > { %v4347_v41 = vadd.f32 %v5013_v44, %v4346_v45 }
0x1da3   : > { %v5367_v46 = vpop.f32.mrf.mxu1 }
0x1da4   : > { %4352 = vst [vmem:[%s7513_s24] sm:$0xff] %v4347_v41 }
0x1da5   : > { %v4349_v47 = vpop.f32.mrf.mxu1 }
0x1da7   : > { %v5368_v48 = vpop.f32.mrf.mxu1 }
0x1da8 PF: > { %s8131_s18 = sld [smem:[#allocation101_spill]]  ;;  %s4371_s12 = sshll.u32 %s1758_s10, 4  ;;  %s4372_s12 = int_to_ptr.vmem [resolvable:$true] %s4371_s12 }
0x1da9   : > { %s8132_s29 = sld [smem:[#allocation97_spill]]  ;;  %s8133_s23 = sand.u32 1, %s6682_s28  }
0x1daa   : > { %s4354_s27 = scalar_lea.sflag [#allocation5], %s8133_s23  ;;  %s6546_s25 = scalar_lea.vmem %s4372_s12, 128 }
0x1dab   : > { %p6547_p7 = scmp.ne.s32.totalorder %s4372_s12, %s6546_s25  ;;  %p8134_p2 = scmp.ne.s32.totalorder %s8058_s21, 0 }
0x1dac   : > { %s6821_s24 = smov [#allocation42]  }
0x1dad   : > { %p6548_p0 = pnand %p6547_p7, %p8134_p2  ;;  %s6550_s19 = sshll.u32 %s6821_s24, 4  ;;  %s6551_s19 = int_to_ptr.vmem [resolvable:$false] %s6550_s19 }
0x1dae   : > { %s5018_s15 = sshll.u32 %s8131_s18, 7  ;;  %s6552_s11 = scalar_lea.vmem %s6551_s19, 256 }
0x1daf   : > { %s4369_s16 = scalar_lea.hbm %s8132_s29, %s5018_s15  ;;  %p6549_p1 = pneg %p6548_p0 }
0x1db0   : > { %p6553_p4 = scmp.lt.s32.totalorder %s4372_s12, %s6551_s19  ;;  %p6554_p11 = scmp.lt.s32.totalorder %s6552_s11, %s6546_s25 }
0x1db2   : > { %p6555_p5 = por %p6554_p11, %p6553_p4 }
0x1db4   : > { %p6556_p6 = pnand %p6555_p5, %p6549_p1 }
0x1db6   : > { %6559 = shalt.err (!%p6556_p6)
}
0x1db7   : > { %s6560_s26 = scalar_lea.hbm %s4369_s16, 128  ;;  %s6564_s10 = scalar_lea.hbm %s8132_s29, 256 }
0x1db8   : > { %p6561_p8 = scmp.ne.s32.totalorder %s4369_s16, %s6560_s26  ;;  %p6565_p10 = scmp.lt.s32.totalorder %s4369_s16, %s8132_s29 }
0x1db9   : > { %p6566_p12 = scmp.lt.s32.totalorder %s6564_s10, %s6560_s26 }
0x1dba   : > { %p6562_p13 = pnand %p6561_p8, %p8134_p2 }
0x1dbb   : > { %p6567_p3 = por %p6566_p12, %p6565_p10 }
0x1dbc   : > { %p6563_p9 = pneg %p6562_p13 }
0x1dbe   : > { %p6568_p7 = pnand %p6567_p3, %p6563_p9 }
0x1dc0   : > { %6571 = shalt.err (!%p6568_p7)
}
0x1dc1   : > { %5453 = dma.vmem_to_hbm [thread:$0]  (%p8134_p2), %s4372_s12, 128, %s4369_s16, %s4354_s27  }
0x1dc2 PF: > { %p5571_p0 = scmp.ge.s32.totalorder %s6718_s22, 2  ;;  %s4386_s3 = sand.u32 1, %s6678_s0  }
0x1dc3   : > { %p8135_p1 = scmp.ne.s32.totalorder %s8059_s6, 0  ;;  %s4387_s17 = scalar_lea.sflag [#allocation5], %s4386_s3 }
0x1dc5   : > { %p5533_p4 = pnand %p5571_p0, %p8135_p1 }
0x1dc7   : > { %p5534_p11 = pneg %p5533_p4 }
0x1dc9   : > { %6673 = dma.done.wait (%p5534_p11), %s4387_s17, 128  }
0x1dca   : > { %6675 = vsyncadd (%p5534_p11), %s4387_s17, 4294967168  ;;  %s118_s22 = sadd.s32 1, %s6718_s22   ;;  %s8136_s21 = sld [smem:[#allocation99_spill]] }
0x1dcb   : > { %p115_p5 = scmp.ge.s32.totalorder %s118_s22, 6   ;;  %s8137_s10 = sld [smem:[#allocation106_spill]] }
0x1dcc   : > { %s8138_s11 = sld [smem:[#allocation102_spill]]  ;;  %s8142_s0 = smov %s6682_s28 }
0x1dcd   : > { %s8139_s15 = sld [smem:[#allocation103_spill]]  ;;  %s8143_s28 = smov %s6686_s1 }
0x1dce   : > { %s8140_s16 = sld [smem:[#allocation104_spill]]  ;;  %s8144_s1 = smov %s7202_s2 }
0x1dcf   : > { %s8141_s18 = sld [smem:[#allocation105_spill]]  ;;  %s8145_s2 = smov %s6694_s7 }
0x1dd0   : > { %s8146_s7 = smov %s8136_s21  ;;  %117 = sbr.rel (!%p115_p5) target bundleno = 110 (0x6e), region = 449 }
0x1dd5   :  { %4399 = vsyncpa [#allocation4], 1 }
0x1dd6   :  { %4401 = vsyncpa [#allocation4 + $0x1], 1 }
0x1dd7   :  { %4402 = vsyncpa [#allocation7], 1 }
0x1dd8   :  { %4404 = vsyncpa [#allocation7 + $0x1], 1 }
0x1dd9   :  { %4405 = vsyncpa [#allocation10], 1 }
0x1dda   :  { %4407 = vsyncpa [#allocation10 + $0x1], 1 }
0x1ddb   :  { %4408 = vsyncpa [#allocation13], 1 }
0x1ddc   :  { %4410 = vsyncpa [#allocation13 + $0x1], 1 }
0x1ddd   :  { %4411 = vsyncpa [#allocation16], 1 }
0x1dde   :  { %4413 = vsyncpa [#allocation16 + $0x1], 1 }
0x1ddf   :  { %4414 = vsyncpa [#allocation19], 1 }
0x1de0   :  { %4415 = vsyncpa [#allocation22], 1 }
0x1de1   :  { %4416 = vsyncpa [#allocation25], 1 }
0x1de2   :  { %4417 = vsyncpa [#allocation28], 1 }
0x1de3   :  { %4418 = vsyncpa [#allocation31], 1 }
0x1de4   :  { %4419 = vsyncpa [#allocation34], 1 }
0x1de5   :  { %4420 = vsyncpa [#allocation37], 1 }
0x1de6   :  { %4421 = vsyncpa [#allocation40], 1 }
0x1de7   :  { %4422 = vsyncpa [#allocation5], 1 }
0x1de8   :  { %4424 = vsyncpa [#allocation5 + $0x1], 1 }

</bundles_post_ra>
